<compile_context>
chip_gen: v7x
topology: tpu7x:2x2x1
jax: 0.10.0
libtpu: 0.0.40
codegen_flags: <defaults>
</compile_context>

<pallas_src>
import math

import jax
import jax.numpy as jnp
from jax.experimental import pallas as pl
from jax.experimental.pallas import tpu as pltpu

NHEAD = 4  # attention heads (d_model must be divisible by NHEAD)


def _build_decoder_kernel(B, T, S, D, F, H, L, with_final_norm):
    assert D % H == 0
    Dh = D // H
    scale = 1.0 / math.sqrt(Dh)
    eps = 1e-5
    f32 = jnp.float32
    bf16 = jnp.bfloat16

    def layernorm(x, w, b):  # x: [N, D] f32, w/b: [1, D] f32
        mu = jnp.mean(x, axis=-1, keepdims=True)
        xc = x - mu
        var = jnp.mean(xc * xc, axis=-1, keepdims=True)
        return xc * jax.lax.rsqrt(var + eps) * w + b

    def proj(x, w, b):
        # x: [N, Din] (f32 or already bf16); w: bf16 [Din, Dout] pre-transposed;
        # b: f32 [1, Dout].  astype is a no-op when x is already bf16.
        return jnp.dot(x.astype(bf16), w, preferred_element_type=f32) + b

    def attend(q, k, v, Lk, w_out, b_out):
        # q: [B*T, D]; k, v: [B*Lk, D] (f32).  Returns [B*T, D] f32.
        # Cast whole tensors to bf16 ONCE, then slice per head.
        q3 = (q * scale).reshape(B, T, D).astype(bf16)
        k3 = k.reshape(B, Lk, D).astype(bf16)
        v3 = v.reshape(B, Lk, D).astype(bf16)
        heads = []
        # TODO(synk): single multi-batch einsum over (B, H) once supported.
        for h in range(H):
            sl = slice(h * Dh, (h + 1) * Dh)
            s = jnp.einsum('bqd,bkd->bqk', q3[:, :, sl], k3[:, :, sl],
                           preferred_element_type=f32)
            s = s - jnp.max(s, axis=-1, keepdims=True)
            p = jnp.exp(s)
            p = p * pl.reciprocal(jnp.sum(p, axis=-1, keepdims=True), approx=True)
            heads.append(jnp.einsum('bqk,bkd->bqd', p.astype(bf16), v3[:, :, sl],
                                    preferred_element_type=f32))
        attn = jnp.concatenate(heads, axis=-1).reshape(B * T, D)
        return jnp.dot(attn.astype(bf16), w_out, preferred_element_type=f32) + b_out

    def kernel(tgt_ref, mem1_ref, mem2_ref, qpos_ref, pos_ref,
               sa_wi_ref, sa_bi_ref, sa_wo_ref, sa_bo_ref,
               c1_wi_ref, c1_bi_ref, c1_wo_ref, c1_bo_ref,
               c2_wi_ref, c2_bi_ref, c2_wo_ref, c2_bo_ref,
               w1_ref, b1_ref, w2_ref, b2_ref,
               nw_ref, nb_ref, fnw_ref, fnb_ref,
               out_ref,
               m1k_ref, m2k_ref):
        layer = pl.program_id(0)

        # Layer 0: initialize the VMEM-resident carry (output block) from tgt,
        # and precompute (memory + pos) in bf16 into persistent VMEM scratch so
        # later layers skip the add + cast entirely.
        @pl.when(layer == 0)
        def _():
            out_ref[...] = tgt_ref[...]
            pos0 = pos_ref[...].astype(f32)
            m1k_ref[...] = (mem1_ref[...].astype(f32) + pos0).astype(bf16)
            m2k_ref[...] = (mem2_ref[...].astype(f32) + pos0).astype(bf16)

        x = out_ref[...].astype(f32)          # [B*T, D] residual stream carry
        mem1 = mem1_ref[...].astype(f32)      # [B*S, D] (V input, layer-invariant)
        mem2 = mem2_ref[...].astype(f32)
        qpos = qpos_ref[...].astype(f32)      # [B*T, D]

        nw = nw_ref[0]                        # [4, D]  per-layer LN weights
        nb = nb_ref[0]

        # ---- self-attention (fused Q/K projection: q_in == k_in == x + qpos) ----
        sa_wi = sa_wi_ref[0]                  # [D, 3D] bf16
        sa_bi = sa_bi_ref[0]                  # [1, 3D] f32
        qk_in = x + qpos
        qk = jnp.dot(qk_in.astype(bf16), sa_wi[:, :2 * D],
                     preferred_element_type=f32) + sa_bi[:, :2 * D]
        v = jnp.dot(x.astype(bf16), sa_wi[:, 2 * D:],
                    preferred_element_type=f32) + sa_bi[:, 2 * D:]
        t2 = attend(qk[:, :D], qk[:, D:], v, T, sa_wo_ref[0], sa_bo_ref[0])
        x = layernorm(x + t2, nw[0:1, :], nb[0:1, :])

        # ---- cross-attention over memory_1 ----
        c1_wi = c1_wi_ref[0]
        c1_bi = c1_bi_ref[0]
        q = proj(x + qpos, c1_wi[:, :D], c1_bi[:, :D])
        k = proj(m1k_ref[...], c1_wi[:, D:2 * D], c1_bi[:, D:2 * D])
        vv = proj(mem1, c1_wi[:, 2 * D:], c1_bi[:, 2 * D:])
        t2 = attend(q, k, vv, S, c1_wo_ref[0], c1_bo_ref[0])
        x = layernorm(x + t2, nw[1:2, :], nb[1:2, :])

        # ---- cross-attention over memory_2 ----
        c2_wi = c2_wi_ref[0]
        c2_bi = c2_bi_ref[0]
        q = proj(x + qpos, c2_wi[:, :D], c2_bi[:, :D])
        k = proj(m2k_ref[...], c2_wi[:, D:2 * D], c2_bi[:, D:2 * D])
        vv = proj(mem2, c2_wi[:, 2 * D:], c2_bi[:, 2 * D:])
        t2 = attend(q, k, vv, S, c2_wo_ref[0], c2_bo_ref[0])
        x = layernorm(x + t2, nw[2:3, :], nb[2:3, :])

        # ---- feed-forward (relu) ----
        hid = jnp.maximum(proj(x, w1_ref[0], b1_ref[0]), 0.0)
        t2 = proj(hid, w2_ref[0], b2_ref[0])
        x = layernorm(x + t2, nw[3:4, :], nb[3:4, :])

        out_ref[...] = x.astype(out_ref.dtype)

        if with_final_norm:
            # Fused final LayerNorm on the last layer (no separate pallas_call).
            @pl.when(layer == L - 1)
            def _():
                y = layernorm(x, fnw_ref[...], fnb_ref[...])
                out_ref[...] = y.astype(out_ref.dtype)

    return kernel


def transformer_multiple_encoder_decoder(tgt, memory_1, memory_2, params,
                                         pos=None, query_pos=None):
    """Mirrors TransformerMultipleEncoderDecoder.forward (return_intermediate=False).

    tgt: [T, B, D]; memory_*: [S, B, D]; pos: [S, B, D]; query_pos: [T, B, D].
    Returns [1, T, B, D] (matching `output.unsqueeze(0)`).
    """
    T, B, D = tgt.shape
    S = memory_1.shape[0]
    L = params['sa_wi'].shape[0]
    F = params['w1'].shape[2]
    H = NHEAD

    def to_2d(a):  # [seq, B, D] -> [B*seq, D] (batch-major rows)
        return jnp.transpose(a, (1, 0, 2)).reshape(B * a.shape[0], D)

    x2 = to_2d(tgt)
    m1 = to_2d(memory_1)
    m2 = to_2d(memory_2)
    qp = jnp.zeros_like(x2) if query_pos is None else to_2d(query_pos)
    ps = jnp.zeros_like(m1) if pos is None else to_2d(pos)

    with_final_norm = params.get('norm') is not None
    if with_final_norm:
        fnw, fnb = params['norm']['w'], params['norm']['b']
    else:  # dummies (unused inside the kernel when the flag is False)
        fnw = jnp.ones((1, D), jnp.float32)
        fnb = jnp.zeros((1, D), jnp.float32)

    kernel = _build_decoder_kernel(B, T, S, D, F, H, L, with_final_norm)

    def act_spec(n_rows):  # layer-invariant activation, stays VMEM-resident
        return pl.BlockSpec((n_rows, D), lambda l: (0, 0))

    def layer_spec(shape):  # stacked-per-layer parameter: pick layer l's slab
        nd = len(shape)
        return pl.BlockSpec((1,) + tuple(shape[1:]),
                            lambda l, _nd=nd: (l,) + (0,) * (_nd - 1))

    def const_spec(shape):
        nd = len(shape)
        return pl.BlockSpec(tuple(shape), lambda l, _nd=nd: (0,) * _nd)

    weight_names = ['sa_wi', 'sa_bi', 'sa_wo', 'sa_bo',
                    'c1_wi', 'c1_bi', 'c1_wo', 'c1_bo',
                    'c2_wi', 'c2_bi', 'c2_wo', 'c2_bo',
                    'w1', 'b1', 'w2', 'b2',
                    'norm_w', 'norm_b']
    weights = [params[n] for n in weight_names]

    in_specs = ([act_spec(B * T), act_spec(B * S), act_spec(B * S),
                 act_spec(B * T), act_spec(B * S)]
                + [layer_spec(w.shape) for w in weights]
                + [const_spec(fnw.shape), const_spec(fnb.shape)])

    out2 = pl.pallas_call(
        kernel,
        out_shape=jax.ShapeDtypeStruct((B * T, D), tgt.dtype),
        grid=(L,),
        in_specs=in_specs,
        out_specs=pl.BlockSpec((B * T, D), lambda l: (0, 0)),
        scratch_shapes=[pltpu.VMEM((B * S, D), jnp.bfloat16),   # memory_1 + pos (bf16)
                        pltpu.VMEM((B * S, D), jnp.bfloat16)],  # memory_2 + pos (bf16)
        compiler_params=pltpu.CompilerParams(
            dimension_semantics=("arbitrary",)),  # layer axis is sequential (carry)
    )(x2, m1, m2, qp, ps, *weights, fnw, fnb)

    out = jnp.transpose(out2.reshape(B, T, D), (1, 0, 2))  # back to [T, B, D]
    return out[None]                                       # -> [1, T, B, D]


def init_params(key, D, F, num_layers, with_norm=True):
    keys = jax.random.split(key, 8)

    def xavier_t(k, out_dim, in_dim):
        limit = math.sqrt(6.0 / (in_dim + out_dim))
        w = jax.random.uniform(k, (out_dim, in_dim), jnp.float32, -limit, limit)
        # Stored pre-transposed ([in, out]) and in bf16: no in-kernel transposes,
        # bf16 MXU operands, half the weight HBM->VMEM traffic.
        return jnp.transpose(w).astype(jnp.bfloat16)

    layer = {
        'sa_wi': xavier_t(keys[0], 3 * D, D), 'sa_bi': jnp.zeros((1, 3 * D), jnp.float32),
        'sa_wo': xavier_t(keys[1], D, D),     'sa_bo': jnp.zeros((1, D), jnp.float32),
        'c1_wi': xavier_t(keys[2], 3 * D, D), 'c1_bi': jnp.zeros((1, 3 * D), jnp.float32),
        'c1_wo': xavier_t(keys[3], D, D),     'c1_bo': jnp.zeros((1, D), jnp.float32),
        'c2_wi': xavier_t(keys[4], 3 * D, D), 'c2_bi': jnp.zeros((1, 3 * D), jnp.float32),
        'c2_wo': xavier_t(keys[5], D, D),     'c2_bo': jnp.zeros((1, D), jnp.float32),
        'w1': xavier_t(keys[6], F, D), 'b1': jnp.zeros((1, F), jnp.float32),
        'w2': xavier_t(keys[7], D, F), 'b2': jnp.zeros((1, D), jnp.float32),
        'norm_w': jnp.ones((4, D), jnp.float32), 'norm_b': jnp.zeros((4, D), jnp.float32),
    }
    # _get_clones uses copy.deepcopy -> identical layers; stack along a leading
    # layer axis so one fused pallas_call walks all layers with grid=(num_layers,).
    params = {k: jnp.stack([v] * num_layers, axis=0) for k, v in layer.items()}
    if with_norm:
        params['norm'] = {'w': jnp.ones((1, D), jnp.float32),
                          'b': jnp.zeros((1, D), jnp.float32)}
    else:
        params['norm'] = None
    return params


if __name__ == "__main__":
    T, S, B, D, F, NUM_LAYERS = 8, 16, 2, 32, 64, 2

    key = jax.random.PRNGKey(0)
    k1, k2, k3, k4, k5, kp = jax.random.split(key, 6)
    tgt = jax.random.normal(k1, (T, B, D), jnp.float32)
    memory_1 = jax.random.normal(k2, (S, B, D), jnp.float32)
    memory_2 = jax.random.normal(k3, (S, B, D), jnp.float32)
    pos = jax.random.normal(k4, (S, B, D), jnp.float32)
    query_pos = jax.random.normal(k5, (T, B, D), jnp.float32)

    params = init_params(kp, D, F, NUM_LAYERS, with_norm=True)

    out = transformer_multiple_encoder_decoder(
        tgt, memory_1, memory_2, params, pos=pos, query_pos=query_pos)
    jax.block_until_ready(out)

    assert out.shape == (1, T, B, D), out.shape
    assert bool(jnp.all(jnp.isfinite(out)))
    print("KERNEL_OK")
</pallas_src>

<mosaic_0001>
module attributes {stable_mosaic.version = 11 : i64} {
  func.func @kernel(%arg0: i32, %arg1: memref<16x32xf32, #tpu.memory_space<vmem>>, %arg2: memref<32x32xf32, #tpu.memory_space<vmem>>, %arg3: memref<32x32xf32, #tpu.memory_space<vmem>>, %arg4: memref<16x32xf32, #tpu.memory_space<vmem>>, %arg5: memref<32x32xf32, #tpu.memory_space<vmem>>, %arg6: memref<1x32x96xbf16, #tpu.memory_space<vmem>>, %arg7: memref<1x1x96xf32, #tpu.memory_space<vmem>>, %arg8: memref<1x32x32xbf16, #tpu.memory_space<vmem>>, %arg9: memref<1x1x32xf32, #tpu.memory_space<vmem>>, %arg10: memref<1x32x96xbf16, #tpu.memory_space<vmem>>, %arg11: memref<1x1x96xf32, #tpu.memory_space<vmem>>, %arg12: memref<1x32x32xbf16, #tpu.memory_space<vmem>>, %arg13: memref<1x1x32xf32, #tpu.memory_space<vmem>>, %arg14: memref<1x32x96xbf16, #tpu.memory_space<vmem>>, %arg15: memref<1x1x96xf32, #tpu.memory_space<vmem>>, %arg16: memref<1x32x32xbf16, #tpu.memory_space<vmem>>, %arg17: memref<1x1x32xf32, #tpu.memory_space<vmem>>, %arg18: memref<1x32x64xbf16, #tpu.memory_space<vmem>>, %arg19: memref<1x1x64xf32, #tpu.memory_space<vmem>>, %arg20: memref<1x64x32xbf16, #tpu.memory_space<vmem>>, %arg21: memref<1x1x32xf32, #tpu.memory_space<vmem>>, %arg22: memref<1x4x32xf32, #tpu.memory_space<vmem>>, %arg23: memref<1x4x32xf32, #tpu.memory_space<vmem>>, %arg24: memref<1x32xf32, #tpu.memory_space<vmem>>, %arg25: memref<1x32xf32, #tpu.memory_space<vmem>>, %arg26: memref<16x32xf32, #tpu.memory_space<vmem>>, %arg27: memref<32x32xbf16, #tpu.memory_space<vmem>>, %arg28: memref<32x32xbf16, #tpu.memory_space<vmem>>) attributes {dimension_semantics = [#tpu.dimension_semantics<arbitrary>], iteration_bounds = array<i64: 2>, scalar_prefetch = 0 : i64, scratch_operands = 2 : i64, tpu.core_type = #tpu.core_type<tc>, window_params = [{pipeline_mode = #tpu.pipeline_mode<synchronous>, transform_indices = @transform_0, window_bounds = array<i64: 16, 32>}, {pipeline_mode = #tpu.pipeline_mode<synchronous>, transform_indices = @transform_1, window_bounds = array<i64: 32, 32>}, {pipeline_mode = #tpu.pipeline_mode<synchronous>, transform_indices = @transform_2, window_bounds = array<i64: 32, 32>}, {pipeline_mode = #tpu.pipeline_mode<synchronous>, transform_indices = @transform_3, window_bounds = array<i64: 16, 32>}, {pipeline_mode = #tpu.pipeline_mode<synchronous>, transform_indices = @transform_4, window_bounds = array<i64: 32, 32>}, {transform_indices = @transform_5, window_bounds = array<i64: 1, 32, 96>}, {transform_indices = @transform_6, window_bounds = array<i64: 1, 1, 96>}, {transform_indices = @transform_7, window_bounds = array<i64: 1, 32, 32>}, {transform_indices = @transform_8, window_bounds = array<i64: 1, 1, 32>}, {transform_indices = @transform_9, window_bounds = array<i64: 1, 32, 96>}, {transform_indices = @transform_10, window_bounds = array<i64: 1, 1, 96>}, {transform_indices = @transform_11, window_bounds = array<i64: 1, 32, 32>}, {transform_indices = @transform_12, window_bounds = array<i64: 1, 1, 32>}, {transform_indices = @transform_13, window_bounds = array<i64: 1, 32, 96>}, {transform_indices = @transform_14, window_bounds = array<i64: 1, 1, 96>}, {transform_indices = @transform_15, window_bounds = array<i64: 1, 32, 32>}, {transform_indices = @transform_16, window_bounds = array<i64: 1, 1, 32>}, {transform_indices = @transform_17, window_bounds = array<i64: 1, 32, 64>}, {transform_indices = @transform_18, window_bounds = array<i64: 1, 1, 64>}, {transform_indices = @transform_19, window_bounds = array<i64: 1, 64, 32>}, {transform_indices = @transform_20, window_bounds = array<i64: 1, 1, 32>}, {transform_indices = @transform_21, window_bounds = array<i64: 1, 4, 32>}, {transform_indices = @transform_22, window_bounds = array<i64: 1, 4, 32>}, {pipeline_mode = #tpu.pipeline_mode<synchronous>, transform_indices = @transform_23, window_bounds = array<i64: 1, 32>}, {pipeline_mode = #tpu.pipeline_mode<synchronous>, transform_indices = @transform_24, window_bounds = array<i64: 1, 32>}, {pipeline_mode = #tpu.pipeline_mode<synchronous>, transform_indices = @transform_25, window_bounds = array<i64: 16, 32>}]} {
    %c0_i32 = arith.constant 0 : i32
    %0 = arith.cmpi eq, %arg0, %c0_i32 : i32
    %1 = arith.extui %0 : i1 to i32
    %c0_i32_0 = arith.constant 0 : i32
    %2 = arith.cmpi ne, %1, %c0_i32_0 : i32
    scf.if %2 {
      %c0_153 = arith.constant 0 : index
      %c0_154 = arith.constant 0 : index
      %436 = vector.load %arg1[%c0_153, %c0_154] : memref<16x32xf32, #tpu.memory_space<vmem>>, vector<16x32xf32>
      %c0_155 = arith.constant 0 : index
      %c0_156 = arith.constant 0 : index
      %437 = vector.load %arg26[%c0_155, %c0_156] : memref<16x32xf32, #tpu.memory_space<vmem>>, vector<16x32xf32>
      tpu.vector_store %arg26[%c0_155, %c0_156], %436 {strides = array<i32>} : memref<16x32xf32, #tpu.memory_space<vmem>>, vector<16x32xf32>,
      %c0_157 = arith.constant 0 : index
      %c0_158 = arith.constant 0 : index
      %438 = vector.load %arg5[%c0_157, %c0_158] : memref<32x32xf32, #tpu.memory_space<vmem>>, vector<32x32xf32>
      %c0_159 = arith.constant 0 : index
      %c0_160 = arith.constant 0 : index
      %439 = vector.load %arg2[%c0_159, %c0_160] : memref<32x32xf32, #tpu.memory_space<vmem>>, vector<32x32xf32>
      %440 = arith.addf %439, %438 : vector<32x32xf32>
      %441 = arith.truncf %440 : vector<32x32xf32> to vector<32x32xbf16>
      %c0_161 = arith.constant 0 : index
      %c0_162 = arith.constant 0 : index
      %442 = vector.load %arg27[%c0_161, %c0_162] : memref<32x32xbf16, #tpu.memory_space<vmem>>, vector<32x32xbf16>
      tpu.vector_store %arg27[%c0_161, %c0_162], %441 {strides = array<i32>} : memref<32x32xbf16, #tpu.memory_space<vmem>>, vector<32x32xbf16>,
      %c0_163 = arith.constant 0 : index
      %c0_164 = arith.constant 0 : index
      %443 = vector.load %arg3[%c0_163, %c0_164] : memref<32x32xf32, #tpu.memory_space<vmem>>, vector<32x32xf32>
      %444 = arith.addf %443, %438 : vector<32x32xf32>
      %445 = arith.truncf %444 : vector<32x32xf32> to vector<32x32xbf16>
      %c0_165 = arith.constant 0 : index
      %c0_166 = arith.constant 0 : index
      %446 = vector.load %arg28[%c0_165, %c0_166] : memref<32x32xbf16, #tpu.memory_space<vmem>>, vector<32x32xbf16>
      tpu.vector_store %arg28[%c0_165, %c0_166], %445 {strides = array<i32>} : memref<32x32xbf16, #tpu.memory_space<vmem>>, vector<32x32xbf16>,
    } else {
    }
    %c0 = arith.constant 0 : index
    %c0_1 = arith.constant 0 : index
    %3 = vector.load %arg26[%c0, %c0_1] : memref<16x32xf32, #tpu.memory_space<vmem>>, vector<16x32xf32>
    %c0_2 = arith.constant 0 : index
    %c0_3 = arith.constant 0 : index
    %4 = vector.load %arg2[%c0_2, %c0_3] : memref<32x32xf32, #tpu.memory_space<vmem>>, vector<32x32xf32>
    %c0_4 = arith.constant 0 : index
    %c0_5 = arith.constant 0 : index
    %5 = vector.load %arg3[%c0_4, %c0_5] : memref<32x32xf32, #tpu.memory_space<vmem>>, vector<32x32xf32>
    %c0_6 = arith.constant 0 : index
    %c0_7 = arith.constant 0 : index
    %6 = vector.load %arg4[%c0_6, %c0_7] : memref<16x32xf32, #tpu.memory_space<vmem>>, vector<16x32xf32>
    %c0_8 = arith.constant 0 : index
    %c0_9 = arith.constant 0 : index
    %c0_10 = arith.constant 0 : index
    %7 = vector.load %arg22[%c0_8, %c0_9, %c0_10] : memref<1x4x32xf32, #tpu.memory_space<vmem>>, vector<1x4x32xf32>
    %8 = vector.shape_cast %7 : vector<1x4x32xf32> to vector<4x32xf32>
    %c0_11 = arith.constant 0 : index
    %c0_12 = arith.constant 0 : index
    %c0_13 = arith.constant 0 : index
    %9 = vector.load %arg23[%c0_11, %c0_12, %c0_13] : memref<1x4x32xf32, #tpu.memory_space<vmem>>, vector<1x4x32xf32>
    %10 = vector.shape_cast %9 : vector<1x4x32xf32> to vector<4x32xf32>
    %c0_14 = arith.constant 0 : index
    %c0_15 = arith.constant 0 : index
    %c0_16 = arith.constant 0 : index
    %11 = vector.load %arg6[%c0_14, %c0_15, %c0_16] : memref<1x32x96xbf16, #tpu.memory_space<vmem>>, vector<1x32x96xbf16>
    %12 = vector.shape_cast %11 : vector<1x32x96xbf16> to vector<32x96xbf16>
    %c0_17 = arith.constant 0 : index
    %c0_18 = arith.constant 0 : index
    %c0_19 = arith.constant 0 : index
    %13 = vector.load %arg7[%c0_17, %c0_18, %c0_19] : memref<1x1x96xf32, #tpu.memory_space<vmem>>, vector<1x1x96xf32>
    %14 = vector.shape_cast %13 : vector<1x1x96xf32> to vector<1x96xf32>
    %15 = arith.addf %3, %6 : vector<16x32xf32>
    %16 = arith.truncf %15 : vector<16x32xf32> to vector<16x32xbf16>
    %17 = vector.extract_strided_slice %12 {offsets = [0, 0], sizes = [32, 64], strides = [1, 1]} : vector<32x96xbf16> to vector<32x64xbf16>
    %cst = arith.constant dense<0.000000e+00> : vector<16x64xf32>
    %18 = tpu.matmul %16, %17, %cst {dimension_numbers = #tpu.dot_dimension_numbers<[1], [0], [0], [1], [0, 0, 1, 1], [], []>} : vector<16x32xbf16>, vector<32x64xbf16>, vector<16x64xf32> -> vector<16x64xf32>
    %19 = vector.extract_strided_slice %14 {offsets = [0, 0], sizes = [1, 64], strides = [1, 1]} : vector<1x96xf32> to vector<1x64xf32>
    %20 = vector.broadcast %19 : vector<1x64xf32> to vector<16x64xf32>
    %21 = arith.addf %18, %20 : vector<16x64xf32>
    %22 = arith.truncf %3 : vector<16x32xf32> to vector<16x32xbf16>
    %23 = vector.extract_strided_slice %12 {offsets = [0, 64], sizes = [32, 32], strides = [1, 1]} : vector<32x96xbf16> to vector<32x32xbf16>
    %cst_20 = arith.constant dense<0.000000e+00> : vector<16x32xf32>
    %24 = tpu.matmul %22, %23, %cst_20 {dimension_numbers = #tpu.dot_dimension_numbers<[1], [0], [0], [1], [0, 0, 1, 1], [], []>} : vector<16x32xbf16>, vector<32x32xbf16>, vector<16x32xf32> -> vector<16x32xf32>
    %25 = vector.extract_strided_slice %14 {offsets = [0, 64], sizes = [1, 32], strides = [1, 1]} : vector<1x96xf32> to vector<1x32xf32>
    %26 = vector.broadcast %25 : vector<1x32xf32> to vector<16x32xf32>
    %27 = arith.addf %24, %26 : vector<16x32xf32>
    %28 = vector.extract_strided_slice %21 {offsets = [0, 0], sizes = [16, 32], strides = [1, 1]} : vector<16x64xf32> to vector<16x32xf32>
    %29 = vector.extract_strided_slice %21 {offsets = [0, 32], sizes = [16, 32], strides = [1, 1]} : vector<16x64xf32> to vector<16x32xf32>
    %c0_21 = arith.constant 0 : index
    %c0_22 = arith.constant 0 : index
    %c0_23 = arith.constant 0 : index
    %30 = vector.load %arg8[%c0_21, %c0_22, %c0_23] : memref<1x32x32xbf16, #tpu.memory_space<vmem>>, vector<1x32x32xbf16>
    %31 = vector.shape_cast %30 : vector<1x32x32xbf16> to vector<32x32xbf16>
    %c0_24 = arith.constant 0 : index
    %c0_25 = arith.constant 0 : index
    %c0_26 = arith.constant 0 : index
    %32 = vector.load %arg9[%c0_24, %c0_25, %c0_26] : memref<1x1x32xf32, #tpu.memory_space<vmem>>, vector<1x1x32xf32>
    %33 = vector.shape_cast %32 : vector<1x1x32xf32> to vector<1x32xf32>
    %cst_27 = arith.constant 0.353553385 : f32
    %34 = vector.broadcast %cst_27 : f32 to vector<16x32xf32>
    %35 = arith.mulf %28, %34 : vector<16x32xf32>
    %36 = vector.shape_cast %35 : vector<16x32xf32> to vector<2x8x32xf32>
    %37 = arith.truncf %36 : vector<2x8x32xf32> to vector<2x8x32xbf16>
    %38 = vector.shape_cast %29 : vector<16x32xf32> to vector<2x8x32xf32>
    %39 = arith.truncf %38 : vector<2x8x32xf32> to vector<2x8x32xbf16>
    %40 = vector.shape_cast %27 : vector<16x32xf32> to vector<2x8x32xf32>
    %41 = arith.truncf %40 : vector<2x8x32xf32> to vector<2x8x32xbf16>
    %42 = vector.extract_strided_slice %37 {offsets = [0, 0, 0], sizes = [2, 8, 8], strides = [1, 1, 1]} : vector<2x8x32xbf16> to vector<2x8x8xbf16>
    %43 = vector.extract_strided_slice %39 {offsets = [0, 0, 0], sizes = [2, 8, 8], strides = [1, 1, 1]} : vector<2x8x32xbf16> to vector<2x8x8xbf16>
    "tpu.trace_start"() <{level = 10 : i32, message = "bqd,bkd->bqk"}> : () -> ()
    %cst_28 = arith.constant dense<0.000000e+00> : vector<2x8x8xf32>
    %44 = tpu.matmul %42, %43, %cst_28 {dimension_numbers = #tpu.dot_dimension_numbers<[2], [2], [1], [1], [0, 0, 0, 1, 1, 1], [0], [0]>} : vector<2x8x8xbf16>, vector<2x8x8xbf16>, vector<2x8x8xf32> -> vector<2x8x8xf32>
    "tpu.trace_stop"() : () -> ()
    %cst_29 = arith.constant dense<0xFF800000> : vector<2x8xf32>
    %45 = vector.multi_reduction <maximumf>, %44, %cst_29 [2] : vector<2x8x8xf32> to vector<2x8xf32>
    %46 = vector.shape_cast %45 : vector<2x8xf32> to vector<2x8x1xf32>
    %47 = vector.broadcast %46 : vector<2x8x1xf32> to vector<2x8x8xf32>
    %48 = arith.subf %44, %47 : vector<2x8x8xf32>
    %49 = math.exp %48 : vector<2x8x8xf32>
    %cst_30 = arith.constant dense<0.000000e+00> : vector<2x8xf32>
    %50 = vector.multi_reduction <add>, %49, %cst_30 [2] : vector<2x8x8xf32> to vector<2x8xf32>
    %51 = vector.shape_cast %50 : vector<2x8xf32> to vector<2x8x1xf32>
    %52 = tpu.reciprocal %51 {approx = true} : vector<2x8x1xf32> -> vector<2x8x1xf32>
    %53 = vector.broadcast %52 : vector<2x8x1xf32> to vector<2x8x8xf32>
    %54 = arith.mulf %49, %53 : vector<2x8x8xf32>
    %55 = arith.truncf %54 : vector<2x8x8xf32> to vector<2x8x8xbf16>
    %56 = vector.extract_strided_slice %41 {offsets = [0, 0, 0], sizes = [2, 8, 8], strides = [1, 1, 1]} : vector<2x8x32xbf16> to vector<2x8x8xbf16>
    "tpu.trace_start"() <{level = 10 : i32, message = "bqk,bkd->bqd"}> : () -> ()
    %cst_31 = arith.constant dense<0.000000e+00> : vector<2x8x8xf32>
    %57 = tpu.matmul %55, %56, %cst_31 {dimension_numbers = #tpu.dot_dimension_numbers<[2], [1], [1], [2], [0, 0, 0, 1, 1, 2], [0], [0]>} : vector<2x8x8xbf16>, vector<2x8x8xbf16>, vector<2x8x8xf32> -> vector<2x8x8xf32>
    "tpu.trace_stop"() : () -> ()
    %58 = vector.extract_strided_slice %37 {offsets = [0, 0, 8], sizes = [2, 8, 8], strides = [1, 1, 1]} : vector<2x8x32xbf16> to vector<2x8x8xbf16>
    %59 = vector.extract_strided_slice %39 {offsets = [0, 0, 8], sizes = [2, 8, 8], strides = [1, 1, 1]} : vector<2x8x32xbf16> to vector<2x8x8xbf16>
    "tpu.trace_start"() <{level = 10 : i32, message = "bqd,bkd->bqk"}> : () -> ()
    %cst_32 = arith.constant dense<0.000000e+00> : vector<2x8x8xf32>
    %60 = tpu.matmul %58, %59, %cst_32 {dimension_numbers = #tpu.dot_dimension_numbers<[2], [2], [1], [1], [0, 0, 0, 1, 1, 1], [0], [0]>} : vector<2x8x8xbf16>, vector<2x8x8xbf16>, vector<2x8x8xf32> -> vector<2x8x8xf32>
    "tpu.trace_stop"() : () -> ()
    %cst_33 = arith.constant dense<0xFF800000> : vector<2x8xf32>
    %61 = vector.multi_reduction <maximumf>, %60, %cst_33 [2] : vector<2x8x8xf32> to vector<2x8xf32>
    %62 = vector.shape_cast %61 : vector<2x8xf32> to vector<2x8x1xf32>
    %63 = vector.broadcast %62 : vector<2x8x1xf32> to vector<2x8x8xf32>
    %64 = arith.subf %60, %63 : vector<2x8x8xf32>
    %65 = math.exp %64 : vector<2x8x8xf32>
    %cst_34 = arith.constant dense<0.000000e+00> : vector<2x8xf32>
    %66 = vector.multi_reduction <add>, %65, %cst_34 [2] : vector<2x8x8xf32> to vector<2x8xf32>
    %67 = vector.shape_cast %66 : vector<2x8xf32> to vector<2x8x1xf32>
    %68 = tpu.reciprocal %67 {approx = true} : vector<2x8x1xf32> -> vector<2x8x1xf32>
    %69 = vector.broadcast %68 : vector<2x8x1xf32> to vector<2x8x8xf32>
    %70 = arith.mulf %65, %69 : vector<2x8x8xf32>
    %71 = arith.truncf %70 : vector<2x8x8xf32> to vector<2x8x8xbf16>
    %72 = vector.extract_strided_slice %41 {offsets = [0, 0, 8], sizes = [2, 8, 8], strides = [1, 1, 1]} : vector<2x8x32xbf16> to vector<2x8x8xbf16>
    "tpu.trace_start"() <{level = 10 : i32, message = "bqk,bkd->bqd"}> : () -> ()
    %cst_35 = arith.constant dense<0.000000e+00> : vector<2x8x8xf32>
    %73 = tpu.matmul %71, %72, %cst_35 {dimension_numbers = #tpu.dot_dimension_numbers<[2], [1], [1], [2], [0, 0, 0, 1, 1, 2], [0], [0]>} : vector<2x8x8xbf16>, vector<2x8x8xbf16>, vector<2x8x8xf32> -> vector<2x8x8xf32>
    "tpu.trace_stop"() : () -> ()
    %74 = vector.extract_strided_slice %37 {offsets = [0, 0, 16], sizes = [2, 8, 8], strides = [1, 1, 1]} : vector<2x8x32xbf16> to vector<2x8x8xbf16>
    %75 = vector.extract_strided_slice %39 {offsets = [0, 0, 16], sizes = [2, 8, 8], strides = [1, 1, 1]} : vector<2x8x32xbf16> to vector<2x8x8xbf16>
    "tpu.trace_start"() <{level = 10 : i32, message = "bqd,bkd->bqk"}> : () -> ()
    %cst_36 = arith.constant dense<0.000000e+00> : vector<2x8x8xf32>
    %76 = tpu.matmul %74, %75, %cst_36 {dimension_numbers = #tpu.dot_dimension_numbers<[2], [2], [1], [1], [0, 0, 0, 1, 1, 1], [0], [0]>} : vector<2x8x8xbf16>, vector<2x8x8xbf16>, vector<2x8x8xf32> -> vector<2x8x8xf32>
    "tpu.trace_stop"() : () -> ()
    %cst_37 = arith.constant dense<0xFF800000> : vector<2x8xf32>
    %77 = vector.multi_reduction <maximumf>, %76, %cst_37 [2] : vector<2x8x8xf32> to vector<2x8xf32>
    %78 = vector.shape_cast %77 : vector<2x8xf32> to vector<2x8x1xf32>
    %79 = vector.broadcast %78 : vector<2x8x1xf32> to vector<2x8x8xf32>
    %80 = arith.subf %76, %79 : vector<2x8x8xf32>
    %81 = math.exp %80 : vector<2x8x8xf32>
    %cst_38 = arith.constant dense<0.000000e+00> : vector<2x8xf32>
    %82 = vector.multi_reduction <add>, %81, %cst_38 [2] : vector<2x8x8xf32> to vector<2x8xf32>
    %83 = vector.shape_cast %82 : vector<2x8xf32> to vector<2x8x1xf32>
    %84 = tpu.reciprocal %83 {approx = true} : vector<2x8x1xf32> -> vector<2x8x1xf32>
    %85 = vector.broadcast %84 : vector<2x8x1xf32> to vector<2x8x8xf32>
    %86 = arith.mulf %81, %85 : vector<2x8x8xf32>
    %87 = arith.truncf %86 : vector<2x8x8xf32> to vector<2x8x8xbf16>
    %88 = vector.extract_strided_slice %41 {offsets = [0, 0, 16], sizes = [2, 8, 8], strides = [1, 1, 1]} : vector<2x8x32xbf16> to vector<2x8x8xbf16>
    "tpu.trace_start"() <{level = 10 : i32, message = "bqk,bkd->bqd"}> : () -> ()
    %cst_39 = arith.constant dense<0.000000e+00> : vector<2x8x8xf32>
    %89 = tpu.matmul %87, %88, %cst_39 {dimension_numbers = #tpu.dot_dimension_numbers<[2], [1], [1], [2], [0, 0, 0, 1, 1, 2], [0], [0]>} : vector<2x8x8xbf16>, vector<2x8x8xbf16>, vector<2x8x8xf32> -> vector<2x8x8xf32>
    "tpu.trace_stop"() : () -> ()
    %90 = vector.extract_strided_slice %37 {offsets = [0, 0, 24], sizes = [2, 8, 8], strides = [1, 1, 1]} : vector<2x8x32xbf16> to vector<2x8x8xbf16>
    %91 = vector.extract_strided_slice %39 {offsets = [0, 0, 24], sizes = [2, 8, 8], strides = [1, 1, 1]} : vector<2x8x32xbf16> to vector<2x8x8xbf16>
    "tpu.trace_start"() <{level = 10 : i32, message = "bqd,bkd->bqk"}> : () -> ()
    %cst_40 = arith.constant dense<0.000000e+00> : vector<2x8x8xf32>
    %92 = tpu.matmul %90, %91, %cst_40 {dimension_numbers = #tpu.dot_dimension_numbers<[2], [2], [1], [1], [0, 0, 0, 1, 1, 1], [0], [0]>} : vector<2x8x8xbf16>, vector<2x8x8xbf16>, vector<2x8x8xf32> -> vector<2x8x8xf32>
    "tpu.trace_stop"() : () -> ()
    %cst_41 = arith.constant dense<0xFF800000> : vector<2x8xf32>
    %93 = vector.multi_reduction <maximumf>, %92, %cst_41 [2] : vector<2x8x8xf32> to vector<2x8xf32>
    %94 = vector.shape_cast %93 : vector<2x8xf32> to vector<2x8x1xf32>
    %95 = vector.broadcast %94 : vector<2x8x1xf32> to vector<2x8x8xf32>
    %96 = arith.subf %92, %95 : vector<2x8x8xf32>
    %97 = math.exp %96 : vector<2x8x8xf32>
    %cst_42 = arith.constant dense<0.000000e+00> : vector<2x8xf32>
    %98 = vector.multi_reduction <add>, %97, %cst_42 [2] : vector<2x8x8xf32> to vector<2x8xf32>
    %99 = vector.shape_cast %98 : vector<2x8xf32> to vector<2x8x1xf32>
    %100 = tpu.reciprocal %99 {approx = true} : vector<2x8x1xf32> -> vector<2x8x1xf32>
    %101 = vector.broadcast %100 : vector<2x8x1xf32> to vector<2x8x8xf32>
    %102 = arith.mulf %97, %101 : vector<2x8x8xf32>
    %103 = arith.truncf %102 : vector<2x8x8xf32> to vector<2x8x8xbf16>
    %104 = vector.extract_strided_slice %41 {offsets = [0, 0, 24], sizes = [2, 8, 8], strides = [1, 1, 1]} : vector<2x8x32xbf16> to vector<2x8x8xbf16>
    "tpu.trace_start"() <{level = 10 : i32, message = "bqk,bkd->bqd"}> : () -> ()
    %cst_43 = arith.constant dense<0.000000e+00> : vector<2x8x8xf32>
    %105 = tpu.matmul %103, %104, %cst_43 {dimension_numbers = #tpu.dot_dimension_numbers<[2], [1], [1], [2], [0, 0, 0, 1, 1, 2], [0], [0]>} : vector<2x8x8xbf16>, vector<2x8x8xbf16>, vector<2x8x8xf32> -> vector<2x8x8xf32>
    "tpu.trace_stop"() : () -> ()
    %106 = tpu.concatenate %57, %73, %89, %105 in 2 : vector<2x8x8xf32>, vector<2x8x8xf32>, vector<2x8x8xf32>, vector<2x8x8xf32> -> vector<2x8x32xf32>
    %107 = vector.shape_cast %106 : vector<2x8x32xf32> to vector<16x32xf32>
    %108 = arith.truncf %107 : vector<16x32xf32> to vector<16x32xbf16>
    %cst_44 = arith.constant dense<0.000000e+00> : vector<16x32xf32>
    %109 = tpu.matmul %108, %31, %cst_44 {dimension_numbers = #tpu.dot_dimension_numbers<[1], [0], [0], [1], [0, 0, 1, 1], [], []>} : vector<16x32xbf16>, vector<32x32xbf16>, vector<16x32xf32> -> vector<16x32xf32>
    %110 = vector.broadcast %33 : vector<1x32xf32> to vector<16x32xf32>
    %111 = arith.addf %109, %110 : vector<16x32xf32>
    %112 = arith.addf %3, %111 : vector<16x32xf32>
    %113 = vector.extract_strided_slice %8 {offsets = [0, 0], sizes = [1, 32], strides = [1, 1]} : vector<4x32xf32> to vector<1x32xf32>
    %114 = vector.extract_strided_slice %10 {offsets = [0, 0], sizes = [1, 32], strides = [1, 1]} : vector<4x32xf32> to vector<1x32xf32>
    %cst_45 = arith.constant dense<0.000000e+00> : vector<16xf32>
    %115 = vector.multi_reduction <add>, %112, %cst_45 [1] : vector<16x32xf32> to vector<16xf32>
    %116 = vector.shape_cast %115 : vector<16xf32> to vector<16x1xf32>
    %cst_46 = arith.constant 3.200000e+01 : f32
    %117 = vector.broadcast %cst_46 : f32 to vector<16x1xf32>
    %118 = arith.divf %116, %117 : vector<16x1xf32>
    %119 = vector.broadcast %118 : vector<16x1xf32> to vector<16x32xf32>
    %120 = arith.subf %112, %119 : vector<16x32xf32>
    %121 = arith.mulf %120, %120 : vector<16x32xf32>
    %cst_47 = arith.constant dense<0.000000e+00> : vector<16xf32>
    %122 = vector.multi_reduction <add>, %121, %cst_47 [1] : vector<16x32xf32> to vector<16xf32>
    %123 = vector.shape_cast %122 : vector<16xf32> to vector<16x1xf32>
    %cst_48 = arith.constant 3.200000e+01 : f32
    %124 = vector.broadcast %cst_48 : f32 to vector<16x1xf32>
    %125 = arith.divf %123, %124 : vector<16x1xf32>
    %cst_49 = arith.constant 9.99999974E-6 : f32
    %126 = vector.broadcast %cst_49 : f32 to vector<16x1xf32>
    %127 = arith.addf %125, %126 : vector<16x1xf32>
    %128 = math.rsqrt %127 : vector<16x1xf32>
    %129 = vector.broadcast %128 : vector<16x1xf32> to vector<16x32xf32>
    %130 = arith.mulf %120, %129 : vector<16x32xf32>
    %131 = vector.broadcast %113 : vector<1x32xf32> to vector<16x32xf32>
    %132 = arith.mulf %130, %131 : vector<16x32xf32>
    %133 = vector.broadcast %114 : vector<1x32xf32> to vector<16x32xf32>
    %134 = arith.addf %132, %133 : vector<16x32xf32>
    %c0_50 = arith.constant 0 : index
    %c0_51 = arith.constant 0 : index
    %c0_52 = arith.constant 0 : index
    %135 = vector.load %arg10[%c0_50, %c0_51, %c0_52] : memref<1x32x96xbf16, #tpu.memory_space<vmem>>, vector<1x32x96xbf16>
    %136 = vector.shape_cast %135 : vector<1x32x96xbf16> to vector<32x96xbf16>
    %c0_53 = arith.constant 0 : index
    %c0_54 = arith.constant 0 : index
    %c0_55 = arith.constant 0 : index
    %137 = vector.load %arg11[%c0_53, %c0_54, %c0_55] : memref<1x1x96xf32, #tpu.memory_space<vmem>>, vector<1x1x96xf32>
    %138 = vector.shape_cast %137 : vector<1x1x96xf32> to vector<1x96xf32>
    %139 = arith.addf %134, %6 : vector<16x32xf32>
    %140 = vector.extract_strided_slice %136 {offsets = [0, 0], sizes = [32, 32], strides = [1, 1]} : vector<32x96xbf16> to vector<32x32xbf16>
    %141 = vector.extract_strided_slice %138 {offsets = [0, 0], sizes = [1, 32], strides = [1, 1]} : vector<1x96xf32> to vector<1x32xf32>
    %142 = arith.truncf %139 : vector<16x32xf32> to vector<16x32xbf16>
    %cst_56 = arith.constant dense<0.000000e+00> : vector<16x32xf32>
    %143 = tpu.matmul %142, %140, %cst_56 {dimension_numbers = #tpu.dot_dimension_numbers<[1], [0], [0], [1], [0, 0, 1, 1], [], []>} : vector<16x32xbf16>, vector<32x32xbf16>, vector<16x32xf32> -> vector<16x32xf32>
    %144 = vector.broadcast %141 : vector<1x32xf32> to vector<16x32xf32>
    %145 = arith.addf %143, %144 : vector<16x32xf32>
    %c0_57 = arith.constant 0 : index
    %c0_58 = arith.constant 0 : index
    %146 = vector.load %arg27[%c0_57, %c0_58] : memref<32x32xbf16, #tpu.memory_space<vmem>>, vector<32x32xbf16>
    %147 = vector.extract_strided_slice %136 {offsets = [0, 32], sizes = [32, 32], strides = [1, 1]} : vector<32x96xbf16> to vector<32x32xbf16>
    %148 = vector.extract_strided_slice %138 {offsets = [0, 32], sizes = [1, 32], strides = [1, 1]} : vector<1x96xf32> to vector<1x32xf32>
    %cst_59 = arith.constant dense<0.000000e+00> : vector<32x32xf32>
    %149 = tpu.matmul %146, %147, %cst_59 {dimension_numbers = #tpu.dot_dimension_numbers<[1], [0], [0], [1], [0, 0, 1, 1], [], []>} : vector<32x32xbf16>, vector<32x32xbf16>, vector<32x32xf32> -> vector<32x32xf32>
    %150 = vector.broadcast %148 : vector<1x32xf32> to vector<32x32xf32>
    %151 = arith.addf %149, %150 : vector<32x32xf32>
    %152 = vector.extract_strided_slice %136 {offsets = [0, 64], sizes = [32, 32], strides = [1, 1]} : vector<32x96xbf16> to vector<32x32xbf16>
    %153 = vector.extract_strided_slice %138 {offsets = [0, 64], sizes = [1, 32], strides = [1, 1]} : vector<1x96xf32> to vector<1x32xf32>
    %154 = arith.truncf %4 : vector<32x32xf32> to vector<32x32xbf16>
    %cst_60 = arith.constant dense<0.000000e+00> : vector<32x32xf32>
    %155 = tpu.matmul %154, %152, %cst_60 {dimension_numbers = #tpu.dot_dimension_numbers<[1], [0], [0], [1], [0, 0, 1, 1], [], []>} : vector<32x32xbf16>, vector<32x32xbf16>, vector<32x32xf32> -> vector<32x32xf32>
    %156 = vector.broadcast %153 : vector<1x32xf32> to vector<32x32xf32>
    %157 = arith.addf %155, %156 : vector<32x32xf32>
    %c0_61 = arith.constant 0 : index
    %c0_62 = arith.constant 0 : index
    %c0_63 = arith.constant 0 : index
    %158 = vector.load %arg12[%c0_61, %c0_62, %c0_63] : memref<1x32x32xbf16, #tpu.memory_space<vmem>>, vector<1x32x32xbf16>
    %159 = vector.shape_cast %158 : vector<1x32x32xbf16> to vector<32x32xbf16>
    %c0_64 = arith.constant 0 : index
    %c0_65 = arith.constant 0 : index
    %c0_66 = arith.constant 0 : index
    %160 = vector.load %arg13[%c0_64, %c0_65, %c0_66] : memref<1x1x32xf32, #tpu.memory_space<vmem>>, vector<1x1x32xf32>
    %161 = vector.shape_cast %160 : vector<1x1x32xf32> to vector<1x32xf32>
    %cst_67 = arith.constant 0.353553385 : f32
    %162 = vector.broadcast %cst_67 : f32 to vector<16x32xf32>
    %163 = arith.mulf %145, %162 : vector<16x32xf32>
    %164 = vector.shape_cast %163 : vector<16x32xf32> to vector<2x8x32xf32>
    %165 = arith.truncf %164 : vector<2x8x32xf32> to vector<2x8x32xbf16>
    %166 = vector.shape_cast %151 : vector<32x32xf32> to vector<2x16x32xf32>
    %167 = arith.truncf %166 : vector<2x16x32xf32> to vector<2x16x32xbf16>
    %168 = vector.shape_cast %157 : vector<32x32xf32> to vector<2x16x32xf32>
    %169 = arith.truncf %168 : vector<2x16x32xf32> to vector<2x16x32xbf16>
    %170 = vector.extract_strided_slice %165 {offsets = [0, 0, 0], sizes = [2, 8, 8], strides = [1, 1, 1]} : vector<2x8x32xbf16> to vector<2x8x8xbf16>
    %171 = vector.extract_strided_slice %167 {offsets = [0, 0, 0], sizes = [2, 16, 8], strides = [1, 1, 1]} : vector<2x16x32xbf16> to vector<2x16x8xbf16>
    "tpu.trace_start"() <{level = 10 : i32, message = "bqd,bkd->bqk"}> : () -> ()
    %cst_68 = arith.constant dense<0.000000e+00> : vector<2x8x16xf32>
    %172 = tpu.matmul %170, %171, %cst_68 {dimension_numbers = #tpu.dot_dimension_numbers<[2], [2], [1], [1], [0, 0, 0, 1, 1, 1], [0], [0]>} : vector<2x8x8xbf16>, vector<2x16x8xbf16>, vector<2x8x16xf32> -> vector<2x8x16xf32>
    "tpu.trace_stop"() : () -> ()
    %cst_69 = arith.constant dense<0xFF800000> : vector<2x8xf32>
    %173 = vector.multi_reduction <maximumf>, %172, %cst_69 [2] : vector<2x8x16xf32> to vector<2x8xf32>
    %174 = vector.shape_cast %173 : vector<2x8xf32> to vector<2x8x1xf32>
    %175 = vector.broadcast %174 : vector<2x8x1xf32> to vector<2x8x16xf32>
    %176 = arith.subf %172, %175 : vector<2x8x16xf32>
    %177 = math.exp %176 : vector<2x8x16xf32>
    %cst_70 = arith.constant dense<0.000000e+00> : vector<2x8xf32>
    %178 = vector.multi_reduction <add>, %177, %cst_70 [2] : vector<2x8x16xf32> to vector<2x8xf32>
    %179 = vector.shape_cast %178 : vector<2x8xf32> to vector<2x8x1xf32>
    %180 = tpu.reciprocal %179 {approx = true} : vector<2x8x1xf32> -> vector<2x8x1xf32>
    %181 = vector.broadcast %180 : vector<2x8x1xf32> to vector<2x8x16xf32>
    %182 = arith.mulf %177, %181 : vector<2x8x16xf32>
    %183 = arith.truncf %182 : vector<2x8x16xf32> to vector<2x8x16xbf16>
    %184 = vector.extract_strided_slice %169 {offsets = [0, 0, 0], sizes = [2, 16, 8], strides = [1, 1, 1]} : vector<2x16x32xbf16> to vector<2x16x8xbf16>
    "tpu.trace_start"() <{level = 10 : i32, message = "bqk,bkd->bqd"}> : () -> ()
    %cst_71 = arith.constant dense<0.000000e+00> : vector<2x8x8xf32>
    %185 = tpu.matmul %183, %184, %cst_71 {dimension_numbers = #tpu.dot_dimension_numbers<[2], [1], [1], [2], [0, 0, 0, 1, 1, 2], [0], [0]>} : vector<2x8x16xbf16>, vector<2x16x8xbf16>, vector<2x8x8xf32> -> vector<2x8x8xf32>
    "tpu.trace_stop"() : () -> ()
    %186 = vector.extract_strided_slice %165 {offsets = [0, 0, 8], sizes = [2, 8, 8], strides = [1, 1, 1]} : vector<2x8x32xbf16> to vector<2x8x8xbf16>
    %187 = vector.extract_strided_slice %167 {offsets = [0, 0, 8], sizes = [2, 16, 8], strides = [1, 1, 1]} : vector<2x16x32xbf16> to vector<2x16x8xbf16>
    "tpu.trace_start"() <{level = 10 : i32, message = "bqd,bkd->bqk"}> : () -> ()
    %cst_72 = arith.constant dense<0.000000e+00> : vector<2x8x16xf32>
    %188 = tpu.matmul %186, %187, %cst_72 {dimension_numbers = #tpu.dot_dimension_numbers<[2], [2], [1], [1], [0, 0, 0, 1, 1, 1], [0], [0]>} : vector<2x8x8xbf16>, vector<2x16x8xbf16>, vector<2x8x16xf32> -> vector<2x8x16xf32>
    "tpu.trace_stop"() : () -> ()
    %cst_73 = arith.constant dense<0xFF800000> : vector<2x8xf32>
    %189 = vector.multi_reduction <maximumf>, %188, %cst_73 [2] : vector<2x8x16xf32> to vector<2x8xf32>
    %190 = vector.shape_cast %189 : vector<2x8xf32> to vector<2x8x1xf32>
    %191 = vector.broadcast %190 : vector<2x8x1xf32> to vector<2x8x16xf32>
    %192 = arith.subf %188, %191 : vector<2x8x16xf32>
    %193 = math.exp %192 : vector<2x8x16xf32>
    %cst_74 = arith.constant dense<0.000000e+00> : vector<2x8xf32>
    %194 = vector.multi_reduction <add>, %193, %cst_74 [2] : vector<2x8x16xf32> to vector<2x8xf32>
    %195 = vector.shape_cast %194 : vector<2x8xf32> to vector<2x8x1xf32>
    %196 = tpu.reciprocal %195 {approx = true} : vector<2x8x1xf32> -> vector<2x8x1xf32>
    %197 = vector.broadcast %196 : vector<2x8x1xf32> to vector<2x8x16xf32>
    %198 = arith.mulf %193, %197 : vector<2x8x16xf32>
    %199 = arith.truncf %198 : vector<2x8x16xf32> to vector<2x8x16xbf16>
    %200 = vector.extract_strided_slice %169 {offsets = [0, 0, 8], sizes = [2, 16, 8], strides = [1, 1, 1]} : vector<2x16x32xbf16> to vector<2x16x8xbf16>
    "tpu.trace_start"() <{level = 10 : i32, message = "bqk,bkd->bqd"}> : () -> ()
    %cst_75 = arith.constant dense<0.000000e+00> : vector<2x8x8xf32>
    %201 = tpu.matmul %199, %200, %cst_75 {dimension_numbers = #tpu.dot_dimension_numbers<[2], [1], [1], [2], [0, 0, 0, 1, 1, 2], [0], [0]>} : vector<2x8x16xbf16>, vector<2x16x8xbf16>, vector<2x8x8xf32> -> vector<2x8x8xf32>
    "tpu.trace_stop"() : () -> ()
    %202 = vector.extract_strided_slice %165 {offsets = [0, 0, 16], sizes = [2, 8, 8], strides = [1, 1, 1]} : vector<2x8x32xbf16> to vector<2x8x8xbf16>
    %203 = vector.extract_strided_slice %167 {offsets = [0, 0, 16], sizes = [2, 16, 8], strides = [1, 1, 1]} : vector<2x16x32xbf16> to vector<2x16x8xbf16>
    "tpu.trace_start"() <{level = 10 : i32, message = "bqd,bkd->bqk"}> : () -> ()
    %cst_76 = arith.constant dense<0.000000e+00> : vector<2x8x16xf32>
    %204 = tpu.matmul %202, %203, %cst_76 {dimension_numbers = #tpu.dot_dimension_numbers<[2], [2], [1], [1], [0, 0, 0, 1, 1, 1], [0], [0]>} : vector<2x8x8xbf16>, vector<2x16x8xbf16>, vector<2x8x16xf32> -> vector<2x8x16xf32>
    "tpu.trace_stop"() : () -> ()
    %cst_77 = arith.constant dense<0xFF800000> : vector<2x8xf32>
    %205 = vector.multi_reduction <maximumf>, %204, %cst_77 [2] : vector<2x8x16xf32> to vector<2x8xf32>
    %206 = vector.shape_cast %205 : vector<2x8xf32> to vector<2x8x1xf32>
    %207 = vector.broadcast %206 : vector<2x8x1xf32> to vector<2x8x16xf32>
    %208 = arith.subf %204, %207 : vector<2x8x16xf32>
    %209 = math.exp %208 : vector<2x8x16xf32>
    %cst_78 = arith.constant dense<0.000000e+00> : vector<2x8xf32>
    %210 = vector.multi_reduction <add>, %209, %cst_78 [2] : vector<2x8x16xf32> to vector<2x8xf32>
    %211 = vector.shape_cast %210 : vector<2x8xf32> to vector<2x8x1xf32>
    %212 = tpu.reciprocal %211 {approx = true} : vector<2x8x1xf32> -> vector<2x8x1xf32>
    %213 = vector.broadcast %212 : vector<2x8x1xf32> to vector<2x8x16xf32>
    %214 = arith.mulf %209, %213 : vector<2x8x16xf32>
    %215 = arith.truncf %214 : vector<2x8x16xf32> to vector<2x8x16xbf16>
    %216 = vector.extract_strided_slice %169 {offsets = [0, 0, 16], sizes = [2, 16, 8], strides = [1, 1, 1]} : vector<2x16x32xbf16> to vector<2x16x8xbf16>
    "tpu.trace_start"() <{level = 10 : i32, message = "bqk,bkd->bqd"}> : () -> ()
    %cst_79 = arith.constant dense<0.000000e+00> : vector<2x8x8xf32>
    %217 = tpu.matmul %215, %216, %cst_79 {dimension_numbers = #tpu.dot_dimension_numbers<[2], [1], [1], [2], [0, 0, 0, 1, 1, 2], [0], [0]>} : vector<2x8x16xbf16>, vector<2x16x8xbf16>, vector<2x8x8xf32> -> vector<2x8x8xf32>
    "tpu.trace_stop"() : () -> ()
    %218 = vector.extract_strided_slice %165 {offsets = [0, 0, 24], sizes = [2, 8, 8], strides = [1, 1, 1]} : vector<2x8x32xbf16> to vector<2x8x8xbf16>
    %219 = vector.extract_strided_slice %167 {offsets = [0, 0, 24], sizes = [2, 16, 8], strides = [1, 1, 1]} : vector<2x16x32xbf16> to vector<2x16x8xbf16>
    "tpu.trace_start"() <{level = 10 : i32, message = "bqd,bkd->bqk"}> : () -> ()
    %cst_80 = arith.constant dense<0.000000e+00> : vector<2x8x16xf32>
    %220 = tpu.matmul %218, %219, %cst_80 {dimension_numbers = #tpu.dot_dimension_numbers<[2], [2], [1], [1], [0, 0, 0, 1, 1, 1], [0], [0]>} : vector<2x8x8xbf16>, vector<2x16x8xbf16>, vector<2x8x16xf32> -> vector<2x8x16xf32>
    "tpu.trace_stop"() : () -> ()
    %cst_81 = arith.constant dense<0xFF800000> : vector<2x8xf32>
    %221 = vector.multi_reduction <maximumf>, %220, %cst_81 [2] : vector<2x8x16xf32> to vector<2x8xf32>
    %222 = vector.shape_cast %221 : vector<2x8xf32> to vector<2x8x1xf32>
    %223 = vector.broadcast %222 : vector<2x8x1xf32> to vector<2x8x16xf32>
    %224 = arith.subf %220, %223 : vector<2x8x16xf32>
    %225 = math.exp %224 : vector<2x8x16xf32>
    %cst_82 = arith.constant dense<0.000000e+00> : vector<2x8xf32>
    %226 = vector.multi_reduction <add>, %225, %cst_82 [2] : vector<2x8x16xf32> to vector<2x8xf32>
    %227 = vector.shape_cast %226 : vector<2x8xf32> to vector<2x8x1xf32>
    %228 = tpu.reciprocal %227 {approx = true} : vector<2x8x1xf32> -> vector<2x8x1xf32>
    %229 = vector.broadcast %228 : vector<2x8x1xf32> to vector<2x8x16xf32>
    %230 = arith.mulf %225, %229 : vector<2x8x16xf32>
    %231 = arith.truncf %230 : vector<2x8x16xf32> to vector<2x8x16xbf16>
    %232 = vector.extract_strided_slice %169 {offsets = [0, 0, 24], sizes = [2, 16, 8], strides = [1, 1, 1]} : vector<2x16x32xbf16> to vector<2x16x8xbf16>
    "tpu.trace_start"() <{level = 10 : i32, message = "bqk,bkd->bqd"}> : () -> ()
    %cst_83 = arith.constant dense<0.000000e+00> : vector<2x8x8xf32>
    %233 = tpu.matmul %231, %232, %cst_83 {dimension_numbers = #tpu.dot_dimension_numbers<[2], [1], [1], [2], [0, 0, 0, 1, 1, 2], [0], [0]>} : vector<2x8x16xbf16>, vector<2x16x8xbf16>, vector<2x8x8xf32> -> vector<2x8x8xf32>
    "tpu.trace_stop"() : () -> ()
    %234 = tpu.concatenate %185, %201, %217, %233 in 2 : vector<2x8x8xf32>, vector<2x8x8xf32>, vector<2x8x8xf32>, vector<2x8x8xf32> -> vector<2x8x32xf32>
    %235 = vector.shape_cast %234 : vector<2x8x32xf32> to vector<16x32xf32>
    %236 = arith.truncf %235 : vector<16x32xf32> to vector<16x32xbf16>
    %cst_84 = arith.constant dense<0.000000e+00> : vector<16x32xf32>
    %237 = tpu.matmul %236, %159, %cst_84 {dimension_numbers = #tpu.dot_dimension_numbers<[1], [0], [0], [1], [0, 0, 1, 1], [], []>} : vector<16x32xbf16>, vector<32x32xbf16>, vector<16x32xf32> -> vector<16x32xf32>
    %238 = vector.broadcast %161 : vector<1x32xf32> to vector<16x32xf32>
    %239 = arith.addf %237, %238 : vector<16x32xf32>
    %240 = arith.addf %134, %239 : vector<16x32xf32>
    %241 = vector.extract_strided_slice %8 {offsets = [1, 0], sizes = [1, 32], strides = [1, 1]} : vector<4x32xf32> to vector<1x32xf32>
    %242 = vector.extract_strided_slice %10 {offsets = [1, 0], sizes = [1, 32], strides = [1, 1]} : vector<4x32xf32> to vector<1x32xf32>
    %cst_85 = arith.constant dense<0.000000e+00> : vector<16xf32>
    %243 = vector.multi_reduction <add>, %240, %cst_85 [1] : vector<16x32xf32> to vector<16xf32>
    %244 = vector.shape_cast %243 : vector<16xf32> to vector<16x1xf32>
    %cst_86 = arith.constant 3.200000e+01 : f32
    %245 = vector.broadcast %cst_86 : f32 to vector<16x1xf32>
    %246 = arith.divf %244, %245 : vector<16x1xf32>
    %247 = vector.broadcast %246 : vector<16x1xf32> to vector<16x32xf32>
    %248 = arith.subf %240, %247 : vector<16x32xf32>
    %249 = arith.mulf %248, %248 : vector<16x32xf32>
    %cst_87 = arith.constant dense<0.000000e+00> : vector<16xf32>
    %250 = vector.multi_reduction <add>, %249, %cst_87 [1] : vector<16x32xf32> to vector<16xf32>
    %251 = vector.shape_cast %250 : vector<16xf32> to vector<16x1xf32>
    %cst_88 = arith.constant 3.200000e+01 : f32
    %252 = vector.broadcast %cst_88 : f32 to vector<16x1xf32>
    %253 = arith.divf %251, %252 : vector<16x1xf32>
    %cst_89 = arith.constant 9.99999974E-6 : f32
    %254 = vector.broadcast %cst_89 : f32 to vector<16x1xf32>
    %255 = arith.addf %253, %254 : vector<16x1xf32>
    %256 = math.rsqrt %255 : vector<16x1xf32>
    %257 = vector.broadcast %256 : vector<16x1xf32> to vector<16x32xf32>
    %258 = arith.mulf %248, %257 : vector<16x32xf32>
    %259 = vector.broadcast %241 : vector<1x32xf32> to vector<16x32xf32>
    %260 = arith.mulf %258, %259 : vector<16x32xf32>
    %261 = vector.broadcast %242 : vector<1x32xf32> to vector<16x32xf32>
    %262 = arith.addf %260, %261 : vector<16x32xf32>
    %c0_90 = arith.constant 0 : index
    %c0_91 = arith.constant 0 : index
    %c0_92 = arith.constant 0 : index
    %263 = vector.load %arg14[%c0_90, %c0_91, %c0_92] : memref<1x32x96xbf16, #tpu.memory_space<vmem>>, vector<1x32x96xbf16>
    %264 = vector.shape_cast %263 : vector<1x32x96xbf16> to vector<32x96xbf16>
    %c0_93 = arith.constant 0 : index
    %c0_94 = arith.constant 0 : index
    %c0_95 = arith.constant 0 : index
    %265 = vector.load %arg15[%c0_93, %c0_94, %c0_95] : memref<1x1x96xf32, #tpu.memory_space<vmem>>, vector<1x1x96xf32>
    %266 = vector.shape_cast %265 : vector<1x1x96xf32> to vector<1x96xf32>
    %267 = arith.addf %262, %6 : vector<16x32xf32>
    %268 = vector.extract_strided_slice %264 {offsets = [0, 0], sizes = [32, 32], strides = [1, 1]} : vector<32x96xbf16> to vector<32x32xbf16>
    %269 = vector.extract_strided_slice %266 {offsets = [0, 0], sizes = [1, 32], strides = [1, 1]} : vector<1x96xf32> to vector<1x32xf32>
    %270 = arith.truncf %267 : vector<16x32xf32> to vector<16x32xbf16>
    %cst_96 = arith.constant dense<0.000000e+00> : vector<16x32xf32>
    %271 = tpu.matmul %270, %268, %cst_96 {dimension_numbers = #tpu.dot_dimension_numbers<[1], [0], [0], [1], [0, 0, 1, 1], [], []>} : vector<16x32xbf16>, vector<32x32xbf16>, vector<16x32xf32> -> vector<16x32xf32>
    %272 = vector.broadcast %269 : vector<1x32xf32> to vector<16x32xf32>
    %273 = arith.addf %271, %272 : vector<16x32xf32>
    %c0_97 = arith.constant 0 : index
    %c0_98 = arith.constant 0 : index
    %274 = vector.load %arg28[%c0_97, %c0_98] : memref<32x32xbf16, #tpu.memory_space<vmem>>, vector<32x32xbf16>
    %275 = vector.extract_strided_slice %264 {offsets = [0, 32], sizes = [32, 32], strides = [1, 1]} : vector<32x96xbf16> to vector<32x32xbf16>
    %276 = vector.extract_strided_slice %266 {offsets = [0, 32], sizes = [1, 32], strides = [1, 1]} : vector<1x96xf32> to vector<1x32xf32>
    %cst_99 = arith.constant dense<0.000000e+00> : vector<32x32xf32>
    %277 = tpu.matmul %274, %275, %cst_99 {dimension_numbers = #tpu.dot_dimension_numbers<[1], [0], [0], [1], [0, 0, 1, 1], [], []>} : vector<32x32xbf16>, vector<32x32xbf16>, vector<32x32xf32> -> vector<32x32xf32>
    %278 = vector.broadcast %276 : vector<1x32xf32> to vector<32x32xf32>
    %279 = arith.addf %277, %278 : vector<32x32xf32>
    %280 = vector.extract_strided_slice %264 {offsets = [0, 64], sizes = [32, 32], strides = [1, 1]} : vector<32x96xbf16> to vector<32x32xbf16>
    %281 = vector.extract_strided_slice %266 {offsets = [0, 64], sizes = [1, 32], strides = [1, 1]} : vector<1x96xf32> to vector<1x32xf32>
    %282 = arith.truncf %5 : vector<32x32xf32> to vector<32x32xbf16>
    %cst_100 = arith.constant dense<0.000000e+00> : vector<32x32xf32>
    %283 = tpu.matmul %282, %280, %cst_100 {dimension_numbers = #tpu.dot_dimension_numbers<[1], [0], [0], [1], [0, 0, 1, 1], [], []>} : vector<32x32xbf16>, vector<32x32xbf16>, vector<32x32xf32> -> vector<32x32xf32>
    %284 = vector.broadcast %281 : vector<1x32xf32> to vector<32x32xf32>
    %285 = arith.addf %283, %284 : vector<32x32xf32>
    %c0_101 = arith.constant 0 : index
    %c0_102 = arith.constant 0 : index
    %c0_103 = arith.constant 0 : index
    %286 = vector.load %arg16[%c0_101, %c0_102, %c0_103] : memref<1x32x32xbf16, #tpu.memory_space<vmem>>, vector<1x32x32xbf16>
    %287 = vector.shape_cast %286 : vector<1x32x32xbf16> to vector<32x32xbf16>
    %c0_104 = arith.constant 0 : index
    %c0_105 = arith.constant 0 : index
    %c0_106 = arith.constant 0 : index
    %288 = vector.load %arg17[%c0_104, %c0_105, %c0_106] : memref<1x1x32xf32, #tpu.memory_space<vmem>>, vector<1x1x32xf32>
    %289 = vector.shape_cast %288 : vector<1x1x32xf32> to vector<1x32xf32>
    %cst_107 = arith.constant 0.353553385 : f32
    %290 = vector.broadcast %cst_107 : f32 to vector<16x32xf32>
    %291 = arith.mulf %273, %290 : vector<16x32xf32>
    %292 = vector.shape_cast %291 : vector<16x32xf32> to vector<2x8x32xf32>
    %293 = arith.truncf %292 : vector<2x8x32xf32> to vector<2x8x32xbf16>
    %294 = vector.shape_cast %279 : vector<32x32xf32> to vector<2x16x32xf32>
    %295 = arith.truncf %294 : vector<2x16x32xf32> to vector<2x16x32xbf16>
    %296 = vector.shape_cast %285 : vector<32x32xf32> to vector<2x16x32xf32>
    %297 = arith.truncf %296 : vector<2x16x32xf32> to vector<2x16x32xbf16>
    %298 = vector.extract_strided_slice %293 {offsets = [0, 0, 0], sizes = [2, 8, 8], strides = [1, 1, 1]} : vector<2x8x32xbf16> to vector<2x8x8xbf16>
    %299 = vector.extract_strided_slice %295 {offsets = [0, 0, 0], sizes = [2, 16, 8], strides = [1, 1, 1]} : vector<2x16x32xbf16> to vector<2x16x8xbf16>
    "tpu.trace_start"() <{level = 10 : i32, message = "bqd,bkd->bqk"}> : () -> ()
    %cst_108 = arith.constant dense<0.000000e+00> : vector<2x8x16xf32>
    %300 = tpu.matmul %298, %299, %cst_108 {dimension_numbers = #tpu.dot_dimension_numbers<[2], [2], [1], [1], [0, 0, 0, 1, 1, 1], [0], [0]>} : vector<2x8x8xbf16>, vector<2x16x8xbf16>, vector<2x8x16xf32> -> vector<2x8x16xf32>
    "tpu.trace_stop"() : () -> ()
    %cst_109 = arith.constant dense<0xFF800000> : vector<2x8xf32>
    %301 = vector.multi_reduction <maximumf>, %300, %cst_109 [2] : vector<2x8x16xf32> to vector<2x8xf32>
    %302 = vector.shape_cast %301 : vector<2x8xf32> to vector<2x8x1xf32>
    %303 = vector.broadcast %302 : vector<2x8x1xf32> to vector<2x8x16xf32>
    %304 = arith.subf %300, %303 : vector<2x8x16xf32>
    %305 = math.exp %304 : vector<2x8x16xf32>
    %cst_110 = arith.constant dense<0.000000e+00> : vector<2x8xf32>
    %306 = vector.multi_reduction <add>, %305, %cst_110 [2] : vector<2x8x16xf32> to vector<2x8xf32>
    %307 = vector.shape_cast %306 : vector<2x8xf32> to vector<2x8x1xf32>
    %308 = tpu.reciprocal %307 {approx = true} : vector<2x8x1xf32> -> vector<2x8x1xf32>
    %309 = vector.broadcast %308 : vector<2x8x1xf32> to vector<2x8x16xf32>
    %310 = arith.mulf %305, %309 : vector<2x8x16xf32>
    %311 = arith.truncf %310 : vector<2x8x16xf32> to vector<2x8x16xbf16>
    %312 = vector.extract_strided_slice %297 {offsets = [0, 0, 0], sizes = [2, 16, 8], strides = [1, 1, 1]} : vector<2x16x32xbf16> to vector<2x16x8xbf16>
    "tpu.trace_start"() <{level = 10 : i32, message = "bqk,bkd->bqd"}> : () -> ()
    %cst_111 = arith.constant dense<0.000000e+00> : vector<2x8x8xf32>
    %313 = tpu.matmul %311, %312, %cst_111 {dimension_numbers = #tpu.dot_dimension_numbers<[2], [1], [1], [2], [0, 0, 0, 1, 1, 2], [0], [0]>} : vector<2x8x16xbf16>, vector<2x16x8xbf16>, vector<2x8x8xf32> -> vector<2x8x8xf32>
    "tpu.trace_stop"() : () -> ()
    %314 = vector.extract_strided_slice %293 {offsets = [0, 0, 8], sizes = [2, 8, 8], strides = [1, 1, 1]} : vector<2x8x32xbf16> to vector<2x8x8xbf16>
    %315 = vector.extract_strided_slice %295 {offsets = [0, 0, 8], sizes = [2, 16, 8], strides = [1, 1, 1]} : vector<2x16x32xbf16> to vector<2x16x8xbf16>
    "tpu.trace_start"() <{level = 10 : i32, message = "bqd,bkd->bqk"}> : () -> ()
    %cst_112 = arith.constant dense<0.000000e+00> : vector<2x8x16xf32>
    %316 = tpu.matmul %314, %315, %cst_112 {dimension_numbers = #tpu.dot_dimension_numbers<[2], [2], [1], [1], [0, 0, 0, 1, 1, 1], [0], [0]>} : vector<2x8x8xbf16>, vector<2x16x8xbf16>, vector<2x8x16xf32> -> vector<2x8x16xf32>
    "tpu.trace_stop"() : () -> ()
    %cst_113 = arith.constant dense<0xFF800000> : vector<2x8xf32>
    %317 = vector.multi_reduction <maximumf>, %316, %cst_113 [2] : vector<2x8x16xf32> to vector<2x8xf32>
    %318 = vector.shape_cast %317 : vector<2x8xf32> to vector<2x8x1xf32>
    %319 = vector.broadcast %318 : vector<2x8x1xf32> to vector<2x8x16xf32>
    %320 = arith.subf %316, %319 : vector<2x8x16xf32>
    %321 = math.exp %320 : vector<2x8x16xf32>
    %cst_114 = arith.constant dense<0.000000e+00> : vector<2x8xf32>
    %322 = vector.multi_reduction <add>, %321, %cst_114 [2] : vector<2x8x16xf32> to vector<2x8xf32>
    %323 = vector.shape_cast %322 : vector<2x8xf32> to vector<2x8x1xf32>
    %324 = tpu.reciprocal %323 {approx = true} : vector<2x8x1xf32> -> vector<2x8x1xf32>
    %325 = vector.broadcast %324 : vector<2x8x1xf32> to vector<2x8x16xf32>
    %326 = arith.mulf %321, %325 : vector<2x8x16xf32>
    %327 = arith.truncf %326 : vector<2x8x16xf32> to vector<2x8x16xbf16>
    %328 = vector.extract_strided_slice %297 {offsets = [0, 0, 8], sizes = [2, 16, 8], strides = [1, 1, 1]} : vector<2x16x32xbf16> to vector<2x16x8xbf16>
    "tpu.trace_start"() <{level = 10 : i32, message = "bqk,bkd->bqd"}> : () -> ()
    %cst_115 = arith.constant dense<0.000000e+00> : vector<2x8x8xf32>
    %329 = tpu.matmul %327, %328, %cst_115 {dimension_numbers = #tpu.dot_dimension_numbers<[2], [1], [1], [2], [0, 0, 0, 1, 1, 2], [0], [0]>} : vector<2x8x16xbf16>, vector<2x16x8xbf16>, vector<2x8x8xf32> -> vector<2x8x8xf32>
    "tpu.trace_stop"() : () -> ()
    %330 = vector.extract_strided_slice %293 {offsets = [0, 0, 16], sizes = [2, 8, 8], strides = [1, 1, 1]} : vector<2x8x32xbf16> to vector<2x8x8xbf16>
    %331 = vector.extract_strided_slice %295 {offsets = [0, 0, 16], sizes = [2, 16, 8], strides = [1, 1, 1]} : vector<2x16x32xbf16> to vector<2x16x8xbf16>
    "tpu.trace_start"() <{level = 10 : i32, message = "bqd,bkd->bqk"}> : () -> ()
    %cst_116 = arith.constant dense<0.000000e+00> : vector<2x8x16xf32>
    %332 = tpu.matmul %330, %331, %cst_116 {dimension_numbers = #tpu.dot_dimension_numbers<[2], [2], [1], [1], [0, 0, 0, 1, 1, 1], [0], [0]>} : vector<2x8x8xbf16>, vector<2x16x8xbf16>, vector<2x8x16xf32> -> vector<2x8x16xf32>
    "tpu.trace_stop"() : () -> ()
    %cst_117 = arith.constant dense<0xFF800000> : vector<2x8xf32>
    %333 = vector.multi_reduction <maximumf>, %332, %cst_117 [2] : vector<2x8x16xf32> to vector<2x8xf32>
    %334 = vector.shape_cast %333 : vector<2x8xf32> to vector<2x8x1xf32>
    %335 = vector.broadcast %334 : vector<2x8x1xf32> to vector<2x8x16xf32>
    %336 = arith.subf %332, %335 : vector<2x8x16xf32>
    %337 = math.exp %336 : vector<2x8x16xf32>
    %cst_118 = arith.constant dense<0.000000e+00> : vector<2x8xf32>
    %338 = vector.multi_reduction <add>, %337, %cst_118 [2] : vector<2x8x16xf32> to vector<2x8xf32>
    %339 = vector.shape_cast %338 : vector<2x8xf32> to vector<2x8x1xf32>
    %340 = tpu.reciprocal %339 {approx = true} : vector<2x8x1xf32> -> vector<2x8x1xf32>
    %341 = vector.broadcast %340 : vector<2x8x1xf32> to vector<2x8x16xf32>
    %342 = arith.mulf %337, %341 : vector<2x8x16xf32>
    %343 = arith.truncf %342 : vector<2x8x16xf32> to vector<2x8x16xbf16>
    %344 = vector.extract_strided_slice %297 {offsets = [0, 0, 16], sizes = [2, 16, 8], strides = [1, 1, 1]} : vector<2x16x32xbf16> to vector<2x16x8xbf16>
    "tpu.trace_start"() <{level = 10 : i32, message = "bqk,bkd->bqd"}> : () -> ()
    %cst_119 = arith.constant dense<0.000000e+00> : vector<2x8x8xf32>
    %345 = tpu.matmul %343, %344, %cst_119 {dimension_numbers = #tpu.dot_dimension_numbers<[2], [1], [1], [2], [0, 0, 0, 1, 1, 2], [0], [0]>} : vector<2x8x16xbf16>, vector<2x16x8xbf16>, vector<2x8x8xf32> -> vector<2x8x8xf32>
    "tpu.trace_stop"() : () -> ()
    %346 = vector.extract_strided_slice %293 {offsets = [0, 0, 24], sizes = [2, 8, 8], strides = [1, 1, 1]} : vector<2x8x32xbf16> to vector<2x8x8xbf16>
    %347 = vector.extract_strided_slice %295 {offsets = [0, 0, 24], sizes = [2, 16, 8], strides = [1, 1, 1]} : vector<2x16x32xbf16> to vector<2x16x8xbf16>
    "tpu.trace_start"() <{level = 10 : i32, message = "bqd,bkd->bqk"}> : () -> ()
    %cst_120 = arith.constant dense<0.000000e+00> : vector<2x8x16xf32>
    %348 = tpu.matmul %346, %347, %cst_120 {dimension_numbers = #tpu.dot_dimension_numbers<[2], [2], [1], [1], [0, 0, 0, 1, 1, 1], [0], [0]>} : vector<2x8x8xbf16>, vector<2x16x8xbf16>, vector<2x8x16xf32> -> vector<2x8x16xf32>
    "tpu.trace_stop"() : () -> ()
    %cst_121 = arith.constant dense<0xFF800000> : vector<2x8xf32>
    %349 = vector.multi_reduction <maximumf>, %348, %cst_121 [2] : vector<2x8x16xf32> to vector<2x8xf32>
    %350 = vector.shape_cast %349 : vector<2x8xf32> to vector<2x8x1xf32>
    %351 = vector.broadcast %350 : vector<2x8x1xf32> to vector<2x8x16xf32>
    %352 = arith.subf %348, %351 : vector<2x8x16xf32>
    %353 = math.exp %352 : vector<2x8x16xf32>
    %cst_122 = arith.constant dense<0.000000e+00> : vector<2x8xf32>
    %354 = vector.multi_reduction <add>, %353, %cst_122 [2] : vector<2x8x16xf32> to vector<2x8xf32>
    %355 = vector.shape_cast %354 : vector<2x8xf32> to vector<2x8x1xf32>
    %356 = tpu.reciprocal %355 {approx = true} : vector<2x8x1xf32> -> vector<2x8x1xf32>
    %357 = vector.broadcast %356 : vector<2x8x1xf32> to vector<2x8x16xf32>
    %358 = arith.mulf %353, %357 : vector<2x8x16xf32>
    %359 = arith.truncf %358 : vector<2x8x16xf32> to vector<2x8x16xbf16>
    %360 = vector.extract_strided_slice %297 {offsets = [0, 0, 24], sizes = [2, 16, 8], strides = [1, 1, 1]} : vector<2x16x32xbf16> to vector<2x16x8xbf16>
    "tpu.trace_start"() <{level = 10 : i32, message = "bqk,bkd->bqd"}> : () -> ()
    %cst_123 = arith.constant dense<0.000000e+00> : vector<2x8x8xf32>
    %361 = tpu.matmul %359, %360, %cst_123 {dimension_numbers = #tpu.dot_dimension_numbers<[2], [1], [1], [2], [0, 0, 0, 1, 1, 2], [0], [0]>} : vector<2x8x16xbf16>, vector<2x16x8xbf16>, vector<2x8x8xf32> -> vector<2x8x8xf32>
    "tpu.trace_stop"() : () -> ()
    %362 = tpu.concatenate %313, %329, %345, %361 in 2 : vector<2x8x8xf32>, vector<2x8x8xf32>, vector<2x8x8xf32>, vector<2x8x8xf32> -> vector<2x8x32xf32>
    %363 = vector.shape_cast %362 : vector<2x8x32xf32> to vector<16x32xf32>
    %364 = arith.truncf %363 : vector<16x32xf32> to vector<16x32xbf16>
    %cst_124 = arith.constant dense<0.000000e+00> : vector<16x32xf32>
    %365 = tpu.matmul %364, %287, %cst_124 {dimension_numbers = #tpu.dot_dimension_numbers<[1], [0], [0], [1], [0, 0, 1, 1], [], []>} : vector<16x32xbf16>, vector<32x32xbf16>, vector<16x32xf32> -> vector<16x32xf32>
    %366 = vector.broadcast %289 : vector<1x32xf32> to vector<16x32xf32>
    %367 = arith.addf %365, %366 : vector<16x32xf32>
    %368 = arith.addf %262, %367 : vector<16x32xf32>
    %369 = vector.extract_strided_slice %8 {offsets = [2, 0], sizes = [1, 32], strides = [1, 1]} : vector<4x32xf32> to vector<1x32xf32>
    %370 = vector.extract_strided_slice %10 {offsets = [2, 0], sizes = [1, 32], strides = [1, 1]} : vector<4x32xf32> to vector<1x32xf32>
    %cst_125 = arith.constant dense<0.000000e+00> : vector<16xf32>
    %371 = vector.multi_reduction <add>, %368, %cst_125 [1] : vector<16x32xf32> to vector<16xf32>
    %372 = vector.shape_cast %371 : vector<16xf32> to vector<16x1xf32>
    %cst_126 = arith.constant 3.200000e+01 : f32
    %373 = vector.broadcast %cst_126 : f32 to vector<16x1xf32>
    %374 = arith.divf %372, %373 : vector<16x1xf32>
    %375 = vector.broadcast %374 : vector<16x1xf32> to vector<16x32xf32>
    %376 = arith.subf %368, %375 : vector<16x32xf32>
    %377 = arith.mulf %376, %376 : vector<16x32xf32>
    %cst_127 = arith.constant dense<0.000000e+00> : vector<16xf32>
    %378 = vector.multi_reduction <add>, %377, %cst_127 [1] : vector<16x32xf32> to vector<16xf32>
    %379 = vector.shape_cast %378 : vector<16xf32> to vector<16x1xf32>
    %cst_128 = arith.constant 3.200000e+01 : f32
    %380 = vector.broadcast %cst_128 : f32 to vector<16x1xf32>
    %381 = arith.divf %379, %380 : vector<16x1xf32>
    %cst_129 = arith.constant 9.99999974E-6 : f32
    %382 = vector.broadcast %cst_129 : f32 to vector<16x1xf32>
    %383 = arith.addf %381, %382 : vector<16x1xf32>
    %384 = math.rsqrt %383 : vector<16x1xf32>
    %385 = vector.broadcast %384 : vector<16x1xf32> to vector<16x32xf32>
    %386 = arith.mulf %376, %385 : vector<16x32xf32>
    %387 = vector.broadcast %369 : vector<1x32xf32> to vector<16x32xf32>
    %388 = arith.mulf %386, %387 : vector<16x32xf32>
    %389 = vector.broadcast %370 : vector<1x32xf32> to vector<16x32xf32>
    %390 = arith.addf %388, %389 : vector<16x32xf32>
    %c0_130 = arith.constant 0 : index
    %c0_131 = arith.constant 0 : index
    %c0_132 = arith.constant 0 : index
    %391 = vector.load %arg18[%c0_130, %c0_131, %c0_132] : memref<1x32x64xbf16, #tpu.memory_space<vmem>>, vector<1x32x64xbf16>
    %392 = vector.shape_cast %391 : vector<1x32x64xbf16> to vector<32x64xbf16>
    %c0_133 = arith.constant 0 : index
    %c0_134 = arith.constant 0 : index
    %c0_135 = arith.constant 0 : index
    %393 = vector.load %arg19[%c0_133, %c0_134, %c0_135] : memref<1x1x64xf32, #tpu.memory_space<vmem>>, vector<1x1x64xf32>
    %394 = vector.shape_cast %393 : vector<1x1x64xf32> to vector<1x64xf32>
    %395 = arith.truncf %390 : vector<16x32xf32> to vector<16x32xbf16>
    %cst_136 = arith.constant dense<0.000000e+00> : vector<16x64xf32>
    %396 = tpu.matmul %395, %392, %cst_136 {dimension_numbers = #tpu.dot_dimension_numbers<[1], [0], [0], [1], [0, 0, 1, 1], [], []>} : vector<16x32xbf16>, vector<32x64xbf16>, vector<16x64xf32> -> vector<16x64xf32>
    %397 = vector.broadcast %394 : vector<1x64xf32> to vector<16x64xf32>
    %398 = arith.addf %396, %397 : vector<16x64xf32>
    %cst_137 = arith.constant 0.000000e+00 : f32
    %399 = vector.broadcast %cst_137 : f32 to vector<16x64xf32>
    %400 = arith.maximumf %398, %399 : vector<16x64xf32>
    %c0_138 = arith.constant 0 : index
    %c0_139 = arith.constant 0 : index
    %c0_140 = arith.constant 0 : index
    %401 = vector.load %arg20[%c0_138, %c0_139, %c0_140] : memref<1x64x32xbf16, #tpu.memory_space<vmem>>, vector<1x64x32xbf16>
    %402 = vector.shape_cast %401 : vector<1x64x32xbf16> to vector<64x32xbf16>
    %c0_141 = arith.constant 0 : index
    %c0_142 = arith.constant 0 : index
    %c0_143 = arith.constant 0 : index
    %403 = vector.load %arg21[%c0_141, %c0_142, %c0_143] : memref<1x1x32xf32, #tpu.memory_space<vmem>>, vector<1x1x32xf32>
    %404 = vector.shape_cast %403 : vector<1x1x32xf32> to vector<1x32xf32>
    %405 = arith.truncf %400 : vector<16x64xf32> to vector<16x64xbf16>
    %cst_144 = arith.constant dense<0.000000e+00> : vector<16x32xf32>
    %406 = tpu.matmul %405, %402, %cst_144 {dimension_numbers = #tpu.dot_dimension_numbers<[1], [0], [0], [1], [0, 0, 1, 1], [], []>} : vector<16x64xbf16>, vector<64x32xbf16>, vector<16x32xf32> -> vector<16x32xf32>
    %407 = vector.broadcast %404 : vector<1x32xf32> to vector<16x32xf32>
    %408 = arith.addf %406, %407 : vector<16x32xf32>
    %409 = arith.addf %390, %408 : vector<16x32xf32>
    %410 = vector.extract_strided_slice %8 {offsets = [3, 0], sizes = [1, 32], strides = [1, 1]} : vector<4x32xf32> to vector<1x32xf32>
    %411 = vector.extract_strided_slice %10 {offsets = [3, 0], sizes = [1, 32], strides = [1, 1]} : vector<4x32xf32> to vector<1x32xf32>
    %cst_145 = arith.constant dense<0.000000e+00> : vector<16xf32>
    %412 = vector.multi_reduction <add>, %409, %cst_145 [1] : vector<16x32xf32> to vector<16xf32>
    %413 = vector.shape_cast %412 : vector<16xf32> to vector<16x1xf32>
    %cst_146 = arith.constant 3.200000e+01 : f32
    %414 = vector.broadcast %cst_146 : f32 to vector<16x1xf32>
    %415 = arith.divf %413, %414 : vector<16x1xf32>
    %416 = vector.broadcast %415 : vector<16x1xf32> to vector<16x32xf32>
    %417 = arith.subf %409, %416 : vector<16x32xf32>
    %418 = arith.mulf %417, %417 : vector<16x32xf32>
    %cst_147 = arith.constant dense<0.000000e+00> : vector<16xf32>
    %419 = vector.multi_reduction <add>, %418, %cst_147 [1] : vector<16x32xf32> to vector<16xf32>
    %420 = vector.shape_cast %419 : vector<16xf32> to vector<16x1xf32>
    %cst_148 = arith.constant 3.200000e+01 : f32
    %421 = vector.broadcast %cst_148 : f32 to vector<16x1xf32>
    %422 = arith.divf %420, %421 : vector<16x1xf32>
    %cst_149 = arith.constant 9.99999974E-6 : f32
    %423 = vector.broadcast %cst_149 : f32 to vector<16x1xf32>
    %424 = arith.addf %422, %423 : vector<16x1xf32>
    %425 = math.rsqrt %424 : vector<16x1xf32>
    %426 = vector.broadcast %425 : vector<16x1xf32> to vector<16x32xf32>
    %427 = arith.mulf %417, %426 : vector<16x32xf32>
    %428 = vector.broadcast %410 : vector<1x32xf32> to vector<16x32xf32>
    %429 = arith.mulf %427, %428 : vector<16x32xf32>
    %430 = vector.broadcast %411 : vector<1x32xf32> to vector<16x32xf32>
    %431 = arith.addf %429, %430 : vector<16x32xf32>
    %c0_150 = arith.constant 0 : index
    %c0_151 = arith.constant 0 : index
    %432 = vector.load %arg26[%c0_150, %c0_151] : memref<16x32xf32, #tpu.memory_space<vmem>>, vector<16x32xf32>
    tpu.vector_store %arg26[%c0_150, %c0_151], %431 {strides = array<i32>} : memref<16x32xf32, #tpu.memory_space<vmem>>, vector<16x32xf32>,
    %c1_i32 = arith.constant 1 : i32
    %433 = arith.cmpi eq, %arg0, %c1_i32 : i32
    %434 = arith.extui %433 : i1 to i32
    %c0_i32_152 = arith.constant 0 : i32
    %435 = arith.cmpi ne, %434, %c0_i32_152 : i32
    scf.if %435 {
      %c0_153 = arith.constant 0 : index
      %c0_154 = arith.constant 0 : index
      %436 = vector.load %arg24[%c0_153, %c0_154] : memref<1x32xf32, #tpu.memory_space<vmem>>, vector<1x32xf32>
      %c0_155 = arith.constant 0 : index
      %c0_156 = arith.constant 0 : index
      %437 = vector.load %arg25[%c0_155, %c0_156] : memref<1x32xf32, #tpu.memory_space<vmem>>, vector<1x32xf32>
      %cst_157 = arith.constant dense<0.000000e+00> : vector<16xf32>
      %438 = vector.multi_reduction <add>, %431, %cst_157 [1] : vector<16x32xf32> to vector<16xf32>
      %439 = vector.shape_cast %438 : vector<16xf32> to vector<16x1xf32>
      %cst_158 = arith.constant 3.200000e+01 : f32
      %440 = vector.broadcast %cst_158 : f32 to vector<16x1xf32>
      %441 = arith.divf %439, %440 : vector<16x1xf32>
      %442 = vector.broadcast %441 : vector<16x1xf32> to vector<16x32xf32>
      %443 = arith.subf %431, %442 : vector<16x32xf32>
      %444 = arith.mulf %443, %443 : vector<16x32xf32>
      %cst_159 = arith.constant dense<0.000000e+00> : vector<16xf32>
      %445 = vector.multi_reduction <add>, %444, %cst_159 [1] : vector<16x32xf32> to vector<16xf32>
      %446 = vector.shape_cast %445 : vector<16xf32> to vector<16x1xf32>
      %cst_160 = arith.constant 3.200000e+01 : f32
      %447 = vector.broadcast %cst_160 : f32 to vector<16x1xf32>
      %448 = arith.divf %446, %447 : vector<16x1xf32>
      %cst_161 = arith.constant 9.99999974E-6 : f32
      %449 = vector.broadcast %cst_161 : f32 to vector<16x1xf32>
      %450 = arith.addf %448, %449 : vector<16x1xf32>
      %451 = math.rsqrt %450 : vector<16x1xf32>
      %452 = vector.broadcast %451 : vector<16x1xf32> to vector<16x32xf32>
      %453 = arith.mulf %443, %452 : vector<16x32xf32>
      %454 = vector.broadcast %436 : vector<1x32xf32> to vector<16x32xf32>
      %455 = arith.mulf %453, %454 : vector<16x32xf32>
      %456 = vector.broadcast %437 : vector<1x32xf32> to vector<16x32xf32>
      %457 = arith.addf %455, %456 : vector<16x32xf32>
      %c0_162 = arith.constant 0 : index
      %c0_163 = arith.constant 0 : index
      %458 = vector.load %arg26[%c0_162, %c0_163] : memref<16x32xf32, #tpu.memory_space<vmem>>, vector<16x32xf32>
      tpu.vector_store %arg26[%c0_162, %c0_163], %457 {strides = array<i32>} : memref<16x32xf32, #tpu.memory_space<vmem>>, vector<16x32xf32>,
    } else {
    }
    return
  }
  func.func @transform_0(%arg0: i32) -> (i32, i32) {
    %c0_i32 = arith.constant 0 : i32
    %c0_i32_0 = arith.constant 0 : i32
    %c0_i32_1 = arith.constant 0 : i32
    return %c0_i32, %c0_i32_0 : i32, i32
  }
  func.func @transform_1(%arg0: i32) -> (i32, i32) {
    %c0_i32 = arith.constant 0 : i32
    %c0_i32_0 = arith.constant 0 : i32
    %c0_i32_1 = arith.constant 0 : i32
    return %c0_i32, %c0_i32_0 : i32, i32
  }
  func.func @transform_2(%arg0: i32) -> (i32, i32) {
    %c0_i32 = arith.constant 0 : i32
    %c0_i32_0 = arith.constant 0 : i32
    %c0_i32_1 = arith.constant 0 : i32
    return %c0_i32, %c0_i32_0 : i32, i32
  }
  func.func @transform_3(%arg0: i32) -> (i32, i32) {
    %c0_i32 = arith.constant 0 : i32
    %c0_i32_0 = arith.constant 0 : i32
    %c0_i32_1 = arith.constant 0 : i32
    return %c0_i32, %c0_i32_0 : i32, i32
  }
  func.func @transform_4(%arg0: i32) -> (i32, i32) {
    %c0_i32 = arith.constant 0 : i32
    %c0_i32_0 = arith.constant 0 : i32
    %c0_i32_1 = arith.constant 0 : i32
    return %c0_i32, %c0_i32_0 : i32, i32
  }
  func.func @transform_5(%arg0: i32) -> (i32, i32, i32) {
    %c0_i32 = arith.constant 0 : i32
    %c0_i32_0 = arith.constant 0 : i32
    %c0_i32_1 = arith.constant 0 : i32
    return %arg0, %c0_i32, %c0_i32_0 : i32, i32, i32
  }
  func.func @transform_6(%arg0: i32) -> (i32, i32, i32) {
    %c0_i32 = arith.constant 0 : i32
    %c0_i32_0 = arith.constant 0 : i32
    %c0_i32_1 = arith.constant 0 : i32
    return %arg0, %c0_i32, %c0_i32_0 : i32, i32, i32
  }
  func.func @transform_7(%arg0: i32) -> (i32, i32, i32) {
    %c0_i32 = arith.constant 0 : i32
    %c0_i32_0 = arith.constant 0 : i32
    %c0_i32_1 = arith.constant 0 : i32
    return %arg0, %c0_i32, %c0_i32_0 : i32, i32, i32
  }
  func.func @transform_8(%arg0: i32) -> (i32, i32, i32) {
    %c0_i32 = arith.constant 0 : i32
    %c0_i32_0 = arith.constant 0 : i32
    %c0_i32_1 = arith.constant 0 : i32
    return %arg0, %c0_i32, %c0_i32_0 : i32, i32, i32
  }
  func.func @transform_9(%arg0: i32) -> (i32, i32, i32) {
    %c0_i32 = arith.constant 0 : i32
    %c0_i32_0 = arith.constant 0 : i32
    %c0_i32_1 = arith.constant 0 : i32
    return %arg0, %c0_i32, %c0_i32_0 : i32, i32, i32
  }
  func.func @transform_10(%arg0: i32) -> (i32, i32, i32) {
    %c0_i32 = arith.constant 0 : i32
    %c0_i32_0 = arith.constant 0 : i32
    %c0_i32_1 = arith.constant 0 : i32
    return %arg0, %c0_i32, %c0_i32_0 : i32, i32, i32
  }
  func.func @transform_11(%arg0: i32) -> (i32, i32, i32) {
    %c0_i32 = arith.constant 0 : i32
    %c0_i32_0 = arith.constant 0 : i32
    %c0_i32_1 = arith.constant 0 : i32
    return %arg0, %c0_i32, %c0_i32_0 : i32, i32, i32
  }
  func.func @transform_12(%arg0: i32) -> (i32, i32, i32) {
    %c0_i32 = arith.constant 0 : i32
    %c0_i32_0 = arith.constant 0 : i32
    %c0_i32_1 = arith.constant 0 : i32
    return %arg0, %c0_i32, %c0_i32_0 : i32, i32, i32
  }
  func.func @transform_13(%arg0: i32) -> (i32, i32, i32) {
    %c0_i32 = arith.constant 0 : i32
    %c0_i32_0 = arith.constant 0 : i32
    %c0_i32_1 = arith.constant 0 : i32
    return %arg0, %c0_i32, %c0_i32_0 : i32, i32, i32
  }
  func.func @transform_14(%arg0: i32) -> (i32, i32, i32) {
    %c0_i32 = arith.constant 0 : i32
    %c0_i32_0 = arith.constant 0 : i32
    %c0_i32_1 = arith.constant 0 : i32
    return %arg0, %c0_i32, %c0_i32_0 : i32, i32, i32
  }
  func.func @transform_15(%arg0: i32) -> (i32, i32, i32) {
    %c0_i32 = arith.constant 0 : i32
    %c0_i32_0 = arith.constant 0 : i32
    %c0_i32_1 = arith.constant 0 : i32
    return %arg0, %c0_i32, %c0_i32_0 : i32, i32, i32
  }
  func.func @transform_16(%arg0: i32) -> (i32, i32, i32) {
    %c0_i32 = arith.constant 0 : i32
    %c0_i32_0 = arith.constant 0 : i32
    %c0_i32_1 = arith.constant 0 : i32
    return %arg0, %c0_i32, %c0_i32_0 : i32, i32, i32
  }
  func.func @transform_17(%arg0: i32) -> (i32, i32, i32) {
    %c0_i32 = arith.constant 0 : i32
    %c0_i32_0 = arith.constant 0 : i32
    %c0_i32_1 = arith.constant 0 : i32
    return %arg0, %c0_i32, %c0_i32_0 : i32, i32, i32
  }
  func.func @transform_18(%arg0: i32) -> (i32, i32, i32) {
    %c0_i32 = arith.constant 0 : i32
    %c0_i32_0 = arith.constant 0 : i32
    %c0_i32_1 = arith.constant 0 : i32
    return %arg0, %c0_i32, %c0_i32_0 : i32, i32, i32
  }
  func.func @transform_19(%arg0: i32) -> (i32, i32, i32) {
    %c0_i32 = arith.constant 0 : i32
    %c0_i32_0 = arith.constant 0 : i32
    %c0_i32_1 = arith.constant 0 : i32
    return %arg0, %c0_i32, %c0_i32_0 : i32, i32, i32
  }
  func.func @transform_20(%arg0: i32) -> (i32, i32, i32) {
    %c0_i32 = arith.constant 0 : i32
    %c0_i32_0 = arith.constant 0 : i32
    %c0_i32_1 = arith.constant 0 : i32
    return %arg0, %c0_i32, %c0_i32_0 : i32, i32, i32
  }
  func.func @transform_21(%arg0: i32) -> (i32, i32, i32) {
    %c0_i32 = arith.constant 0 : i32
    %c0_i32_0 = arith.constant 0 : i32
    %c0_i32_1 = arith.constant 0 : i32
    return %arg0, %c0_i32, %c0_i32_0 : i32, i32, i32
  }
  func.func @transform_22(%arg0: i32) -> (i32, i32, i32) {
    %c0_i32 = arith.constant 0 : i32
    %c0_i32_0 = arith.constant 0 : i32
    %c0_i32_1 = arith.constant 0 : i32
    return %arg0, %c0_i32, %c0_i32_0 : i32, i32, i32
  }
  func.func @transform_23(%arg0: i32) -> (i32, i32) {
    %c0_i32 = arith.constant 0 : i32
    %c0_i32_0 = arith.constant 0 : i32
    %c0_i32_1 = arith.constant 0 : i32
    return %c0_i32, %c0_i32_0 : i32, i32
  }
  func.func @transform_24(%arg0: i32) -> (i32, i32) {
    %c0_i32 = arith.constant 0 : i32
    %c0_i32_0 = arith.constant 0 : i32
    %c0_i32_1 = arith.constant 0 : i32
    return %c0_i32, %c0_i32_0 : i32, i32
  }
  func.func @transform_25(%arg0: i32) -> (i32, i32) {
    %c0_i32 = arith.constant 0 : i32
    %c0_i32_0 = arith.constant 0 : i32
    %c0_i32_1 = arith.constant 0 : i32
    return %c0_i32, %c0_i32_0 : i32, i32
  }
}

</mosaic_0001>

<bundles_post_ra>
// kernel: tpu_custom_call.1
= control target key start
LH: loop header
LB: loop body
LE: loop exit
PB: predicated region body
PF: predicated region fallthrough
CT: control target
= control target key end

     0   :  { %s8608_s0 = inlined_call_operand.hbm [shape: f32[16,32], index: 0, kind: input, shape index: {}]   ;;  %s8609_s1 = inlined_call_operand.vmem [shape: f32[32,32], index: 1, kind: input, shape index: {}]   ;;  %s8610_s2 = inlined_call_operand.vmem [shape: f32[32,32], index: 2, kind: input, shape index: {}]   ;;  %s8611_s3 = inlined_call_operand.hbm [shape: f32[16,32], index: 3, kind: input, shape index: {}]   ;;  %s8612_s4 = inlined_call_operand.vmem [shape: f32[32,32], index: 4, kind: input, shape index: {}]   ;;  %s8613_s5 = inlined_call_operand.hbm [shape: bf16[2,32,96], index: 5, kind: input, shape index: {}]   ;;  %s8614_s6 = inlined_call_operand.hbm [shape: f32[2,1,96], index: 6, kind: input, shape index: {}]   ;;  %s8615_s7 = inlined_call_operand.hbm [shape: bf16[2,32,32], index: 7, kind: input, shape index: {}]   ;;  %s8616_s8 = inlined_call_operand.hbm [shape: f32[2,1,32], index: 8, kind: input, shape index: {}]   ;;  %s8617_s9 = inlined_call_operand.vmem [shape: bf16[2,32,96], index: 9, kind: input, shape index: {}]   ;;  %s8618_s10 = inlined_call_operand.hbm [shape: f32[2,1,96], index: 10, kind: input, shape index: {}]   ;;  %s8619_s11 = inlined_call_operand.hbm [shape: bf16[2,32,32], index: 11, kind: input, shape index: {}]   ;;  %s8620_s12 = inlined_call_operand.hbm [shape: f32[2,1,32], index: 12, kind: input, shape index: {}]   ;;  %s8621_s13 = inlined_call_operand.hbm [shape: bf16[2,32,96], index: 13, kind: input, shape index: {}]   ;;  %s8622_s14 = inlined_call_operand.hbm [shape: f32[2,1,96], index: 14, kind: input, shape index: {}]   ;;  %s8623_s15 = inlined_call_operand.hbm [shape: bf16[2,32,32], index: 15, kind: input, shape index: {}]   ;;  %s8624_s16 = inlined_call_operand.hbm [shape: f32[2,1,32], index: 16, kind: input, shape index: {}]   ;;  %s8625_s17 = inlined_call_operand.hbm [shape: bf16[2,32,64], index: 17, kind: input, shape index: {}]   ;;  %s8626_s18 = inlined_call_operand.vmem [shape: f32[2,1,64], index: 18, kind: input, shape index: {}]   ;;  %s8627_s19 = inlined_call_operand.vmem [shape: bf16[2,64,32], index: 19, kind: input, shape index: {}]   ;;  %s8628_s20 = inlined_call_operand.hbm [shape: f32[2,1,32], index: 20, kind: input, shape index: {}]   ;;  %s8629_s21 = inlined_call_operand.vmem [shape: f32[2,4,32], index: 21, kind: input, shape index: {}]   ;;  %s8630_s22 = inlined_call_operand.vmem [shape: f32[2,4,32], index: 22, kind: input, shape index: {}]   ;;  %s8631_s23 = inlined_call_operand.vmem [shape: f32[1,32], index: 23, kind: input, shape index: {}]   ;;  %s8632_s24 = inlined_call_operand.vmem [shape: f32[1,32], index: 24, kind: input, shape index: {}]   ;;  %s8633_s25 = inlined_call_operand.hbm [shape: f32[16,32], index: 25, kind: output, shape index: {}]  }
   0x1   :  { %8682 = sst [smem:[#allocation34_spill]] %s8608_s0 }
   0x2   :  { %8683 = sst [smem:[#allocation35_spill]] %s8609_s1 }
   0x3   :  { %8684 = sst [smem:[#allocation36_spill]] %s8610_s2 }
   0x4   :  { %8685 = sst [smem:[#allocation37_spill]] %s8611_s3 }
   0x5   :  { %8686 = sst [smem:[#allocation38_spill]] %s8612_s4 }
   0x6   :  { %8687 = sst [smem:[#allocation39_spill]] %s8613_s5 }
   0x7   :  { %8688 = sst [smem:[#allocation40_spill]] %s8614_s6 }
   0x8   :  { %8689 = sst [smem:[#allocation41_spill]] %s8615_s7 }
   0x9   :  { %8690 = sst [smem:[#allocation42_spill]] %s8616_s8 }
   0xa   :  { %8691 = sst [smem:[#allocation43_spill]] %s8617_s9 }
   0xb   :  { %8692 = sst [smem:[#allocation44_spill]] %s8618_s10 }
   0xc   :  { %8693 = sst [smem:[#allocation45_spill]] %s8619_s11 }
   0xd   :  { %8694 = sst [smem:[#allocation46_spill]] %s8620_s12 }
   0xe   :  { %8695 = sst [smem:[#allocation47_spill]] %s8621_s13 }
   0xf   :  { %8696 = sst [smem:[#allocation48_spill]] %s8622_s14 }
  0x10   :  { %8697 = sst [smem:[#allocation49_spill]] %s8623_s15 }
  0x11   :  { %8698 = sst [smem:[#allocation50_spill]] %s8626_s18 }
  0x12   :  { %8699 = sst [smem:[#allocation51_spill]] %s8627_s19 }
  0x13   :  { %8700 = sst [smem:[#allocation52_spill]] %s8629_s21 }
  0x14   :  { %8701 = sst [smem:[#allocation53_spill]] %s8630_s22 }
  0x15   :  { %8702 = sst [smem:[#allocation54_spill]] %s8631_s23 }
  0x16   :  { %8703 = sst [smem:[#allocation55_spill]] %s8632_s24 }
  0x17   :  { %8704 = sst [smem:[#allocation56_spill]] %s8633_s25 }
  0x18   :  { %30 = vsyncpa [#allocation5], 0 }
  0x19   :  { %31 = vsyncpa [#allocation8], 0 }
  0x1a   :  { %32 = vsyncpa [#allocation6], 0  ;;  %s7204_s29 = smov 0   ;;  %s7206_s2 = smov 0  }
  0x1b   :  { %s7208_s6 = smov 0   ;;  %s7210_s30 = smov 0  }
  0x1c LB: > { %8705 = sst [smem:[#allocation27_spill]] %s7030_s2  ;;  %s7223_s7 = sadd.s32 4294967295, %s7038_s30   ;;  %s7038_s30 = sphi %s7210_s30, %s8786_s30   ;;  %s7034_s6 = sphi %s7208_s6, %s8789_s6   ;;  %s7030_s2 = sphi %s7206_s2, %s8788_s2   ;;  %s7026_s29 = sphi %s7204_s29, %s8787_s29  }
  0x1d   : > { %8706 = sst [smem:[#allocation28_spill]] %s7034_s6  ;;  %s7226_s3 = sadd.s32 1, %s7038_s30  }
  0x1e   : > { %8707 = sst [smem:[#allocation29_spill]] %s7223_s7  ;;  %s147_s26 = ssub.s32 %s7038_s30, %s7226_s3 }
  0x1f   : > { %8708 = sst [smem:[#allocation30_spill]] %s7226_s3  ;;  %s150_s1 = sadd.s32 1, %s7034_s6 }
  0x20   : > { %p148_p0 = scmp.eq.s32.totalorder %s147_s26, 0  ;;  %p157_p1 = scmp.ne.s32.totalorder %s7034_s6, %s7030_s2 }
  0x21   : > { %p158_p2 = scmp.eq.s32.totalorder %s7038_s30, 0  ;;  %p163_p3 = scmp.ne.s32.totalorder %s7030_s2, %s7026_s29 }
  0x22   : > { %s7236_s8 = scalar_select %p148_p0, %s7034_s6, %s150_s1  }
  0x23   : > { %p7238_p4 = por %p158_p2, %p157_p1  ;;  %p8649_p5 = scmp.eq.s32.totalorder %s7223_s7, 0 }
  0x24   : > { %8709 = sst [smem:[#allocation31_spill]] %s7236_s8  ;;  %p5504_p6 = scmp.ge.s32.totalorder %s7038_s30, 1 }
  0x25   : > { %p679_p7 = scmp.lt.s32.totalorder %s7038_s30, 3  ;;  %p7247_p8 = por %p8649_p5, %p163_p3 }
  0x26   : > { %s7040_s9 = smov [#allocation4]   ;;  %p6279_p13 = scmp.lt.s32.totalorder %s7038_s30, 2 }
  0x27   : > { %s8711_s4 = scalar_select %p7247_p8, 1, 0 }
  0x28   : > { %p7252_p10 = pnand %p5504_p6, %p679_p7  ;;  %s691_s5 = sshll.u32 %s7040_s9, 4  ;;  %s692_s5 = int_to_ptr.vmem [resolvable:$true] %s691_s5 }
  0x29   : > { %8712 = sst [smem:[#allocation32_spill]] %s8711_s4  ;;  %s7266_s29 = sand.u32 1, %s7034_s6  }
  0x2a   : > { %s8713_s28 = scalar_select %p7252_p10, 1, 0 }
  0x2b   : > { %p6230_p11 = pneg %p7252_p10  ;;  %s733_s26 = sand.u32 1, %s7038_s30  }
  0x2c   : > { %8714 = sst [smem:[#allocation33_spill]] %s8713_s28  ;;  %p7271_p0 = pnand %p6279_p13, %p7238_p4 }
  0x2d   : > { %p7260_p12 = pnand %p6230_p11, %p8649_p5  ;;  %s8717_s3 = sld [smem:[#allocation34_spill]] }
  0x2e   : > { %s8716_s1 = scalar_select %p7271_p0, 1, 0 }
  0x2f   : > { %s8715_s0 = scalar_select %p7260_p12, 1, 0 }
  0x30   : > { %p8657_p2 = pneg %p7260_p12 }
  0x33   : > { %s6520_s25 = scalar_lea.hbm %s8717_s3, 256 }
  0x34   : > { %p6521_p1 = scmp.ne.s32.totalorder %s8717_s3, %s6520_s25  ;;  %p6527_p4 = scmp.lt.u32.totalorder %s6520_s25, %s8717_s3 }
  0x36   : > { %p6523_p3 = pnand %p8657_p2, %p6521_p1 }
  0x38   : > { %p6524_p6 = pneg %p6523_p3 }
  0x3a   : > { %p6529_p7 = pnand %p6527_p4, %p6524_p6 }
  0x3c   : > { %6532 = shalt.err (!%p6529_p7)
}
  0x3d   : > { %s6533_s22 = scalar_lea.vmem %s692_s5, 256  ;;  %p6541_p5 = scmp.lt.s32.totalorder %s692_s5, %s692_s5 }
  0x3e   : > { %p6534_p11 = scmp.ne.s32.totalorder %s692_s5, %s6533_s22  ;;  %p6542_p8 = scmp.lt.s32.totalorder %s6533_s22, %s6533_s22 }
  0x40   : > { %p6536_p13 = pnand %p6534_p11, %p8657_p2  ;;  %p6543_p10 = por %p6542_p8, %p6541_p5 }
  0x42   : > { %p6537_p9 = pneg %p6536_p13 }
  0x44   : > { %p6544_p0 = pnand %p6543_p10, %p6537_p9 }
  0x46   : > { %6547 = shalt.err (!%p6544_p0)
}
  0x47   : > { %s8655_s23 = smov 128   ;;  %s8656_s24 = smov 8  }
  0x48   : > { %6233 = dma.hbm_to_vmem [thread:$0]  (!%p7260_p12), %s8717_s3, 256, %s692_s5, [#allocation5], %s8655_s23, %s8655_s23, %s8656_s24  }
  0x49   : > { %s7301_s8 = sshll.u32 %s7266_s29, 4  ;;  %s7304_s22 = sshll.u32 %s7038_s30, 8 }
  0x4a   : > { %s8718_s21 = sld [smem:[#allocation39_spill]]  ;;  %s737_s18 = scalar_lea.vmem [#allocation9], %s7301_s8 }
  0x4b   : > { %s744_s4 = sshll.u32 %s737_s18, 4  ;;  %s7315_s5 = scalar_lea.sflag [#allocation5], %s733_s26  ;;  %s7313_s4 = int_to_ptr.vmem [resolvable:$true] %s744_s4 }
  0x4c   : > { %p8719_p8 = scmp.ne.s32.totalorder %s8716_s1, 0 }
  0x4e   : > { %p7321_p9 = pneg %p8719_p8 }
  0x50   : > { %s7310_s19 = scalar_lea.hbm %s8718_s21, %s7304_s22  ;;  %s6553_s23 = scalar_lea.hbm %s8718_s21, 512 }
  0x51   : > { %s6548_s25 = scalar_lea.hbm %s7310_s19, 256  ;;  %p6554_p1 = scmp.lt.u32.totalorder %s7310_s19, %s8718_s21 }
  0x52   : > { %p6549_p5 = scmp.ne.s32.totalorder %s7310_s19, %s6548_s25  ;;  %p6555_p3 = scmp.lt.u32.totalorder %s6553_s23, %s6548_s25 }
  0x53   : > { %s8720_s6 = scalar_select %p7321_p9, 1, 0 }
  0x54   : > { %p6551_p10 = pnand %p7321_p9, %p6549_p5  ;;  %p6556_p6 = por %p6555_p3, %p6554_p1 }
  0x55   : > { %p6557_p4 = scmp.lt.u32.totalorder %s6548_s25, %s7310_s19 }
  0x56   : > { %p6552_p0 = pneg %p6551_p10 }
  0x57   : > { %p6558_p7 = por %p6557_p4, %p6556_p6 }
  0x59   : > { %p6559_p11 = pnand %p6558_p7, %p6552_p0 }
  0x5b   : > { %6562 = shalt.err (!%p6559_p11)
}
  0x5c   : > { %s6563_s26 = scalar_lea.vmem %s7313_s4, 256  ;;  %s7043_s9 = smov [#allocation9]  }
  0x5d   : > { %p6564_p13 = scmp.ne.s32.totalorder %s7313_s4, %s6563_s26  ;;  %s6568_s27 = sshll.u32 %s7043_s9, 4  ;;  %s6569_s27 = int_to_ptr.vmem [resolvable:$false] %s6568_s27 }
  0x5e   : > { %s6570_s24 = scalar_lea.vmem %s6569_s27, 512  ;;  %p6571_p2 = scmp.lt.s32.totalorder %s7313_s4, %s6569_s27 }
  0x5f   : > { %p6566_p5 = pnand %p6564_p13, %p7321_p9  ;;  %p6572_p12 = scmp.lt.s32.totalorder %s6570_s24, %s6563_s26 }
  0x61   : > { %p6567_p10 = pneg %p6566_p5  ;;  %p6573_p1 = por %p6572_p12, %p6571_p2 }
  0x63   : > { %p6574_p3 = pnand %p6573_p1, %p6567_p10 }
  0x65   : > { %6577 = shalt.err (!%p6574_p3)
}
  0x66   : > { %s8663_s23 = smov 64   ;;  %s8665_s25 = smov 4  }
  0x67   : > { %6240 = dma.hbm_to_vmem [thread:$0]  (!%p8719_p8), %s7310_s19, 256, %s7313_s4, %s7315_s5, %s8663_s23, %s8663_s23, %s8665_s25  }
  0x68   : > { %s7349_s18 = sshll.u32 %s7038_s30, 4  ;;  %s8721_s27 = sld [smem:[#allocation40_spill]] }
  0x69   : > { %s757_s3 = scalar_lea.vmem [#allocation10], %s7266_s29 }
  0x6a   : > { %s764_s21 = sshll.u32 %s757_s3, 4  ;;  %s765_s21 = int_to_ptr.vmem [resolvable:$true] %s764_s21 }
  0x6e   : > { %s7355_s24 = scalar_lea.hbm %s8721_s27, %s7349_s18  ;;  %s6583_s4 = scalar_lea.hbm %s8721_s27, 32 }
  0x6f   : > { %s6578_s2 = scalar_lea.hbm %s7355_s24, 16  ;;  %p6584_p6 = scmp.lt.u32.totalorder %s7355_s24, %s8721_s27 }
  0x70   : > { %p6579_p12 = scmp.ne.s32.totalorder %s7355_s24, %s6578_s2  ;;  %p6585_p4 = scmp.lt.u32.totalorder %s6583_s4, %s6578_s2 }
  0x71   : > { %p6587_p11 = scmp.lt.u32.totalorder %s6578_s2, %s7355_s24 }
  0x72   : > { %p6581_p2 = pnand %p6579_p12, %p7321_p9  ;;  %p6586_p7 = por %p6585_p4, %p6584_p6 }
  0x74   : > { %p6582_p0 = pneg %p6581_p2  ;;  %p6588_p13 = por %p6587_p11, %p6586_p7 }
  0x76   : > { %p6589_p5 = pnand %p6588_p13, %p6582_p0 }
  0x78   : > { %6592 = shalt.err (!%p6589_p5)
}
  0x79   : > { %s6593_s3 = scalar_lea.vmem %s765_s21, 16  ;;  %s7046_s9 = smov [#allocation10]  }
  0x7a   : > { %p6594_p10 = scmp.ne.s32.totalorder %s765_s21, %s6593_s3  ;;  %s6598_s25 = sshll.u32 %s7046_s9, 4  ;;  %s6599_s25 = int_to_ptr.vmem [resolvable:$false] %s6598_s25 }
  0x7b   : > { %s6600_s19 = scalar_lea.vmem %s6599_s25, 32  ;;  %p6601_p12 = scmp.lt.s32.totalorder %s765_s21, %s6599_s25 }
  0x7c   : > { %p6596_p1 = pnand %p6594_p10, %p7321_p9  ;;  %p6602_p2 = scmp.lt.s32.totalorder %s6600_s19, %s6593_s3 }
  0x7e   : > { %p6597_p3 = pneg %p6596_p1  ;;  %p6603_p8 = por %p6602_p2, %p6601_p12 }
  0x80   : > { %p6604_p4 = pnand %p6603_p8, %p6597_p3 }
  0x82   : > { %6607 = shalt.err (!%p6604_p4)
}
  0x83   : > { %p8722_p6 = scmp.ne.s32.totalorder %s8716_s1, 0  ;;  %s8723_s30 = sld [smem:[#allocation41_spill]] }
  0x84   : > { %s775_s25 = scalar_lea.vmem [#allocation11], %s7301_s8 }
  0x85   : > { %6243 = dma.hbm_to_vmem [thread:$0]  (!%p8722_p6), %s7355_s24, 16, %s765_s21, %s7315_s5  }
  0x86   : > { %s782_s3 = sshll.u32 %s775_s25, 4  ;;  %s7383_s3 = int_to_ptr.vmem [resolvable:$true] %s782_s3 }
  0x89   : > { %s8724_s4 = smov %s8723_s30  ;;  %s7380_s26 = scalar_lea.hbm %s8723_s30, %s7304_s22 }
  0x8a   : > { %s6608_s9 = scalar_lea.hbm %s7380_s26, 256  ;;  %s6613_s24 = scalar_lea.hbm %s8724_s4, 512 }
  0x8b   : > { %p6609_p8 = scmp.ne.s32.totalorder %s7380_s26, %s6608_s9  ;;  %p6614_p11 = scmp.lt.u32.totalorder %s7380_s26, %s8724_s4 }
  0x8c   : > { %p6615_p13 = scmp.lt.u32.totalorder %s6613_s24, %s6608_s9  ;;  %p6617_p10 = scmp.lt.u32.totalorder %s6608_s9, %s7380_s26 }
  0x8d   : > { %p6611_p0 = pnand %p6609_p8, %p7321_p9 }
  0x8e   : > { %p6616_p5 = por %p6615_p13, %p6614_p11 }
  0x8f   : > { %p6612_p7 = pneg %p6611_p0 }
  0x90   : > { %p6618_p1 = por %p6617_p10, %p6616_p5 }
  0x92   : > { %p6619_p3 = pnand %p6618_p1, %p6612_p7 }
  0x94   : > { %6622 = shalt.err (!%p6619_p3)
}
  0x95   : > { %s6623_s30 = scalar_lea.vmem %s7383_s3, 256  ;;  %s7047_s25 = smov [#allocation11]  }
  0x96   : > { %p6624_p12 = scmp.ne.s32.totalorder %s7383_s3, %s6623_s30  ;;  %s6628_s19 = sshll.u32 %s7047_s25, 4  ;;  %s6629_s19 = int_to_ptr.vmem [resolvable:$false] %s6628_s19 }
  0x97   : > { %s6630_s21 = scalar_lea.vmem %s6629_s19, 512  ;;  %p6631_p8 = scmp.lt.s32.totalorder %s7383_s3, %s6629_s19 }
  0x98   : > { %p6626_p2 = pnand %p6624_p12, %p7321_p9  ;;  %p6632_p0 = scmp.lt.s32.totalorder %s6630_s21, %s6623_s30 }
  0x9a   : > { %p6627_p4 = pneg %p6626_p2  ;;  %p6633_p11 = por %p6632_p0, %p6631_p8 }
  0x9c   : > { %p6634_p13 = pnand %p6633_p11, %p6627_p4 }
  0x9e   : > { %6637 = shalt.err (!%p6634_p13)
}
  0x9f   : > { %s8725_s9 = smov 4   ;;  %s8726_s24 = smov 64  }
  0xa0   : > { %6246 = dma.hbm_to_vmem [thread:$0]  (!%p8722_p6), %s7380_s26, 256, %s7383_s3, %s7315_s5, %s8726_s24, %s8726_s24, %s8725_s9  }
  0xa1   : > { %s8727_s25 = sld [smem:[#allocation42_spill]]  ;;  %s795_s30 = scalar_lea.vmem [#allocation12], %s7266_s29 }
  0xa2   : > { %s802_s21 = sshll.u32 %s795_s30, 4  ;;  %s803_s21 = int_to_ptr.vmem [resolvable:$true] %s802_s21 }
  0xa7   : > { %s7414_s19 = scalar_lea.hbm %s8727_s25, %s7349_s18  ;;  %s6643_s26 = scalar_lea.hbm %s8727_s25, 32 }
  0xa8   : > { %s6638_s4 = scalar_lea.hbm %s7414_s19, 16  ;;  %p6644_p1 = scmp.lt.u32.totalorder %s7414_s19, %s8727_s25 }
  0xa9   : > { %p6639_p7 = scmp.ne.s32.totalorder %s7414_s19, %s6638_s4  ;;  %p6645_p3 = scmp.lt.u32.totalorder %s6643_s26, %s6638_s4 }
  0xaa   : > { %p6647_p2 = scmp.lt.u32.totalorder %s6638_s4, %s7414_s19 }
  0xab   : > { %p6641_p5 = pnand %p6639_p7, %p7321_p9  ;;  %p6646_p12 = por %p6645_p3, %p6644_p1 }
  0xad   : > { %p6642_p10 = pneg %p6641_p5  ;;  %p6648_p4 = por %p6647_p2, %p6646_p12 }
  0xaf   : > { %p6649_p8 = pnand %p6648_p4, %p6642_p10 }
  0xb1   : > { %6652 = shalt.err (!%p6649_p8)
}
  0xb2   : > { %s6653_s23 = scalar_lea.vmem %s803_s21, 16  ;;  %s7048_s30 = smov [#allocation12]  }
  0xb3   : > { %p6654_p0 = scmp.ne.s32.totalorder %s803_s21, %s6653_s23  ;;  %s6658_s28 = sshll.u32 %s7048_s30, 4  ;;  %s6659_s28 = int_to_ptr.vmem [resolvable:$false] %s6658_s28 }
  0xb4   : > { %s6660_s7 = scalar_lea.vmem %s6659_s28, 32  ;;  %p6661_p7 = scmp.lt.s32.totalorder %s803_s21, %s6659_s28 }
  0xb5   : > { %p6656_p11 = pnand %p6654_p0, %p7321_p9  ;;  %p6662_p5 = scmp.lt.s32.totalorder %s6660_s7, %s6653_s23 }
  0xb7   : > { %p6657_p13 = pneg %p6656_p11  ;;  %p6663_p6 = por %p6662_p5, %p6661_p7 }
  0xb9   : > { %p6664_p1 = pnand %p6663_p6, %p6657_p13 }
  0xbb   : > { %6667 = shalt.err (!%p6664_p1)
}
  0xbc   : > { %p8728_p3 = scmp.ne.s32.totalorder %s8716_s1, 0  ;;  %s8729_s10 = sld [smem:[#allocation44_spill]] }
  0xbd   : > { %s820_s28 = scalar_lea.vmem [#allocation13], %s7266_s29 }
  0xbe   : > { %6249 = dma.hbm_to_vmem [thread:$0]  (!%p8728_p3), %s7414_s19, 16, %s803_s21, %s7315_s5  }
  0xbf   : > { %s827_s3 = sshll.u32 %s820_s28, 4  ;;  %s828_s3 = int_to_ptr.vmem [resolvable:$true] %s827_s3 }
  0xc2   : > { %s7439_s26 = scalar_lea.hbm %s8729_s10, %s7349_s18  ;;  %s6673_s19 = scalar_lea.hbm %s8729_s10, 32 }
  0xc3   : > { %s6668_s2 = scalar_lea.hbm %s7439_s26, 16  ;;  %p6674_p2 = scmp.lt.u32.totalorder %s7439_s26, %s8729_s10 }
  0xc4   : > { %p6669_p6 = scmp.ne.s32.totalorder %s7439_s26, %s6668_s2  ;;  %p6675_p4 = scmp.lt.u32.totalorder %s6673_s19, %s6668_s2 }
  0xc5   : > { %p6677_p0 = scmp.lt.u32.totalorder %s6668_s2, %s7439_s26 }
  0xc6   : > { %p6671_p10 = pnand %p6669_p6, %p7321_p9  ;;  %p6676_p8 = por %p6675_p4, %p6674_p2 }
  0xc8   : > { %p6672_p12 = pneg %p6671_p10  ;;  %p6678_p11 = por %p6677_p0, %p6676_p8 }
  0xca   : > { %p6679_p13 = pnand %p6678_p11, %p6672_p12 }
  0xcc   : > { %6682 = shalt.err (!%p6679_p13)
}
  0xcd   : > { %s6683_s27 = scalar_lea.vmem %s828_s3, 16  ;;  %s7049_s4 = smov [#allocation13]  }
  0xce   : > { %p6684_p7 = scmp.ne.s32.totalorder %s828_s3, %s6683_s27  ;;  %s6688_s28 = sshll.u32 %s7049_s4, 4  ;;  %s6689_s28 = int_to_ptr.vmem [resolvable:$false] %s6688_s28 }
  0xcf   : > { %s6690_s23 = scalar_lea.vmem %s6689_s28, 32  ;;  %p6691_p6 = scmp.lt.s32.totalorder %s828_s3, %s6689_s28 }
  0xd0   : > { %p6686_p5 = pnand %p6684_p7, %p7321_p9  ;;  %p6692_p10 = scmp.lt.s32.totalorder %s6690_s23, %s6683_s27 }
  0xd2   : > { %p6687_p1 = pneg %p6686_p5  ;;  %p6693_p3 = por %p6692_p10, %p6691_p6 }
  0xd4   : > { %p6694_p2 = pnand %p6693_p3, %p6687_p1 }
  0xd6   : > { %6697 = shalt.err (!%p6694_p2)
}
  0xd7   : > { %p8730_p4 = scmp.ne.s32.totalorder %s8716_s1, 0  ;;  %s8731_s11 = sld [smem:[#allocation45_spill]] }
  0xd8   : > { %s838_s21 = scalar_lea.vmem [#allocation14], %s7301_s8 }
  0xd9   : > { %6252 = dma.hbm_to_vmem [thread:$0]  (!%p8730_p4), %s7439_s26, 16, %s828_s3, %s7315_s5  }
  0xda   : > { %s845_s7 = sshll.u32 %s838_s21, 4  ;;  %s7467_s7 = int_to_ptr.vmem [resolvable:$true] %s845_s7 }
  0xdd   : > { %s7464_s19 = scalar_lea.hbm %s8731_s11, %s7304_s22  ;;  %s6703_s3 = scalar_lea.hbm %s8731_s11, 512 }
  0xde   : > { %s6698_s27 = scalar_lea.hbm %s7464_s19, 256  ;;  %p6704_p0 = scmp.lt.u32.totalorder %s7464_s19, %s8731_s11 }
  0xdf   : > { %p6699_p3 = scmp.ne.s32.totalorder %s7464_s19, %s6698_s27  ;;  %p6705_p11 = scmp.lt.u32.totalorder %s6703_s3, %s6698_s27 }
  0xe0   : > { %p6707_p7 = scmp.lt.u32.totalorder %s6698_s27, %s7464_s19 }
  0xe1   : > { %p6701_p12 = pnand %p6699_p3, %p7321_p9  ;;  %p6706_p13 = por %p6705_p11, %p6704_p0 }
  0xe3   : > { %p6702_p8 = pneg %p6701_p12  ;;  %p6708_p5 = por %p6707_p7, %p6706_p13 }
  0xe5   : > { %p6709_p1 = pnand %p6708_p5, %p6702_p8 }
  0xe7   : > { %6712 = shalt.err (!%p6709_p1)
}
  0xe8   : > { %s6713_s2 = scalar_lea.vmem %s7467_s7, 256  ;;  %s7050_s30 = smov [#allocation14]  }
  0xe9   : > { %p6714_p6 = scmp.ne.s32.totalorder %s7467_s7, %s6713_s2  ;;  %s6718_s21 = sshll.u32 %s7050_s30, 4  ;;  %s6719_s21 = int_to_ptr.vmem [resolvable:$false] %s6718_s21 }
  0xea   : > { %s6720_s4 = scalar_lea.vmem %s6719_s21, 512  ;;  %p6721_p3 = scmp.lt.s32.totalorder %s7467_s7, %s6719_s21 }
  0xeb   : > { %p6716_p10 = pnand %p6714_p6, %p7321_p9  ;;  %p6722_p12 = scmp.lt.s32.totalorder %s6720_s4, %s6713_s2 }
  0xed   : > { %p6717_p2 = pneg %p6716_p10  ;;  %p6723_p0 = por %p6722_p12, %p6721_p3 }
  0xef   : > { %p6724_p11 = pnand %p6723_p0, %p6717_p2 }
  0xf1   : > { %6727 = shalt.err (!%p6724_p11)
}
  0xf2   : > { %6255 = dma.hbm_to_vmem [thread:$0]  (!%p8730_p4), %s7464_s19, 256, %s7467_s7, %s7315_s5, %s8726_s24, %s8726_s24, %s8725_s9  }
  0xf3   : > { %s8732_s12 = sld [smem:[#allocation46_spill]]  ;;  %s858_s28 = scalar_lea.vmem [#allocation15], %s7266_s29 }
  0xf4   : > { %s865_s23 = sshll.u32 %s858_s28, 4  ;;  %s866_s23 = int_to_ptr.vmem [resolvable:$true] %s865_s23 }
  0xf9   : > { %s7498_s3 = scalar_lea.hbm %s8732_s12, %s7349_s18  ;;  %s6733_s19 = scalar_lea.hbm %s8732_s12, 32 }
  0xfa   : > { %s6728_s2 = scalar_lea.hbm %s7498_s3, 16  ;;  %p6734_p5 = scmp.lt.u32.totalorder %s7498_s3, %s8732_s12 }
  0xfb   : > { %p6729_p8 = scmp.ne.s32.totalorder %s7498_s3, %s6728_s2  ;;  %p6735_p1 = scmp.lt.u32.totalorder %s6733_s19, %s6728_s2 }
  0xfc   : > { %p6737_p10 = scmp.lt.u32.totalorder %s6728_s2, %s7498_s3 }
  0xfd   : > { %p6731_p13 = pnand %p6729_p8, %p7321_p9  ;;  %p6736_p6 = por %p6735_p1, %p6734_p5 }
  0xff   : > { %p6732_p7 = pneg %p6731_p13  ;;  %p6738_p2 = por %p6737_p10, %p6736_p6 }
 0x101   : > { %p6739_p3 = pnand %p6738_p2, %p6732_p7 }
 0x103   : > { %6742 = shalt.err (!%p6739_p3)
}
 0x104   : > { %s6743_s27 = scalar_lea.vmem %s866_s23, 16  ;;  %s7051_s26 = smov [#allocation15]  }
 0x105   : > { %p6744_p12 = scmp.ne.s32.totalorder %s866_s23, %s6743_s27  ;;  %s6748_s28 = sshll.u32 %s7051_s26, 4  ;;  %s6749_s28 = int_to_ptr.vmem [resolvable:$false] %s6748_s28 }
 0x106   : > { %s6750_s30 = scalar_lea.vmem %s6749_s28, 32  ;;  %p6751_p8 = scmp.lt.s32.totalorder %s866_s23, %s6749_s28 }
 0x107   : > { %p6746_p0 = pnand %p6744_p12, %p7321_p9  ;;  %p6752_p13 = scmp.lt.s32.totalorder %s6750_s30, %s6743_s27 }
 0x109   : > { %p6747_p11 = pneg %p6746_p0  ;;  %p6753_p4 = por %p6752_p13, %p6751_p8 }
 0x10b   : > { %p6754_p1 = pnand %p6753_p4, %p6747_p11 }
 0x10d   : > { %6757 = shalt.err (!%p6754_p1)
}
 0x10e   : > { %p8733_p5 = scmp.ne.s32.totalorder %s8716_s1, 0  ;;  %s8734_s13 = sld [smem:[#allocation47_spill]] }
 0x10f   : > { %s876_s7 = scalar_lea.vmem [#allocation16], %s7301_s8 }
 0x110   : > { %6258 = dma.hbm_to_vmem [thread:$0]  (!%p8733_p5), %s7498_s3, 16, %s866_s23, %s7315_s5  }
 0x111   : > { %s883_s4 = sshll.u32 %s876_s7, 4  ;;  %s7526_s4 = int_to_ptr.vmem [resolvable:$true] %s883_s4 }
 0x114   : > { %s7523_s19 = scalar_lea.hbm %s8734_s13, %s7304_s22  ;;  %s6763_s23 = scalar_lea.hbm %s8734_s13, 512 }
 0x115   : > { %s6758_s27 = scalar_lea.hbm %s7523_s19, 256  ;;  %p6764_p10 = scmp.lt.u32.totalorder %s7523_s19, %s8734_s13 }
 0x116   : > { %p6759_p4 = scmp.ne.s32.totalorder %s7523_s19, %s6758_s27  ;;  %p6765_p2 = scmp.lt.u32.totalorder %s6763_s23, %s6758_s27 }
 0x117   : > { %p6767_p12 = scmp.lt.u32.totalorder %s6758_s27, %s7523_s19 }
 0x118   : > { %p6761_p7 = pnand %p6759_p4, %p7321_p9  ;;  %p6766_p3 = por %p6765_p2, %p6764_p10 }
 0x11a   : > { %p6762_p6 = pneg %p6761_p7  ;;  %p6768_p0 = por %p6767_p12, %p6766_p3 }
 0x11c   : > { %p6769_p11 = pnand %p6768_p0, %p6762_p6 }
 0x11e   : > { %6772 = shalt.err (!%p6769_p11)
}
 0x11f   : > { %s6773_s2 = scalar_lea.vmem %s7526_s4, 256  ;;  %s7052_s21 = smov [#allocation16]  }
 0x120   : > { %p6774_p8 = scmp.ne.s32.totalorder %s7526_s4, %s6773_s2  ;;  %s6778_s7 = sshll.u32 %s7052_s21, 4  ;;  %s6779_s7 = int_to_ptr.vmem [resolvable:$false] %s6778_s7 }
 0x121   : > { %s6780_s26 = scalar_lea.vmem %s6779_s7, 512  ;;  %p6781_p4 = scmp.lt.s32.totalorder %s7526_s4, %s6779_s7 }
 0x122   : > { %p6776_p13 = pnand %p6774_p8, %p7321_p9  ;;  %p6782_p7 = scmp.lt.s32.totalorder %s6780_s26, %s6773_s2 }
 0x124   : > { %p6777_p1 = pneg %p6776_p13  ;;  %p6783_p10 = por %p6782_p7, %p6781_p4 }
 0x126   : > { %p6784_p2 = pnand %p6783_p10, %p6777_p1 }
 0x128   : > { %6787 = shalt.err (!%p6784_p2)
}
 0x129   : > { %6261 = dma.hbm_to_vmem [thread:$0]  (!%p8733_p5), %s7523_s19, 256, %s7526_s4, %s7315_s5, %s8726_s24, %s8726_s24, %s8725_s9  }
 0x12a   : > { %s8735_s14 = sld [smem:[#allocation48_spill]]  ;;  %s896_s28 = scalar_lea.vmem [#allocation17], %s7266_s29 }
 0x12b   : > { %s903_s30 = sshll.u32 %s896_s28, 4  ;;  %s904_s30 = int_to_ptr.vmem [resolvable:$true] %s903_s30 }
 0x130   : > { %s7557_s23 = scalar_lea.hbm %s8735_s14, %s7349_s18  ;;  %s6793_s19 = scalar_lea.hbm %s8735_s14, 32 }
 0x131   : > { %s6788_s2 = scalar_lea.hbm %s7557_s23, 16  ;;  %p6794_p0 = scmp.lt.u32.totalorder %s7557_s23, %s8735_s14 }
 0x132   : > { %p6789_p6 = scmp.ne.s32.totalorder %s7557_s23, %s6788_s2  ;;  %p6795_p11 = scmp.lt.u32.totalorder %s6793_s19, %s6788_s2 }
 0x133   : > { %p6797_p13 = scmp.lt.u32.totalorder %s6788_s2, %s7557_s23 }
 0x134   : > { %p6791_p3 = pnand %p6789_p6, %p7321_p9  ;;  %p6796_p8 = por %p6795_p11, %p6794_p0 }
 0x136   : > { %p6792_p12 = pneg %p6791_p3  ;;  %p6798_p1 = por %p6797_p13, %p6796_p8 }
 0x138   : > { %p6799_p4 = pnand %p6798_p1, %p6792_p12 }
 0x13a   : > { %6802 = shalt.err (!%p6799_p4)
}
 0x13b   : > { %s6803_s27 = scalar_lea.vmem %s904_s30, 16  ;;  %s7053_s3 = smov [#allocation17]  }
 0x13c   : > { %p6804_p7 = scmp.ne.s32.totalorder %s904_s30, %s6803_s27  ;;  %s6808_s28 = sshll.u32 %s7053_s3, 4  ;;  %s6809_s28 = int_to_ptr.vmem [resolvable:$false] %s6808_s28 }
 0x13d   : > { %s6810_s21 = scalar_lea.vmem %s6809_s28, 32  ;;  %p6811_p6 = scmp.lt.s32.totalorder %s904_s30, %s6809_s28 }
 0x13e   : > { %p6806_p10 = pnand %p6804_p7, %p7321_p9  ;;  %p6812_p3 = scmp.lt.s32.totalorder %s6810_s21, %s6803_s27 }
 0x140   : > { %p6807_p2 = pneg %p6806_p10  ;;  %p6813_p5 = por %p6812_p3, %p6811_p6 }
 0x142   : > { %p6814_p0 = pnand %p6813_p5, %p6807_p2 }
 0x144   : > { %6817 = shalt.err (!%p6814_p0)
}
 0x145   : > { %p8736_p11 = scmp.ne.s32.totalorder %s8716_s1, 0  ;;  %s8737_s15 = sld [smem:[#allocation49_spill]] }
 0x146   : > { %s914_s4 = scalar_lea.vmem [#allocation18], %s7301_s8 }
 0x147   : > { %6264 = dma.hbm_to_vmem [thread:$0]  (!%p8736_p11), %s7557_s23, 16, %s904_s30, %s7315_s5  }
 0x148   : > { %s921_s26 = sshll.u32 %s914_s4, 4  ;;  %s7585_s26 = int_to_ptr.vmem [resolvable:$true] %s921_s26 }
 0x14b   : > { %s7582_s19 = scalar_lea.hbm %s8737_s15, %s7304_s22  ;;  %s6823_s30 = scalar_lea.hbm %s8737_s15, 512 }
 0x14c   : > { %s6818_s27 = scalar_lea.hbm %s7582_s19, 256  ;;  %p6824_p13 = scmp.lt.u32.totalorder %s7582_s19, %s8737_s15 }
 0x14d   : > { %p6819_p5 = scmp.ne.s32.totalorder %s7582_s19, %s6818_s27  ;;  %p6825_p1 = scmp.lt.u32.totalorder %s6823_s30, %s6818_s27 }
 0x14e   : > { %p6827_p7 = scmp.lt.u32.totalorder %s6818_s27, %s7582_s19 }
 0x14f   : > { %p6821_p12 = pnand %p6819_p5, %p7321_p9  ;;  %p6826_p4 = por %p6825_p1, %p6824_p13 }
 0x151   : > { %p6822_p8 = pneg %p6821_p12  ;;  %p6828_p10 = por %p6827_p7, %p6826_p4 }
 0x153   : > { %p6829_p2 = pnand %p6828_p10, %p6822_p8 }
 0x155   : > { %6832 = shalt.err (!%p6829_p2)
}
 0x156   : > { %s6833_s2 = scalar_lea.vmem %s7585_s26, 256  ;;  %s7054_s7 = smov [#allocation18]  }
 0x157   : > { %p6834_p6 = scmp.ne.s32.totalorder %s7585_s26, %s6833_s2  ;;  %s6838_s4 = sshll.u32 %s7054_s7, 4  ;;  %s6839_s4 = int_to_ptr.vmem [resolvable:$false] %s6838_s4 }
 0x158   : > { %s6840_s3 = scalar_lea.vmem %s6839_s4, 512  ;;  %p6841_p5 = scmp.lt.s32.totalorder %s7585_s26, %s6839_s4 }
 0x159   : > { %p6836_p3 = pnand %p6834_p6, %p7321_p9  ;;  %p6842_p12 = scmp.lt.s32.totalorder %s6840_s3, %s6833_s2 }
 0x15b   : > { %p6837_p0 = pneg %p6836_p3  ;;  %p6843_p13 = por %p6842_p12, %p6841_p5 }
 0x15d   : > { %p6844_p1 = pnand %p6843_p13, %p6837_p0 }
 0x15f   : > { %6847 = shalt.err (!%p6844_p1)
}
 0x160   : > { %6267 = dma.hbm_to_vmem [thread:$0]  (!%p8736_p11), %s7582_s19, 256, %s7585_s26, %s7315_s5, %s8726_s24, %s8726_s24, %s8725_s9  }
 0x161   : > { %s7616_s30 = scalar_lea.hbm %s8624_s16, %s7349_s18  ;;  %s934_s28 = scalar_lea.vmem [#allocation19], %s7266_s29 }
 0x162   : > { %s941_s21 = sshll.u32 %s934_s28, 4  ;;  %s6848_s2 = scalar_lea.hbm %s7616_s30, 16  ;;  %s942_s21 = int_to_ptr.vmem [resolvable:$true] %s941_s21 }
 0x163   : > { %p6849_p8 = scmp.ne.s32.totalorder %s7616_s30, %s6848_s2  ;;  %s6853_s19 = scalar_lea.hbm %s8624_s16, 32 }
 0x164   : > { %p6854_p10 = scmp.lt.u32.totalorder %s7616_s30, %s8624_s16  ;;  %p6855_p2 = scmp.lt.u32.totalorder %s6853_s19, %s6848_s2 }
 0x165   : > { %p6851_p4 = pnand %p6849_p8, %p7321_p9  ;;  %p6857_p3 = scmp.lt.u32.totalorder %s6848_s2, %s7616_s30 }
 0x166   : > { %p6856_p6 = por %p6855_p2, %p6854_p10 }
 0x167   : > { %p6852_p7 = pneg %p6851_p4 }
 0x168   : > { %p6858_p0 = por %p6857_p3, %p6856_p6 }
 0x16a   : > { %p6859_p5 = pnand %p6858_p0, %p6852_p7 }
 0x16c   : > { %6862 = shalt.err (!%p6859_p5)
}
 0x16d   : > { %s6863_s27 = scalar_lea.vmem %s942_s21, 16  ;;  %s7055_s23 = smov [#allocation19]  }
 0x16e   : > { %p6864_p12 = scmp.ne.s32.totalorder %s942_s21, %s6863_s27  ;;  %s6868_s28 = sshll.u32 %s7055_s23, 4  ;;  %s6869_s28 = int_to_ptr.vmem [resolvable:$false] %s6868_s28 }
 0x16f   : > { %s6870_s7 = scalar_lea.vmem %s6869_s28, 32  ;;  %p6871_p8 = scmp.lt.s32.totalorder %s942_s21, %s6869_s28 }
 0x170   : > { %p6866_p13 = pnand %p6864_p12, %p7321_p9  ;;  %p6872_p4 = scmp.lt.s32.totalorder %s6870_s7, %s6863_s27 }
 0x172   : > { %p6867_p1 = pneg %p6866_p13  ;;  %p6873_p11 = por %p6872_p4, %p6871_p8 }
 0x174   : > { %p6874_p2 = pnand %p6873_p11, %p6867_p1 }
 0x176   : > { %6877 = shalt.err (!%p6874_p2)
}
 0x177   : > { %p8738_p10 = scmp.ne.s32.totalorder %s8716_s1, 0  ;;  %s7641_s19 = scalar_lea.hbm %s8625_s17, %s7304_s22 }
 0x178   : > { %s952_s26 = scalar_lea.vmem [#allocation20], %s7301_s8  ;;  %s6878_s27 = scalar_lea.hbm %s7641_s19, 256 }
 0x179   : > { %6270 = dma.hbm_to_vmem [thread:$0]  (!%p8738_p10), %s7616_s30, 16, %s942_s21, %s7315_s5  }
 0x17a   : > { %s959_s3 = sshll.u32 %s952_s26, 4  ;;  %p6879_p11 = scmp.ne.s32.totalorder %s7641_s19, %s6878_s27  ;;  %s7644_s3 = int_to_ptr.vmem [resolvable:$true] %s959_s3 }
 0x17b   : > { %s6883_s21 = scalar_lea.hbm %s8625_s17, 512  ;;  %p6884_p3 = scmp.lt.u32.totalorder %s7641_s19, %s8625_s17 }
 0x17c   : > { %p6881_p7 = pnand %p6879_p11, %p7321_p9  ;;  %p6885_p0 = scmp.lt.u32.totalorder %s6883_s21, %s6878_s27 }
 0x17d   : > { %p6887_p12 = scmp.lt.u32.totalorder %s6878_s27, %s7641_s19 }
 0x17e   : > { %p6882_p6 = pneg %p6881_p7  ;;  %p6886_p5 = por %p6885_p0, %p6884_p3 }
 0x180   : > { %p6888_p13 = por %p6887_p12, %p6886_p5 }
 0x182   : > { %p6889_p1 = pnand %p6888_p13, %p6882_p6 }
 0x184   : > { %6892 = shalt.err (!%p6889_p1)
}
 0x185   : > { %s6893_s8 = scalar_lea.vmem %s7644_s3, 256  ;;  %s7056_s7 = smov [#allocation20]  }
 0x186   : > { %p6894_p8 = scmp.ne.s32.totalorder %s7644_s3, %s6893_s8  ;;  %s6898_s2 = sshll.u32 %s7056_s7, 4  ;;  %s6899_s2 = int_to_ptr.vmem [resolvable:$false] %s6898_s2 }
 0x187   : > { %s6900_s4 = scalar_lea.vmem %s6899_s2, 512  ;;  %p6901_p11 = scmp.lt.s32.totalorder %s7644_s3, %s6899_s2 }
 0x188   : > { %p6896_p4 = pnand %p6894_p8, %p7321_p9  ;;  %p6902_p7 = scmp.lt.s32.totalorder %s6900_s4, %s6893_s8 }
 0x18a   : > { %p6897_p2 = pneg %p6896_p4  ;;  %p6903_p3 = por %p6902_p7, %p6901_p11 }
 0x18c   : > { %p6904_p0 = pnand %p6903_p3, %p6897_p2 }
 0x18e   : > { %6907 = shalt.err (!%p6904_p0)
}
 0x18f   : > { %6273 = dma.hbm_to_vmem [thread:$0]  (!%p8738_p10), %s7641_s19, 256, %s7644_s3, %s7315_s5, %s8726_s24, %s8726_s24, %s8725_s9  }
 0x190   : > { %s7057_s26 = smov [#allocation7]   ;;  %s7675_s21 = scalar_lea.hbm %s8628_s20, %s7349_s18 }
 0x191   : > { %s710_s27 = sshll.u32 %s7057_s26, 4  ;;  %s8739_s8 = sld [smem:[#allocation37_spill]]  ;;  %s711_s27 = int_to_ptr.vmem [resolvable:$true] %s710_s27 }
 0x192   : > { %p8740_p5 = scmp.ne.s32.totalorder %s8715_s0, 0 }
 0x194   : > { %p8741_p12 = pneg %p8740_p5 }
 0x197   : > { %s6908_s7 = scalar_lea.hbm %s8739_s8, 256 }
 0x198   : > { %p6909_p6 = scmp.ne.s32.totalorder %s8739_s8, %s6908_s7  ;;  %p6915_p8 = scmp.lt.u32.totalorder %s6908_s7, %s8739_s8 }
 0x19a   : > { %p6911_p13 = pnand %p6909_p6, %p8741_p12 }
 0x19c   : > { %p6912_p1 = pneg %p6911_p13 }
 0x19e   : > { %p6917_p4 = pnand %p6915_p8, %p6912_p1 }
 0x1a0   : > { %6920 = shalt.err (!%p6917_p4)
}
 0x1a1   : > { %s6921_s18 = scalar_lea.vmem %s711_s27, 256  ;;  %p8742_p11 = pmov %p8741_p12 }
 0x1a2   : > { %p6922_p2 = scmp.ne.s32.totalorder %s711_s27, %s6921_s18  ;;  %p6929_p0 = scmp.lt.s32.totalorder %s711_s27, %s711_s27 }
 0x1a3   : > { %p6930_p10 = scmp.lt.s32.totalorder %s6921_s18, %s6921_s18 }
 0x1a4   : > { %p6924_p7 = pnand %p6922_p2, %p8742_p11 }
 0x1a5   : > { %p6931_p9 = por %p6930_p10, %p6929_p0 }
 0x1a6   : > { %p6925_p3 = pneg %p6924_p7 }
 0x1a8   : > { %p6932_p6 = pnand %p6931_p9, %p6925_p3 }
 0x1aa   : > { %6935 = shalt.err (!%p6932_p6)
}
 0x1ab   : > { %s8743_s19 = smov 8   ;;  %s8744_s3 = smov 128  }
 0x1ac   : > { %6236 = dma.hbm_to_vmem [thread:$0]  (!%p8740_p5), %s8739_s8, 256, %s711_s27, [#allocation8], %s8744_s3, %s8744_s3, %s8743_s19  }
 0x1ad   : > { %s986_s30 = scalar_lea.vmem [#allocation21], %s7266_s29  ;;  %s6936_s22 = scalar_lea.hbm %s7675_s21, 16 }
 0x1ae   : > { %s993_s28 = sshll.u32 %s986_s30, 4  ;;  %p6937_p9 = scmp.ne.s32.totalorder %s7675_s21, %s6936_s22  ;;  %s994_s28 = int_to_ptr.vmem [resolvable:$true] %s993_s28 }
 0x1af   : > { %p8745_p10 = scmp.ne.s32.totalorder %s8720_s6, 0  ;;  %s6941_s2 = scalar_lea.hbm %s8628_s20, 32 }
 0x1b0   : > { %p6942_p1 = scmp.lt.u32.totalorder %s7675_s21, %s8628_s20  ;;  %p6943_p8 = scmp.lt.u32.totalorder %s6941_s2, %s6936_s22 }
 0x1b1   : > { %p6939_p12 = pnand %p6937_p9, %p8745_p10  ;;  %p6945_p2 = scmp.lt.u32.totalorder %s6936_s22, %s7675_s21 }
 0x1b2   : > { %p6944_p4 = por %p6943_p8, %p6942_p1 }
 0x1b3   : > { %p6940_p13 = pneg %p6939_p12 }
 0x1b4   : > { %p6946_p5 = por %p6945_p2, %p6944_p4 }
 0x1b6   : > { %p6947_p11 = pnand %p6946_p5, %p6940_p13 }
 0x1b8   : > { %6950 = shalt.err (!%p6947_p11)
}
 0x1b9   : > { %s6951_s29 = scalar_lea.vmem %s994_s28, 16  ;;  %s7058_s27 = smov [#allocation21]  }
 0x1ba   : > { %p6952_p7 = scmp.ne.s32.totalorder %s994_s28, %s6951_s29  ;;  %s6956_s24 = sshll.u32 %s7058_s27, 4  ;;  %s6957_s24 = int_to_ptr.vmem [resolvable:$false] %s6956_s24 }
 0x1bb   : > { %s6958_s18 = scalar_lea.vmem %s6957_s24, 32  ;;  %p6959_p6 = scmp.lt.s32.totalorder %s994_s28, %s6957_s24 }
 0x1bc   : > { %p6954_p3 = pnand %p6952_p7, %p8745_p10  ;;  %p6960_p9 = scmp.lt.s32.totalorder %s6958_s18, %s6951_s29 }
 0x1be   : > { %p6955_p0 = pneg %p6954_p3  ;;  %p6961_p12 = por %p6960_p9, %p6959_p6 }
 0x1c0   : > { %p6962_p1 = pnand %p6961_p12, %p6955_p0 }
 0x1c2   : > { %6965 = shalt.err (!%p6962_p1)
}
 0x1c3   : > { %p8746_p8 = scmp.ne.s32.totalorder %s8716_s1, 0  ;;  %s8747_s19 = sld [smem:[#allocation33_spill]] }
 0x1c5   : > { %6276 = dma.hbm_to_vmem [thread:$0]  (!%p8746_p8), %s7675_s21, 16, %s994_s28, %s7315_s5  }
 0x1c9   : > { %p8748_p13 = scmp.ne.s32.totalorder %s8747_s19, 0 }
 0x1ca   : > { %s8749_s6 = sld [smem:[#allocation29_spill]] (!%p8748_p13) }
 0x1cb   : > { %1016 = sbr.rel (%p8748_p13) target bundleno = 11422 (0x2c9e), region = 120 }
 0x1d0   : > { %p8750_p10 = scmp.eq.s32.totalorder (!%p8748_p13), %s8749_s6, 0 }
 0x1d2   : > { %7009 = dma.done.wait (%p8750_p10), [#allocation5], 256   ;;  %p8751_p4 = pmov %p8750_p10 }
 0x1d4   : > { %7011 = vsyncadd (%p8751_p4), [#allocation5], 4294967040  ;;  %p8752_p2 = pmov %p8751_p4 }
 0x1d6   : > { %7013 = dma.done.wait (%p8752_p2), [#allocation8], 256   ;;  %p8753_p5 = pmov %p8752_p2 }
 0x1d7   : > { %s8754_s1 = sld [smem:[#allocation27_spill]]  ;;  %s8755_s3 = sld [smem:[#allocation32_spill]] }
 0x1d8   : > { %7015 = vsyncadd (%p8753_p5), [#allocation8], 4294967040  ;;  %s1026_s26 = sand.u32 1, %s8749_s6  }
 0x1d9   : > { %s1027_s23 = scalar_lea.sflag [#allocation5], %s1026_s26 }
 0x1dd   : > { %s7731_s5 = sand.u32 1, %s8754_s1   ;;  %p8756_p11 = scmp.ne.s32.totalorder %s8755_s3, 0 }
 0x1de   : > { %s7734_s21 = sshll.u32 %s7731_s5, 4 }
 0x1df   : > { %7017 = dma.done.wait (%p8756_p11), %s1027_s23, 1648  }
 0x1e0   : > { %7019 = vsyncadd (%p8756_p11), %s1027_s23, 4294965648  ;;  %p1267_p7 = scmp.lt.s32.totalorder %s8749_s6, 1  ;;  %s8758_s27 = sld [smem:[#allocation43_spill]] }
 0x1e1   : > { %s8759_s3 = sld [smem:[#allocation51_spill]]  ;;  %s8760_s0 = sld [smem:[#allocation52_spill]] }
 0x1e2   : > { %s7743_s28 = scalar_select %p1267_p7, %s8749_s6, 1 }
 0x1e3   : > { %s8761_s9 = sld [smem:[#allocation53_spill]]  ;;  %s1055_s10 = scalar_lea.vmem [#allocation12], %s7731_s5 }
 0x1e4   : > { %s5653_s22 = sshll.u32 %s7743_s28, 4  ;;  %s5654_s18 = sshll.u32 %s7743_s28, 5 }
 0x1e5   : > { %s5546_s23 = sshll.u32 %s7743_s28, 2  ;;  %s1063_s11 = scalar_lea.vmem [#allocation13], %s7731_s5 }
 0x1e6   : > { %s7753_s24 = scalar_lea.vmem %s8758_s27, %s5653_s22  ;;  %s1038_s22 = scalar_lea.vmem [#allocation10], %s7731_s5 }
 0x1e7   : > { %s7759_s26 = scalar_lea.vmem %s8759_s3, %s5654_s18  ;;  %s7765_s7 = scalar_lea.vmem %s8760_s0, %s5546_s23 }
 0x1e8   : > { %s1047_s27 = scalar_lea.vmem [#allocation11], %s7734_s21  ;;  %s1072_s12 = scalar_lea.vmem [#allocation14], %s7734_s21 }
 0x1e9   : > { %s7770_s29 = scalar_lea.vmem %s8761_s9, %s5546_s23  ;;  %s1080_s19 = scalar_lea.vmem [#allocation15], %s7731_s5 }
 0x1ea   : > { %p8762_p3 = scmp.ne.s32.totalorder %s8749_s6, 0 }
 0x1eb   : > { %v1293_v0 = vld [vmem:[#allocation4] sm:$0xff] (!%p8762_p3)  ;;  %vm1295_vm0 = vcmask (!%p8762_p3), 261120   ;;  %v1294_v1 = vld [vmem:[#allocation4 + $0x8] sm:$0xff] (!%p8762_p3)  ;;  %s8763_s4 = sld [smem:[#allocation38_spill]] (!%p8762_p3)  ;;  %s8764_s15 = sld [smem:[#allocation35_spill]] (!%p8762_p3) }
 0x1ec   : > { %1292 = sbr.rel (%p8762_p3) target bundleno = 506 (0x1fa), region = 184  ;;  %1296 = vst.msk [vmem:[#allocation22] sm:$0xff] (!%p8762_p3), %vm1295_vm0, %v1293_v0  ;;  %1297 = vst.msk [vmem:[#allocation22 + $0x8] sm:$0xff] (!%p8762_p3), %vm1295_vm0, %v1294_v1  ;;  %s8765_s18 = sld [smem:[#allocation36_spill]] (!%p8762_p3) }
 0x1f1   : > { %v1298_v2 = vld [vmem:[%s8763_s4] sm:$0xff] (!%p8762_p3)  ;;  %v1299_v3 = vld [vmem:[%s8763_s4 + $0x8] sm:$0xff] (!%p8762_p3)  ;;  %v1300_v8 = vld [vmem:[%s8763_s4 + $0x10] sm:$0xff] (!%p8762_p3) }
 0x1f2   : > { %v1302_v4 = vld [vmem:[%s8764_s15] sm:$0xff] (!%p8762_p3)  ;;  %v1303_v5 = vld [vmem:[%s8764_s15 + $0x8] sm:$0xff] (!%p8762_p3)  ;;  %v1301_v9 = vld [vmem:[%s8763_s4 + $0x18] sm:$0xff] (!%p8762_p3) }
 0x1f3   : > { %v1306_v6 = vadd.f32 %v1302_v4, %v1298_v2  ;;  %v1307_v7 = vadd.f32 %v1303_v5, %v1299_v3  ;;  %v1304_v10 = vld [vmem:[%s8764_s15 + $0x10] sm:$0xff]  ;;  %v1305_v11 = vld [vmem:[%s8764_s15 + $0x18] sm:$0xff]  ;;  %v1314_v13 = vld [vmem:[%s8765_s18] sm:$0xff] }
 0x1f4   : > { %v1308_v12 = vadd.f32 %v1304_v10, %v1300_v8  ;;  %v1315_v14 = vld [vmem:[%s8765_s18 + $0x8] sm:$0xff]  ;;  %v1309_v16 = vadd.f32 %v1305_v11, %v1301_v9  ;;  %v1318_v17 = vadd.f32 %v1314_v13, %v1298_v2  ;;  %v1316_v19 = vld [vmem:[%s8765_s18 + $0x10] sm:$0xff]  ;;  %v1317_v20 = vld [vmem:[%s8765_s18 + $0x18] sm:$0xff] }
 0x1f5   : > { %v1310_v15 = vpack.c.bf16 %v1307_v7, %v1306_v6  ;;  %v1319_v18 = vadd.f32 %v1315_v14, %v1299_v3  ;;  %v1320_v21 = vadd.f32 %v1316_v19, %v1300_v8  ;;  %v1321_v22 = vadd.f32 %v1317_v20, %v1301_v9 }
 0x1f6   : > { %v1311_v23 = vpack.c.bf16 %v1309_v16, %v1308_v12 }
 0x1f7   : > { %1312 = vst.msk [vmem:[#allocation2] sm:$0xff] %vm1295_vm0, %v1310_v15  ;;  %v1322_v24 = vpack.c.bf16 %v1319_v18, %v1318_v17  ;;  %v1323_v25 = vpack.c.bf16 %v1321_v22, %v1320_v21 }
 0x1f8   : > { %1313 = vst.msk [vmem:[#allocation2 + $0x8] sm:$0xff] %vm1295_vm0, %v1311_v23 }
 0x1f9   : > { %1324 = vst.msk [vmem:[#allocation3] sm:$0xff] %vm1295_vm0, %v1322_v24  ;;  %1325 = vst.msk [vmem:[#allocation3 + $0x8] sm:$0xff] %vm1295_vm0, %v1323_v25 }
 0x1fa PF: > { %s8766_s15 = scalar_lea.vmem [#allocation9], %s7734_s21  ;;  %v7059_v27 = vmov 0.0   ;;  %vm7060_vm1 = vmmov 0   ;;  %v7836_v29 = vld [vmem:[#allocation22] sm:$0xff]  ;;  %v7838_v30 = vld [vmem:[#allocation22 + $0x8] sm:$0xff]  ;;  %vm1366_vm2 = vcmask 261120  }
 0x1fb   : > { %v6382_v26 = vld [vmem:[%s8766_s15] sm:$0xff]   ;;  %5796 = vmatprep.subr.bf16.mxu1 %v7059_v27  ;;  %s8767_s1 = smov %s8766_s15  ;;  %5812 = vmatprep.subr.bf16.mxu0 %v7059_v27  ;;  %v7843_v32 = vld [vmem:[#allocation7 + $0x8] sm:$0xff]  ;;  %s7061_s18 = smov 64   ;;  %v1411_v38 = vpack.c.bf16 %v7838_v30, %v7836_v29  ;;  %vm1481_vm3 = vcmask 64512   ;;  %vm1604_vm4 = vcmask 1043456   ;;  %vm2384_vm5 = vcmask 130048  }
 0x1fc   : > { %v6383_v28 = vld [vmem:[%s8767_s1 + $0x8] sm:$0xff]   ;;  %5797 = vmatpush3.bf16.msra.mxu1 %v6382_v26  ;;  %5800 = vmatprep.mubr.msk.bf16.mxu1 %vm7060_vm1, %v7059_v27  ;;  %v7840_v31 = vld [vmem:[#allocation7] sm:$0xff]  ;;  %v1346_v34 = vadd.f32 %v7843_v32, %v7838_v30  ;;  %v5549_v39 = vld [vmem:[%s1038_s22] ss:$0 sm:$0xff]  ;;  %s7062_s0 = smov 96   ;;  %s7063_s22 = smov 88  }
 0x1fd   : > { %5798 = vmatprep.subr.bf16.mxu1 %v7059_v27  ;;  %v1345_v33 = vadd.f32 %v7840_v31, %v7836_v29  ;;  %1412 = vrot.lane.b32.xlu0 %v6382_v26, %s7061_s18  ;;  %s7064_s2 = smov 120   ;;  %s7065_s9 = smov 80   ;;  %vm2387_vm6 = vcmask 195584   ;;  %vm5012_vm7 = vcmask 523264  }
 0x1fe   : > { %5814 = vmatprep.mubr.msk.bf16.mxu0 %vm7060_vm1, %v7059_v27  ;;  %s7066_s14 = smov 112   ;;  %s7067_s6 = smov 72  }
 0x1ff   : > { %v1347_v35 = vpack.c.bf16 %v1346_v34, %v1345_v33  ;;  %s7068_s8 = smov 104   ;;  %s7069_s13 = smov 8  }
 0x200   : > { %5799 = vmatpush3.bf16.msra.mxu1 %v6383_v28  ;;  %s7070_s3 = smov 16   ;;  %s7071_s30 = smov 24  }
 0x201   : > { %1414 = vrot.lane.b32.xlu0 %v6383_v28, %s7061_s18  ;;  %5804 = vmatprep.subr.bf16.mxu1 %v7059_v27 }
 0x203   : > { %5801 = vmatmul.mubr.msk.bf16.vlgmr.msra.gmra.mrb[0].mxu1 %vm1366_vm2, %v1347_v35 }
 0x204   : > { %5808 = vmatprep.mubr.msk.bf16.mxu1 %vm7060_vm1, %v7059_v27 }
 0x26f   : > { %v1413_v36 = vpop.permute.xlu0 %1412 }
 0x270   : > { %5805 = vmatpush3.bf16.msra.mxu1 %v1413_v36 }
 0x271   : > { %5806 = vmatprep.subr.bf16.mxu1 %v7059_v27 }
 0x273   : > { %v1415_v37 = vpop.permute.xlu0 %1414 }
 0x274   : > { %5807 = vmatpush3.bf16.msra.mxu1 %v1415_v37 }
 0x275   : > { %5818 = vmatprep.subr.bf16.mxu1 %v7059_v27 }
 0x277   : > { %5809 = vmatmul.mubr.msk.bf16.vlgmr.msra.gmra.mrb[4].mxu1 %vm1366_vm2, %v1411_v38 }
 0x278   : > { %5820 = vmatprep.mubr.msk.bf16.mxu1 %vm7060_vm1, %v7059_v27 }
 0x2d6   : > { %v1404_v40 = vpop.f32.mrb[0].mxu1 }
 0x2d7   : > { %v1405_v41 = vadd.f32 %v5549_v39, %v1404_v40  ;;  %v5802_v42 = vpop.f32.mrb[1].mxu1 }
 0x2d8   : > { %v1407_v43 = vpop.f32.mrb[2].mxu1 }
 0x2d9   : > { %v7866_v44 = vpack.c.bf16 %v1405_v41, %v1405_v41  ;;  %v1408_v45 = vadd.f32 %v5549_v39, %v1407_v43  ;;  %v5803_v46 = vpop.f32.mrb[3].mxu1  ;;  %v1470_v50 = vmul.f32 0.35355338, %v1405_v41 }
 0x2db   : > { %1479 = vrot.lane.b32.xlu1 %v7866_v44, %s7062_s0  ;;  %v7870_v47 = vpack.c.bf16 %v1408_v45, %v1408_v45  ;;  %v7877_v53 = vpack.c.bf16 %v1470_v50, %v1470_v50  ;;  %v1471_v54 = vmul.f32 0.35355338, %v1408_v45 }
 0x2dd   : > { %v7884_v55 = vpack.c.bf16 %v1471_v54, %v1471_v54 }
 0x2df   : > { %1529 = vrot.lane.b32.xlu1 %v7870_v47, %s7062_s0 }
 0x34a   : > { %v1458_v56 = vpop.f32.mrb[4].mxu1 }
 0x34b   : > { %v5810_v57 = vpop.f32.mrb[5].mxu1 }
 0x34c   : > { %v1461_v58 = vpop.f32.mrb[6].mxu1 }
 0x34d   : > { %v1480_v48 = vpop.permute.xlu1 %1479  ;;  %v5811_v59 = vpop.f32.mrb[7].mxu1 }
 0x34e   : > { %v1486_v49 = vsel %vm1481_vm3, %v1480_v48, 0 }
 0x34f   : > { %5813 = vmatpush3.bf16.xpose.msra.mxu0 %v1486_v49 }
 0x350   : > { %5824 = vmatprep.subr.bf16.mxu0 %v7059_v27 }
 0x351   : > { %v1530_v51 = vpop.permute.xlu1 %1529 }
 0x352   : > { %v1535_v52 = vsel %vm1481_vm3, %v1530_v51, 0 }
 0x353   : > { %5819 = vmatpush3.bf16.xpose.msra.mxu1 %v1535_v52 }
 0x354   : > { %5830 = vmatprep.subr.bf16.mxu1 %v7059_v27 }
 0x356   : > { %5815 = vmatmul.mubr.msk.bf16.vlgmr.msra.gmra.mrb[0].mxu0 %vm1481_vm3, %v7877_v53 }
 0x357   : > { %5826 = vmatprep.mubr.msk.bf16.mxu0 %vm7060_vm1, %v7059_v27 }
 0x35a   : > { %5821 = vmatmul.mubr.msk.bf16.vlgmr.msra.gmra.mrb[8].mxu1 %vm1481_vm3, %v7884_v55 }
 0x35b   : > { %5832 = vmatprep.mubr.msk.bf16.mxu1 %vm7060_vm1, %v7059_v27 }
 0x429   : > { %v1522_v60 = vpop.f32.mrb[0].mxu0 }
 0x42a   : > { %v5816_v61 = vpop.f32.mrb[1].mxu0  ;;  %v1577_v62 = vsel %vm1481_vm3, %v1522_v60, -inf }
 0x42b   : > { %1578 = vmax.xlane.f32.xlu0 %v1577_v62  ;;  %v1525_v63 = vpop.f32.mrb[2].mxu0 }
 0x42c   : > { %v5817_v0 = vpop.f32.mrb[3].mxu0 }
 0x42d   : > { %v1571_v1 = vpop.f32.mrb[8].mxu1 }
 0x42e   : > { %v5822_v2 = vpop.f32.mrb[9].mxu1  ;;  %v1580_v3 = vsel %vm1481_vm3, %v1571_v1, -inf }
 0x42f   : > { %1581 = vmax.xlane.f32.xlu1 %v1580_v3  ;;  %v1574_v4 = vpop.f32.mrb[10].mxu1 }
 0x430   : > { %v5823_v5 = vpop.f32.mrb[11].mxu1 }
 0x440   : > { %1418 = vrot.lane.b32.xlu1 %v5549_v39, %s7061_s18 }
 0x444   : > { %1748 = vrot.lane.b32.xlu1 %v7870_v47, %s7063_s22 }
 0x448   : > { %1695 = vrot.lane.b32.xlu1 %v7877_v53, %s7064_s2 }
 0x4b8   : > { %v1579_v6 = vpop.xlane.xlu0 %1578 }
 0x4b9   : > { %v1583_v7 = vsub.f32 %v1522_v60, %v1579_v6 }
 0x4bb   : > { %v1585_v8 = vmul.f32 1.442695, %v1583_v7 }
 0x4bc   : > { %v1582_v9 = vpop.xlane.xlu1 %1581 }
 0x4bd   : > { %6400 = vpow2.f32 %v1585_v8  ;;  %v1584_v10 = vsub.f32 %v1571_v1, %v1582_v9 }
 0x4bf   : > { %v1587_v11 = vmul.f32 1.442695, %v1584_v10 }
 0x4c0   : > { %v1419_v12 = vpop.permute.xlu1 %1418 }
 0x4c1   : > { %6402 = vpow2.f32 %v1587_v11  ;;  %v1459_v13 = vadd.f32 %v1458_v56, %v1419_v12  ;;  %v1462_v14 = vadd.f32 %v1461_v58, %v1419_v12 }
 0x4c3   : > { %v7896_v15 = vpack.c.bf16 %v1459_v13, %v1459_v13  ;;  %v7898_v16 = vpack.c.bf16 %v1462_v14, %v1462_v14 }
 0x4c4   : > { %v1749_v37 = vpop.permute.xlu1 %1748 }
 0x4c5   : > { %v1606_v17 = vsel %vm1604_vm4, %v7896_v15, 0  ;;  %v1652_v18 = vsel %vm1604_vm4, %v7898_v16, 0  ;;  %v1754_v39 = vsel %vm1481_vm3, %v1749_v37, 0 }
 0x4c6   : > { %5825 = vmatpush3.bf16.msra.mxu0 %v1606_v17  ;;  %5831 = vmatpush3.bf16.msra.mxu1 %v1652_v18 }
 0x4c7   : > { %v6401_v19 = vpop.eup %6400  ;;  %5836 = vmatprep.subr.bf16.mxu0 %v7059_v27  ;;  %5842 = vmatprep.subr.bf16.mxu1 %v7059_v27 }
 0x4c8   : > { %v1589_v20 = vsel %vm1481_vm3, %v6401_v19, 0.0  ;;  %v1696_v40 = vpop.permute.xlu1 %1695 }
 0x4c9   : > { %1590 = vadd.xlane.f32.xlu0 %v1589_v20 }
 0x4cb   : > { %v6403_v21 = vpop.eup %6402 }
 0x4cc   : > { %v1592_v22 = vsel %vm1481_vm3, %v6403_v21, 0.0 }
 0x4cd   : > { %1593 = vadd.xlane.f32.xlu0 %v1592_v22 }
 0x4e3   : > { %1697 = vrot.lane.b32.xlu0 %v7866_v44, %s7063_s22 }
 0x4e7   : > { %1746 = vrot.lane.b32.xlu0 %v7884_v55, %s7064_s2 }
 0x556   : > { %v1591_v23 = vpop.xlane.xlu0 %1590 }
 0x557   : > { %6404 = vrcp.f32 %v1591_v23 }
 0x55a   : > { %v1594_v24 = vpop.xlane.xlu0 %1593 }
 0x55b   : > { %6406 = vrcp.f32 %v1594_v24 }
 0x55e   : > { %v1698_v28 = vpop.permute.xlu0 %1697 }
 0x55f   : > { %v1703_v35 = vsel %vm1481_vm3, %v1698_v28, 0 }
 0x561   : > { %v6405_v25 = vpop.eup %6404 }
 0x562   : > { %v1597_v26 = vmul.f32 %v6405_v25, %v6401_v19  ;;  %v1747_v41 = vpop.permute.xlu0 %1746 }
 0x564   : > { %v1599_v33 = vpack.c.bf16 %v1597_v26, %v1597_v26 }
 0x565   : > { %v6407_v34 = vpop.eup %6406 }
 0x566   : > { %5827 = vmatmul.mubr.msk.bf16.vlgmr.msra.gmra.mrb[4].mxu0 %vm1481_vm3, %v1599_v33  ;;  %v1598_v36 = vmul.f32 %v6407_v34, %v6403_v21 }
 0x567   : > { %5837 = vmatpush3.bf16.xpose.msra.mxu0 %v1703_v35  ;;  %5838 = vmatprep.mubr.msk.bf16.mxu0 %vm7060_vm1, %v7059_v27 }
 0x568   : > { %v1600_v38 = vpack.c.bf16 %v1598_v36, %v1598_v36  ;;  %5848 = vmatprep.subr.bf16.mxu0 %v7059_v27 }
 0x56a   : > { %5833 = vmatmul.mubr.msk.bf16.vlgmr.msra.gmra.mrb[12].mxu1 %vm1481_vm3, %v1600_v38 }
 0x56b   : > { %5843 = vmatpush3.bf16.xpose.msra.mxu1 %v1754_v39  ;;  %5844 = vmatprep.mubr.msk.bf16.mxu1 %vm7060_vm1, %v7059_v27 }
 0x56c   : > { %5854 = vmatprep.subr.bf16.mxu1 %v7059_v27 }
 0x56e   : > { %5839 = vmatmul.mubr.msk.bf16.vlgmr.msra.gmra.mrb[8].mxu0 %vm1481_vm3, %v1696_v40 }
 0x56f   : > { %5850 = vmatprep.mubr.msk.bf16.mxu0 %vm7060_vm1, %v7059_v27 }
 0x572   : > { %5845 = vmatmul.mubr.msk.bf16.vlgmr.msra.gmra.mrb[16].mxu1 %vm1481_vm3, %v1747_v41 }
 0x573   : > { %5856 = vmatprep.mubr.msk.bf16.mxu1 %vm7060_vm1, %v7059_v27 }
 0x639   : > { %v7927_v42 = vpop.f32.mrb[4].mxu0 }
 0x63a   : > { %v5828_v43 = vpop.f32.mrb[5].mxu0 }
 0x63b   : > { %v1645_v45 = vpop.f32.mrb[6].mxu0 }
 0x63c   : > { %v5829_v46 = vpop.f32.mrb[7].mxu0 }
 0x63d   : > { %v7929_v48 = vpop.f32.mrb[12].mxu1 }
 0x63e   : > { %v5834_v49 = vpop.f32.mrb[13].mxu1 }
 0x63f   : > { %v1691_v50 = vpop.f32.mrb[14].mxu1 }
 0x640   : > { %v5835_v51 = vpop.f32.mrb[15].mxu1 }
 0x641   : > { %v1739_v52 = vpop.f32.mrb[8].mxu0 }
 0x642   : > { %v5840_v54 = vpop.f32.mrb[9].mxu0  ;;  %v1796_v56 = vsel %vm1481_vm3, %v1739_v52, -inf }
 0x643   : > { %1797 = vmax.xlane.f32.xlu1 %v1796_v56  ;;  %v1742_v57 = vpop.f32.mrb[10].mxu0 }
 0x644   : > { %v5841_v58 = vpop.f32.mrb[11].mxu0 }
 0x645   : > { %v1790_v59 = vpop.f32.mrb[16].mxu1 }
 0x646   : > { %v5846_v60 = vpop.f32.mrb[17].mxu1  ;;  %v1799_v61 = vsel %vm1481_vm3, %v1790_v59, -inf }
 0x647   : > { %1800 = vmax.xlane.f32.xlu0 %v1799_v61  ;;  %v1793_v62 = vpop.f32.mrb[18].mxu1 }
 0x648   : > { %v5847_v63 = vpop.f32.mrb[19].mxu1 }
 0x654   : > { %1870 = vrot.lane.b32.xlu1 %v7898_v16, %s7064_s2 }
 0x65d   : > { %1821 = vrot.lane.b32.xlu0 %v7896_v15, %s7064_s2 }
 0x6d0   : > { %v1798_v0 = vpop.xlane.xlu1 %1797 }
 0x6d1   : > { %v1802_v1 = vsub.f32 %v1739_v52, %v1798_v0 }
 0x6d3   : > { %v1804_v2 = vmul.f32 1.442695, %v1802_v1 }
 0x6d4   : > { %v1871_v3 = vpop.permute.xlu1 %1870  ;;  %v1801_v4 = vpop.xlane.xlu0 %1800 }
 0x6d5   : > { %6408 = vpow2.f32 %v1804_v2  ;;  %v1876_v5 = vsel %vm1604_vm4, %v1871_v3, 0  ;;  %v1803_v6 = vsub.f32 %v1790_v59, %v1801_v4 }
 0x6d6   : > { %5855 = vmatpush3.bf16.msra.mxu1 %v1876_v5 }
 0x6d7   : > { %v1806_v7 = vmul.f32 1.442695, %v1803_v6  ;;  %5866 = vmatprep.subr.bf16.mxu1 %v7059_v27 }
 0x6d8   : > { %v1822_v8 = vpop.permute.xlu0 %1821 }
 0x6d9   : > { %6410 = vpow2.f32 %v1806_v7  ;;  %v1827_v9 = vsel %vm1604_vm4, %v1822_v8, 0 }
 0x6da   : > { %5849 = vmatpush3.bf16.msra.mxu0 %v1827_v9 }
 0x6db   : > { %5860 = vmatprep.subr.bf16.mxu0 %v7059_v27 }
 0x6df   : > { %v6409_v10 = vpop.eup %6408 }
 0x6e0   : > { %v1808_v11 = vsel %vm1481_vm3, %v6409_v10, 0.0 }
 0x6e1   : > { %1809 = vadd.xlane.f32.xlu0 %v1808_v11 }
 0x6e3   : > { %v6411_v12 = vpop.eup %6410 }
 0x6e4   : > { %v1811_v13 = vsel %vm1481_vm3, %v6411_v12, 0.0 }
 0x6e5   : > { %1812 = vadd.xlane.f32.xlu1 %v1811_v13 }
 0x6f6   : > { %1920 = vrot.lane.b32.xlu1 %v7866_v44, %s7065_s9 }
 0x6f7   : > { %1970 = vrot.lane.b32.xlu0 %v7870_v47, %s7065_s9 }
 0x6fa   : > { %1918 = vrot.lane.b32.xlu1 %v7877_v53, %s7066_s14 }
 0x6fb   : > { %1968 = vrot.lane.b32.xlu0 %v7884_v55, %s7066_s14 }
 0x76e   : > { %v1810_v14 = vpop.xlane.xlu0 %1809 }
 0x76f   : > { %6412 = vrcp.f32 %v1810_v14 }
 0x772   : > { %v1813_v17 = vpop.xlane.xlu1 %1812  ;;  %v1971_v25 = vpop.permute.xlu0 %1970 }
 0x773   : > { %6414 = vrcp.f32 %v1813_v17  ;;  %v1976_v28 = vsel %vm1481_vm3, %v1971_v25, 0 }
 0x776   : > { %v1921_v20 = vpop.permute.xlu1 %1920  ;;  %v1969_v34 = vpop.permute.xlu0 %1968 }
 0x777   : > { %v1926_v23 = vsel %vm1481_vm3, %v1921_v20, 0 }
 0x779   : > { %v6413_v18 = vpop.eup %6412 }
 0x77a   : > { %v1816_v19 = vmul.f32 %v6413_v18, %v6409_v10  ;;  %v1919_v33 = vpop.permute.xlu1 %1918 }
 0x77c   : > { %v1818_v21 = vpack.c.bf16 %v1816_v19, %v1816_v19 }
 0x77d   : > { %v6415_v22 = vpop.eup %6414 }
 0x77e   : > { %5851 = vmatmul.mubr.msk.bf16.vlgmr.msra.gmra.mrb[12].mxu0 %vm1481_vm3, %v1818_v21  ;;  %v1817_v24 = vmul.f32 %v6415_v22, %v6411_v12 }
 0x77f   : > { %5861 = vmatpush3.bf16.xpose.msra.mxu0 %v1926_v23  ;;  %5862 = vmatprep.mubr.msk.bf16.mxu0 %vm7060_vm1, %v7059_v27 }
 0x780   : > { %v1819_v26 = vpack.c.bf16 %v1817_v24, %v1817_v24  ;;  %5872 = vmatprep.subr.bf16.mxu0 %v7059_v27 }
 0x782   : > { %5857 = vmatmul.mubr.msk.bf16.vlgmr.msra.gmra.mrb[20].mxu1 %vm1481_vm3, %v1819_v26 }
 0x783   : > { %5867 = vmatpush3.bf16.xpose.msra.mxu1 %v1976_v28  ;;  %5868 = vmatprep.mubr.msk.bf16.mxu1 %vm7060_vm1, %v7059_v27 }
 0x784   : > { %5878 = vmatprep.subr.bf16.mxu1 %v7059_v27 }
 0x786   : > { %5863 = vmatmul.mubr.msk.bf16.vlgmr.msra.gmra.mrb[16].mxu0 %vm1481_vm3, %v1919_v33 }
 0x787   : > { %5874 = vmatprep.mubr.msk.bf16.mxu0 %vm7060_vm1, %v7059_v27 }
 0x78a   : > { %5869 = vmatmul.mubr.msk.bf16.vlgmr.msra.gmra.mrb[24].mxu1 %vm1481_vm3, %v1969_v34 }
 0x78b   : > { %5880 = vmatprep.mubr.msk.bf16.mxu1 %vm7060_vm1, %v7059_v27 }
 0x851   : > { %v7965_v35 = vpop.f32.mrb[12].mxu0 }
 0x852   : > { %v5852_v36 = vpop.f32.mrb[13].mxu0 }
 0x853   : > { %v1866_v37 = vpop.f32.mrb[14].mxu0 }
 0x854   : > { %v5853_v38 = vpop.f32.mrb[15].mxu0 }
 0x855   : > { %v7967_v39 = vpop.f32.mrb[20].mxu1 }
 0x856   : > { %v6337_v40 = vpack.i.bf16 %v7967_v39, %v7965_v35  ;;  %v5858_v41 = vpop.f32.mrb[21].mxu1 }
 0x857   : > { %v1915_v43 = vpop.f32.mrb[22].mxu1 }
 0x858   : > { %v5859_v45 = vpop.f32.mrb[23].mxu1 }
 0x859   : > { %v1962_v46 = vpop.f32.mrb[16].mxu0 }
 0x85a   : > { %v5864_v49 = vpop.f32.mrb[17].mxu0  ;;  %v2018_v50 = vsel %vm1481_vm3, %v1962_v46, -inf }
 0x85b   : > { %2019 = vmax.xlane.f32.xlu1 %v2018_v50  ;;  %v1965_v51 = vpop.f32.mrb[18].mxu0 }
 0x85c   : > { %v5865_v52 = vpop.f32.mrb[19].mxu0 }
 0x85d   : > { %v2012_v54 = vpop.f32.mrb[24].mxu1 }
 0x85e   : > { %v5870_v56 = vpop.f32.mrb[25].mxu1  ;;  %v2021_v57 = vsel %vm1481_vm3, %v2012_v54, -inf }
 0x85f   : > { %2022 = vmax.xlane.f32.xlu0 %v2021_v57  ;;  %v2015_v58 = vpop.f32.mrb[26].mxu1 }
 0x860   : > { %v5871_v59 = vpop.f32.mrb[27].mxu1 }
 0x86c   : > { %2090 = vrot.lane.b32.xlu1 %v7898_v16, %s7066_s14 }
 0x875   : > { %2042 = vrot.lane.b32.xlu0 %v7896_v15, %s7066_s14 }
 0x8e8   : > { %v2020_v60 = vpop.xlane.xlu1 %2019 }
 0x8e9   : > { %v2024_v61 = vsub.f32 %v1962_v46, %v2020_v60 }
 0x8eb   : > { %v2026_v62 = vmul.f32 1.442695, %v2024_v61 }
 0x8ec   : > { %v2091_v63 = vpop.permute.xlu1 %2090  ;;  %v2023_v0 = vpop.xlane.xlu0 %2022 }
 0x8ed   : > { %6416 = vpow2.f32 %v2026_v62  ;;  %v2096_v1 = vsel %vm1604_vm4, %v2091_v63, 0  ;;  %v2025_v2 = vsub.f32 %v2012_v54, %v2023_v0 }
 0x8ee   : > { %5879 = vmatpush3.bf16.msra.mxu1 %v2096_v1 }
 0x8ef   : > { %v2028_v3 = vmul.f32 1.442695, %v2025_v2  ;;  %5890 = vmatprep.subr.bf16.mxu1 %v7059_v27 }
 0x8f0   : > { %v2043_v4 = vpop.permute.xlu0 %2042 }
 0x8f1   : > { %6418 = vpow2.f32 %v2028_v3  ;;  %v2048_v5 = vsel %vm1604_vm4, %v2043_v4, 0 }
 0x8f2   : > { %5873 = vmatpush3.bf16.msra.mxu0 %v2048_v5 }
 0x8f3   : > { %5884 = vmatprep.subr.bf16.mxu0 %v7059_v27 }
 0x8f7   : > { %v6417_v6 = vpop.eup %6416 }
 0x8f8   : > { %v2030_v7 = vsel %vm1481_vm3, %v6417_v6, 0.0 }
 0x8f9   : > { %2031 = vadd.xlane.f32.xlu0 %v2030_v7 }
 0x8fb   : > { %v6419_v8 = vpop.eup %6418 }
 0x8fc   : > { %v2033_v9 = vsel %vm1481_vm3, %v6419_v8, 0.0 }
 0x8fd   : > { %2034 = vadd.xlane.f32.xlu1 %v2033_v9  ;;  %v6385_v9 = vld [vmem:[%s1047_s27 + $0x8] sm:$0xff]  }
 0x90e   : > { %2140 = vrot.lane.b32.xlu1 %v7866_v44, %s7067_s6 }
 0x90f   : > { %2190 = vrot.lane.b32.xlu0 %v7870_v47, %s7067_s6  ;;  %s8771_s6 = scalar_lea.vmem [#allocation17], %s7731_s5 }
 0x912   : > { %2138 = vrot.lane.b32.xlu1 %v7877_v53, %s7068_s8 }
 0x913   : > { %2188 = vrot.lane.b32.xlu0 %v7884_v55, %s7068_s8 }
 0x986   : > { %v2032_v10 = vpop.xlane.xlu0 %2031 }
 0x987   : > { %6420 = vrcp.f32 %v2032_v10 }
 0x98a   : > { %v2035_v11 = vpop.xlane.xlu1 %2034  ;;  %v2191_v19 = vpop.permute.xlu0 %2190 }
 0x98b   : > { %6422 = vrcp.f32 %v2035_v11  ;;  %v2196_v55 = vsel %vm1481_vm3, %v2191_v19, 0 }
 0x98e   : > { %v2141_v14 = vpop.permute.xlu1 %2140  ;;  %v2189_v21 = vpop.permute.xlu0 %2188 }
 0x98f   : > { %v2146_v44 = vsel %vm1481_vm3, %v2141_v14, 0 }
 0x991   : > { %v6421_v12 = vpop.eup %6420 }
 0x992   : > { %v2038_v13 = vmul.f32 %v6421_v12, %v6417_v6  ;;  %v2139_v20 = vpop.permute.xlu1 %2138 }
 0x994   : > { %v2040_v17 = vpack.c.bf16 %v2038_v13, %v2038_v13 }
 0x995   : > { %v6423_v18 = vpop.eup %6422 }
 0x996   : > { %5875 = vmatmul.mubr.msk.bf16.vlgmr.msra.gmra.mrb[20].mxu0 %vm1481_vm3, %v2040_v17  ;;  %v2039_v47 = vmul.f32 %v6423_v18, %v6419_v8  ;;  %v6384_v8 = vld [vmem:[%s1047_s27] sm:$0xff]  }
 0x997   : > { %5885 = vmatpush3.bf16.xpose.msra.mxu0 %v2146_v44  ;;  %5886 = vmatprep.mubr.msk.bf16.mxu0 %vm7060_vm1, %v7059_v27 }
 0x998   : > { %v2041_v53 = vpack.c.bf16 %v2039_v47, %v2039_v47  ;;  %5896 = vmatprep.subr.bf16.mxu0 %v7059_v27 }
 0x99a   : > { %5881 = vmatmul.mubr.msk.bf16.vlgmr.msra.gmra.mrb[28].mxu1 %vm1481_vm3, %v2041_v53 }
 0x99b   : > { %5891 = vmatpush3.bf16.xpose.msra.mxu1 %v2196_v55  ;;  %5892 = vmatprep.mubr.msk.bf16.mxu1 %vm7060_vm1, %v7059_v27 }
 0x99c   : > { %5902 = vmatprep.subr.bf16.mxu1 %v7059_v27 }
 0x99e   : > { %5887 = vmatmul.mubr.msk.bf16.vlgmr.msra.gmra.mrb[24].mxu0 %vm1481_vm3, %v2139_v20 }
 0x99f   : > { %5898 = vmatprep.mubr.msk.bf16.mxu0 %vm7060_vm1, %v7059_v27 }
 0x9a2   : > { %5893 = vmatmul.mubr.msk.bf16.vlgmr.msra.gmra.mrb[32].mxu1 %vm1481_vm3, %v2189_v21 }
 0x9a3   : > { %5904 = vmatprep.mubr.msk.bf16.mxu1 %vm7060_vm1, %v7059_v27 }
 0xa69   : > { %v2084_v22 = vpop.f32.mrb[20].mxu0 }
 0xa6a   : > { %v5876_v23 = vpop.f32.mrb[21].mxu0 }
 0xa6b   : > { %v2087_v24 = vpop.f32.mrb[22].mxu0 }
 0xa6c   : > { %v5877_v25 = vpop.f32.mrb[23].mxu0 }
 0xa6d   : > { %v2132_v26 = vpop.f32.mrb[28].mxu1 }
 0xa6e   : > { %v6342_v28 = vpack.i.bf16 %v2132_v26, %v2084_v22  ;;  %v5882_v33 = vpop.f32.mrb[29].mxu1 }
 0xa6f   : > { %v2135_v34 = vpop.f32.mrb[30].mxu1 }
 0xa70   : > { %v5883_v36 = vpop.f32.mrb[31].mxu1 }
 0xa71   : > { %v2182_v37 = vpop.f32.mrb[24].mxu0 }
 0xa72   : > { %v5888_v38 = vpop.f32.mrb[25].mxu0  ;;  %v2238_v41 = vsel %vm1481_vm3, %v2182_v37, -inf }
 0xa73   : > { %2239 = vmax.xlane.f32.xlu1 %v2238_v41  ;;  %v2185_v43 = vpop.f32.mrb[26].mxu0 }
 0xa74   : > { %v5889_v45 = vpop.f32.mrb[27].mxu0 }
 0xa75   : > { %v2232_v46 = vpop.f32.mrb[32].mxu1 }
 0xa76   : > { %v5894_v49 = vpop.f32.mrb[33].mxu1  ;;  %v2241_v50 = vsel %vm1481_vm3, %v2232_v46, -inf }
 0xa77   : > { %2242 = vmax.xlane.f32.xlu0 %v2241_v50  ;;  %v2235_v51 = vpop.f32.mrb[34].mxu1 }
 0xa78   : > { %v5895_v52 = vpop.f32.mrb[35].mxu1 }
 0xb00   : > { %v2240_v54 = vpop.xlane.xlu1 %2239 }
 0xb01   : > { %v2244_v56 = vsub.f32 %v2182_v37, %v2240_v54 }
 0xb03   : > { %v2246_v57 = vmul.f32 1.442695, %v2244_v56  ;;  %v6386_v56 = vld [vmem:[%s7753_s24] sm:$0xff]  }
 0xb04   : > { %v2243_v58 = vpop.xlane.xlu0 %2242 }
 0xb05   : > { %6424 = vpow2.f32 %v2246_v57  ;;  %v2245_v59 = vsub.f32 %v2232_v46, %v2243_v58  ;;  %v6387_v57 = vld [vmem:[%s7753_s24 + $0x8] sm:$0xff]   ;;  %s8768_s24 = sld [smem:[#allocation35_spill]] }
 0xb07   : > { %v2248_v60 = vmul.f32 1.442695, %v2245_v59 }
 0xb09   : > { %6426 = vpow2.f32 %v2248_v60 }
 0xb0f   : > { %v6425_v61 = vpop.eup %6424 }
 0xb10   : > { %v2250_v62 = vsel %vm1481_vm3, %v6425_v61, 0.0 }
 0xb11   : > { %2251 = vadd.xlane.f32.xlu0 %v2250_v62 }
 0xb13   : > { %v6427_v63 = vpop.eup %6426 }
 0xb14   : > { %v2253_v0 = vsel %vm1481_vm3, %v6427_v63, 0.0 }
 0xb15   : > { %2254 = vadd.xlane.f32.xlu1 %v2253_v0 }
 0xb26   : > { %2310 = vrot.lane.b32.xlu1 %v7898_v16, %s7068_s8 }
 0xb27   : > { %2262 = vrot.lane.b32.xlu0 %v7896_v15, %s7068_s8 }
 0xb2a   : > { %6338 = vrot.lane.b32.xlu1 %v6337_v40, %s7069_s13 }
 0xb2b   : > { %6343 = vrot.lane.b32.xlu0 %v6342_v28, %s7070_s3 }
 0xb9e   : > { %v2252_v1 = vpop.xlane.xlu0 %2251 }
 0xb9f   : > { %6428 = vrcp.f32 %v2252_v1 }
 0xba2   : > { %v2255_v2 = vpop.xlane.xlu1 %2254  ;;  %v2263_v3 = vpop.permute.xlu0 %2262 }
 0xba3   : > { %6430 = vrcp.f32 %v2255_v2  ;;  %v2268_v4 = vsel %vm1604_vm4, %v2263_v3, 0  ;;  %v2564_v3 = vld [vmem:[#allocation2] sm:$0xff] }
 0xba4   : > { %5897 = vmatpush3.bf16.msra.mxu0 %v2268_v4  ;;  %v8061_v4 = vld [vmem:[%s1063_s11] ss:$0 sm:$0xff]  ;;  %s8772_s11 = sld [smem:[#allocation36_spill]] }
 0xba5   : > { %5908 = vmatprep.subr.bf16.mxu0 %v7059_v27 }
 0xba6   : > { %v2311_v15 = vpop.permute.xlu1 %2310  ;;  %v6344_v20 = vpop.permute.xlu0 %6343 }
 0xba7   : > { %v2316_v16 = vsel %vm1604_vm4, %v2311_v15, 0  ;;  %v6346_v23 = vunpack.i.h.bf16 %v6344_v20  ;;  %v6345_v24 = vunpack.i.l.bf16 %v6344_v20 }
 0xba8   : > { %5903 = vmatpush3.bf16.msra.mxu1 %v2316_v16 }
 0xba9   : > { %v6429_v35 = vpop.eup %6428  ;;  %5916 = vmatprep.subr.bf16.mxu1 %v7059_v27 }
 0xbaa   : > { %v2258_v39 = vmul.f32 %v6429_v35, %v6425_v61  ;;  %v6339_v19 = vpop.permute.xlu1 %6338 }
 0xbab   : > { %v6341_v53 = vunpack.i.h.bf16 %v6339_v19  ;;  %v6340_v55 = vunpack.i.l.bf16 %v6339_v19 }
 0xbac   : > { %v2260_v40 = vpack.c.bf16 %v2258_v39, %v2258_v39  ;;  %v2482_v39 = vlaneseq }
 0xbad   : > { %v6431_v5 = vpop.eup %6430  ;;  %v2383_v21 = vsel %vm1481_vm3, %v7929_v48, %v6341_v53  ;;  %v2382_v22 = vsel %vm1481_vm3, %v7927_v42, %v6340_v55  ;;  %v5570_v42 = vld [vmem:[%s1055_s10] ss:$0 sm:$0xff] }
 0xbae   : > { %5899 = vmatmul.mubr.msk.bf16.vlgmr.msra.gmra.mrb[28].mxu0 %vm1481_vm3, %v2260_v40  ;;  %v2259_v6 = vmul.f32 %v6431_v5, %v6427_v63  ;;  %v2385_v33 = vsel %vm2384_vm5, %v2382_v22, %v6345_v24  ;;  %v2386_v34 = vsel %vm2384_vm5, %v2383_v21, %v6346_v23 }
 0xbaf   : > { %5912 = vmatprep.mubr.msk.bf16.mxu0 %vm7060_vm1, %v7059_v27  ;;  %5909 = vmatpush3.bf16.msra.mxu0 %v6384_v8 }
 0xbb0   : > { %v2261_v7 = vpack.c.bf16 %v2259_v6, %v2259_v6  ;;  %5910 = vmatprep.subr.bf16.mxu0 %v7059_v27 }
 0xbb2   : > { %5905 = vmatmul.mubr.msk.bf16.vlgmr.msra.gmra.mrb[36].mxu1 %vm1481_vm3, %v2261_v7  ;;  %v8065_v7 = vshrl.u32 %v2482_v39, 7 }
 0xbb3   : > { %5920 = vmatprep.mubr.msk.bf16.mxu1 %vm7060_vm1, %v7059_v27  ;;  %5911 = vmatpush3.bf16.msra.mxu0 %v6385_v9 }
 0xbb4   : > { %5917 = vmatpush3.bf16.msra.mxu1 %v6386_v56 }
 0xbb5   : > { %5918 = vmatprep.subr.bf16.mxu1 %v7059_v27 }
 0xbb8   : > { %5919 = vmatpush3.bf16.msra.mxu1 %v6387_v57 }
 0xc81   : > { %v2304_v10 = vpop.f32.mrb[28].mxu0 }
 0xc82   : > { %v5900_v11 = vpop.f32.mrb[29].mxu0 }
 0xc83   : > { %v2307_v12 = vpop.f32.mrb[30].mxu0  ;;  %v2565_v11 = vld [vmem:[#allocation2 + $0x8] sm:$0xff] }
 0xc84   : > { %v5901_v13 = vpop.f32.mrb[31].mxu0  ;;  %v8069_v12 = vld [vmem:[%s7765_s7] sm:$0xf] }
 0xc85   : > { %v2352_v14 = vpop.f32.mrb[36].mxu1 }
 0xc86   : > { %v6347_v17 = vpack.i.bf16 %v2352_v14, %v2304_v10  ;;  %v5906_v18 = vpop.f32.mrb[37].mxu1  ;;  %v2484_v10 = vsub.s32 0, %v8065_v7 }
 0xc87   : > { %v2355_v44 = vpop.f32.mrb[38].mxu1 }
 0xc88   : > { %6348 = vrot.lane.b32.xlu1 %v6347_v17, %s7071_s30  ;;  %v5907_v47 = vpop.f32.mrb[39].mxu1  ;;  %v2485_v13 = vrot.slane %v8069_v12, %v2484_v10  ;;  %v8077_v17 = vld [vmem:[%s7770_s29] sm:$0xf] }
 0xc89   : > { %v2491_v47 = vrot.slane %v8077_v17, %v2484_v10 }
 0xcfa   : > { %v6349_v25 = vpop.permute.xlu1 %6348 }
 0xcfb   : > { %v6351_v26 = vunpack.i.h.bf16 %v6349_v25  ;;  %v6350_v28 = vunpack.i.l.bf16 %v6349_v25 }
 0xcfd   : > { %v2389_v36 = vsel %vm2387_vm6, %v2386_v34, %v6351_v26  ;;  %v2388_v37 = vsel %vm2387_vm6, %v2385_v33, %v6350_v28  ;;  %v1328_v26 = vld [vmem:[%s8768_s24] sm:$0xff]  ;;  %v1331_v33 = vld [vmem:[%s8768_s24 + $0x18] sm:$0xff] }
 0xcfe   : > { %v2390_v48 = vpack.c.bf16 %v2389_v36, %v2388_v37 }
 0xd00   : > { %5913 = vmatmul.mubr.msk.bf16.vlgmr.msra.gmra.mrb[32].mxu0 %vm1366_vm2, %v2390_v48 }
 0xd01   : > { %5928 = vmatprep.mubr.msk.bf16.mxu0 %vm1366_vm2, %v2564_v3 }
 0xdd3   : > { %v2446_v38 = vpop.f32.mrb[32].mxu0 }
 0xdd4   : > { %v2447_v41 = vadd.f32 %v5570_v42, %v2446_v38  ;;  %v5914_v43 = vpop.f32.mrb[33].mxu0 }
 0xdd5   : > { %v2449_v45 = vpop.f32.mrb[34].mxu0 }
 0xdd6   : > { %v2450_v46 = vadd.f32 %v5570_v42, %v2449_v45  ;;  %v5915_v49 = vpop.f32.mrb[35].mxu0  ;;  %v2453_v50 = vadd.f32 %v2447_v41, %v7836_v29 }
 0xdd8   : > { %v2455_v51 = vsel %vm1366_vm2, %v2453_v50, 0.0  ;;  %v2454_v52 = vadd.f32 %v2450_v46, %v7838_v30 }
 0xdd9   : > { %2456 = vadd.xlane.f32.xlu0 %v2455_v51 }
 0xdda   : > { %v2458_v54 = vsel %vm1366_vm2, %v2454_v52, 0.0 }
 0xddb   : > { %2459 = vadd.xlane.f32.xlu1 %v2458_v54 }
 0xdec   : > { %2566 = vrot.lane.b32.xlu1 %v6386_v56, %s7062_s0 }
 0xdf0   : > { %2632 = vrot.lane.b32.xlu1 %v6386_v56, %s7061_s18 }
 0xdf4   : > { %2634 = vrot.lane.b32.xlu1 %v6387_v57, %s7061_s18 }
 0xe66   : > { %v2457_v29 = vpop.xlane.xlu0 %2456 }
 0xe67   : > { %v2462_v58 = vmul.f32 0.03125, %v2457_v29 }
 0xe68   : > { %v2460_v59 = vpop.xlane.xlu1 %2459 }
 0xe69   : > { %v2464_v30 = vsub.f32 %v2453_v50, %v2462_v58  ;;  %v2463_v60 = vmul.f32 0.03125, %v2460_v59 }
 0xe6b   : > { %v2465_v61 = vsub.f32 %v2454_v52, %v2463_v60  ;;  %v2466_v62 = vmul.f32 %v2464_v30, %v2464_v30 }
 0xe6c   : > { %v2567_v2 = vpop.permute.xlu1 %2566 }
 0xe6d   : > { %v2468_v63 = vsel %vm1366_vm2, %v2466_v62, 0.0  ;;  %v2467_v0 = vmul.f32 %v2465_v61, %v2465_v61  ;;  %5924 = vmatprep.subr.bf16.mxu0 %v2567_v2 }
 0xe6e   : > { %2469 = vadd.xlane.f32.xlu0 %v2468_v63  ;;  %5925 = vmatpush3.bf16.msra.mxu0 %v2567_v2 }
 0xe6f   : > { %v2471_v1 = vsel %vm1366_vm2, %v2467_v0, 0.0 }
 0xe70   : > { %v2633_v15 = vpop.permute.xlu1 %2632 }
 0xe71   : > { %5932 = vmatprep.subr.bf16.mxu1 %v2633_v15 }
 0xe72   : > { %2472 = vadd.xlane.f32.xlu0 %v2471_v1 }
 0xe74   : > { %v2635_v25 = vpop.permute.xlu1 %2634 }
 0xe88   : > { %2568 = vrot.lane.b32.xlu0 %v6387_v57, %s7062_s0 }
 0xe8c   : > { %2572 = vrot.lane.b32.xlu0 %v8061_v4, %s7062_s0 }
 0xefb   : > { %v2470_v16 = vpop.xlane.xlu0 %2469 }
 0xefc   : > { %v2474_v35 = vmul.f32 0.03125, %v2470_v16 }
 0xefe   : > { %v2476_v40 = vadd.f32 1e-05, %v2474_v35 }
 0xeff   : > { %v2473_v5 = vpop.xlane.xlu0 %2472 }
 0xf00   : > { %6432 = vrsqrt.f32 %v2476_v40  ;;  %v2475_v6 = vmul.f32 0.03125, %v2473_v5 }
 0xf02   : > { %v2477_v8 = vadd.f32 1e-05, %v2475_v6 }
 0xf03   : > { %v2569_v9 = vpop.permute.xlu0 %2568 }
 0xf04   : > { %6434 = vrsqrt.f32 %v2477_v8  ;;  %5926 = vmatprep.subr.bf16.mxu0 %v2569_v9 }
 0xf05   : > { %5927 = vmatpush3.bf16.msra.mxu0 %v2569_v9 }
 0xf06   : > { %5940 = vmatprep.subr.bf16.mxu0 %v7059_v27 }
 0xf07   : > { %v2573_v36 = vpop.permute.xlu0 %2572 }
 0xf08   : > { %5929 = vmatmul.mubr.msk.bf16.vlgmr.msra.gmra.mrb[36].mxu0 %vm1366_vm2, %v2565_v11 }
 0xf09   : > { %5942 = vmatprep.mubr.msk.bf16.mxu0 %vm7060_vm1, %v7059_v27 }
 0xf0a   : > { %v6433_v14 = vpop.eup %6432 }
 0xf0b   : > { %v2480_v18 = vmul.f32 %v6433_v14, %v2464_v30 }
 0xf0d   : > { %v2486_v44 = vmul.f32 %v2485_v13, %v2480_v18 }
 0xf0e   : > { %v6435_v19 = vpop.eup %6434 }
 0xf0f   : > { %v2481_v53 = vmul.f32 %v6435_v19, %v2465_v61  ;;  %v8080_v20 = vadd.f32 %v2491_v47, %v2486_v44 }
 0xf11   : > { %v2487_v55 = vmul.f32 %v2485_v13, %v2481_v53  ;;  %v2499_v22 = vadd.f32 %v8080_v20, %v7840_v31  ;;  %v1329_v31 = vld [vmem:[%s8768_s24 + $0x8] sm:$0xff] }
 0xf12   : > { %v2630_v28 = vpack.c.bf16 %v1329_v31, %v1328_v26 }
 0xf13   : > { %v8082_v21 = vadd.f32 %v2491_v47, %v2487_v55 }
 0xf15   : > { %v2500_v23 = vadd.f32 %v8082_v21, %v7843_v32  ;;  %v1330_v32 = vld [vmem:[%s8768_s24 + $0x10] sm:$0xff] }
 0xf16   : > { %v2631_v34 = vpack.c.bf16 %v1331_v33, %v1330_v32 }
 0xf17   : > { %v2501_v24 = vpack.c.bf16 %v2500_v23, %v2499_v22 }
 0xf19   : > { %5921 = vmatmul.mubr.msk.bf16.vlgmr.msra.gmra.mrb[40].mxu1 %vm1366_vm2, %v2501_v24 }
 0xf1a   : > { %5933 = vmatpush3.bf16.msra.mxu1 %v2633_v15  ;;  %5936 = vmatprep.mubr.msk.bf16.mxu1 %vm1366_vm2, %v2630_v28 }
 0xf1b   : > { %5934 = vmatprep.subr.bf16.mxu1 %v2635_v25 }
 0xf1e   : > { %5935 = vmatpush3.bf16.msra.mxu1 %v2635_v25 }
 0xf1f   : > { %5946 = vmatprep.subr.bf16.mxu1 %v7059_v27 }
 0xf21   : > { %5937 = vmatmul.mubr.msk.bf16.vlgmr.msra.gmra.mrb[44].mxu1 %vm1366_vm2, %v2631_v34 }
 0xf22   : > { %5948 = vmatprep.mubr.msk.bf16.mxu1 %vm7060_vm1, %v7059_v27 }
 0xfdb   : > { %v5930_v37 = vpop.f32.mrb[36].mxu0 }
 0xfdc   : > { %v2615_v48 = vpop.f32.mrb[37].mxu0  ;;  %v2624_v42 = vadd.f32 %v5930_v37, %v2573_v36 }
 0xfdd   : > { %v5931_v38 = vpop.f32.mrb[38].mxu0  ;;  %v2616_v41 = vadd.f32 %v2615_v48, %v2573_v36 }
 0xfde   : > { %v2627_v43 = vadd.f32 %v5931_v38, %v2573_v36  ;;  %v2618_v45 = vpop.f32.mrb[39].mxu0 }
 0xfdf   : > { %v2619_v46 = vadd.f32 %v2618_v45, %v2573_v36 }
 0xfe0   : > { %v8106_v49 = vpack.c.bf16 %v2627_v43, %v2624_v42 }
 0xfe1   : > { %v8108_v50 = vpack.c.bf16 %v2619_v46, %v2616_v41 }
 0xfe2   : > { %v2759_v51 = vsel %vm1481_vm3, %v8106_v49, 0 }
 0xfe3   : > { %v2713_v52 = vsel %vm1481_vm3, %v8108_v50, 0  ;;  %5947 = vmatpush3.bf16.xpose.msra.mxu1 %v2759_v51 }
 0xfe4   : > { %5941 = vmatpush3.bf16.xpose.msra.mxu0 %v2713_v52  ;;  %5958 = vmatprep.subr.bf16.mxu1 %v7059_v27 }
 0xfe5   : > { %5952 = vmatprep.subr.bf16.mxu0 %v7059_v27 }
 0xfec   : > { %v2557_v54 = vpop.f32.mrb[40].mxu1 }
 0xfed   : > { %v2558_v56 = vadd.f32 %v8061_v4, %v2557_v54  ;;  %v5922_v57 = vpop.f32.mrb[41].mxu1 }
 0xfee   : > { %v2560_v29 = vpop.f32.mrb[42].mxu1 }
 0xfef   : > { %v2701_v58 = vmul.f32 0.35355338, %v2558_v56  ;;  %v2561_v59 = vadd.f32 %v8061_v4, %v2560_v29  ;;  %v5923_v30 = vpop.f32.mrb[43].mxu1 }
 0xff1   : > { %v8118_v60 = vpack.c.bf16 %v2701_v58, %v2701_v58  ;;  %v2702_v61 = vmul.f32 0.35355338, %v2561_v59 }
 0xff3   : > { %v8120_v62 = vpack.c.bf16 %v2702_v61, %v2702_v61  ;;  %5943 = vmatmul.mubr.msk.bf16.vlgmr.msra.gmra.mrb[40].mxu0 %vm1481_vm3, %v8118_v60 }
 0xff4   : > { %5954 = vmatprep.mubr.msk.bf16.mxu0 %vm7060_vm1, %v7059_v27  ;;  %v5938_v63 = vpop.f32.mrb[44].mxu1 }
 0xff5   : > { %5949 = vmatmul.mubr.msk.bf16.vlgmr.msra.gmra.mrb[48].mxu1 %vm1481_vm3, %v8120_v62  ;;  %v2681_v0 = vpop.f32.mrb[45].mxu1 }
 0xff6   : > { %5960 = vmatprep.mubr.msk.bf16.mxu1 %vm7060_vm1, %v7059_v27  ;;  %v5939_v1 = vpop.f32.mrb[46].mxu1 }
 0xff7   : > { %v2684_v2 = vpop.f32.mrb[47].mxu1 }
0x10c6   : > { %v2749_v3 = vpop.f32.mrb[40].mxu0 }
0x10c7   : > { %v5944_v15 = vpop.f32.mrb[41].mxu0  ;;  %v2801_v16 = vsel %vm2384_vm5, %v2749_v3, -inf }
0x10c8   : > { %2802 = vmax.xlane.f32.xlu1 %v2801_v16  ;;  %v2752_v35 = vpop.f32.mrb[42].mxu0  ;;  %v2795_v39 = vpop.f32.mrb[48].mxu1 }
0x10c9   : > { %v5945_v40 = vpop.f32.mrb[43].mxu0  ;;  %v5950_v5 = vpop.f32.mrb[49].mxu1  ;;  %v2804_v6 = vsel %vm2384_vm5, %v2795_v39, -inf }
0x10ca   : > { %2805 = vmax.xlane.f32.xlu0 %v2804_v6  ;;  %v2798_v8 = vpop.f32.mrb[50].mxu1 }
0x10cb   : > { %v5951_v9 = vpop.f32.mrb[51].mxu1 }
0x10d9   : > { %2915 = vrot.lane.b32.xlu1 %v8108_v50, %s7064_s2 }
0x1155   : > { %v2803_v10 = vpop.xlane.xlu1 %2802 }
0x1156   : > { %v2807_v11 = vsub.f32 %v2749_v3, %v2803_v10 }
0x1157   : > { %v2806_v13 = vpop.xlane.xlu0 %2805 }
0x1158   : > { %v2809_v14 = vmul.f32 1.442695, %v2807_v11  ;;  %v2808_v18 = vsub.f32 %v2795_v39, %v2806_v13 }
0x1159   : > { %v2916_v22 = vpop.permute.xlu1 %2915 }
0x115a   : > { %6436 = vpow2.f32 %v2809_v14  ;;  %v2811_v44 = vmul.f32 1.442695, %v2808_v18  ;;  %v2921_v43 = vsel %vm1481_vm3, %v2916_v22, 0 }
0x115c   : > { %6438 = vpow2.f32 %v2811_v44 }
0x1164   : > { %v6437_v47 = vpop.eup %6436 }
0x1165   : > { %v2813_v19 = vsel %vm2384_vm5, %v6437_v47, 0.0 }
0x1166   : > { %v6439_v53 = vpop.eup %6438  ;;  %2814 = vadd.xlane.f32.xlu0 %v2813_v19 }
0x1167   : > { %v2816_v55 = vsel %vm2384_vm5, %v6439_v53, 0.0 }
0x1168   : > { %2817 = vadd.xlane.f32.xlu1 %v2816_v55 }
0x1179   : > { %2967 = vrot.lane.b32.xlu1 %v8106_v49, %s7064_s2 }
0x117c   : > { %2638 = vrot.lane.b32.xlu0 %v8061_v4, %s7061_s18 }
0x117d   : > { %2964 = vrot.lane.b32.xlu1 %v8120_v62, %s7064_s2 }
0x1180   : > { %2912 = vrot.lane.b32.xlu0 %v8118_v60, %s7064_s2 }
0x11f3   : > { %v2815_v23 = vpop.xlane.xlu0 %2814 }
0x11f4   : > { %6440 = vrcp.f32 %v2815_v23 }
0x11f5   : > { %v2818_v24 = vpop.xlane.xlu1 %2817 }
0x11f6   : > { %6442 = vrcp.f32 %v2818_v24 }
0x11f7   : > { %v2639_v25 = vpop.permute.xlu0 %2638 }
0x11f8   : > { %v2682_v26 = vadd.f32 %v2681_v0, %v2639_v25  ;;  %v2690_v31 = vadd.f32 %v5938_v63, %v2639_v25  ;;  %v2685_v32 = vadd.f32 %v2684_v2, %v2639_v25  ;;  %v2693_v28 = vadd.f32 %v5939_v1, %v2639_v25 }
0x11f9   : > { %v2968_v38 = vpop.permute.xlu1 %2967 }
0x11fa   : > { %v8144_v33 = vpack.c.bf16 %v2685_v32, %v2682_v26  ;;  %v8146_v34 = vpack.c.bf16 %v2693_v28, %v2690_v31  ;;  %v2973_v45 = vsel %vm1481_vm3, %v2968_v38, 0 }
0x11fb   : > { %v2913_v46 = vpop.permute.xlu0 %2912 }
0x11fc   : > { %5953 = vmatpush3.bf16.msra.mxu0 %v8144_v33  ;;  %5959 = vmatpush3.bf16.msra.mxu1 %v8146_v34 }
0x11fd   : > { %5964 = vmatprep.subr.bf16.mxu0 %v7059_v27  ;;  %5970 = vmatprep.subr.bf16.mxu1 %v7059_v27  ;;  %v2965_v51 = vpop.permute.xlu1 %2964 }
0x11fe   : > { %v6441_v4 = vpop.eup %6440 }
0x11ff   : > { %v2821_v36 = vmul.f32 %v6441_v4, %v6437_v47 }
0x1200   : > { %v6443_v37 = vpop.eup %6442 }
0x1201   : > { %v2822_v48 = vmul.f32 %v6443_v37, %v6439_v53  ;;  %v2823_v42 = vpack.c.bf16 %v2821_v36, %v2821_v36 }
0x1203   : > { %5955 = vmatmul.mubr.msk.bf16.vlgmr.msra.gmra.mrb[44].mxu0 %vm2384_vm5, %v2823_v42  ;;  %v2824_v41 = vpack.c.bf16 %v2822_v48, %v2822_v48 }
0x1204   : > { %5966 = vmatprep.mubr.msk.bf16.mxu0 %vm7060_vm1, %v7059_v27 }
0x1205   : > { %5961 = vmatmul.mubr.msk.bf16.vlgmr.msra.gmra.mrb[52].mxu1 %vm2384_vm5, %v2824_v41  ;;  %5965 = vmatpush3.bf16.xpose.msra.mxu0 %v2921_v43 }
0x1206   : > { %5971 = vmatpush3.bf16.xpose.msra.mxu1 %v2973_v45  ;;  %5972 = vmatprep.mubr.msk.bf16.mxu1 %vm7060_vm1, %v7059_v27 }
0x1207   : > { %5976 = vmatprep.subr.bf16.mxu0 %v7059_v27  ;;  %5982 = vmatprep.subr.bf16.mxu1 %v7059_v27 }
0x120c   : > { %5967 = vmatmul.mubr.msk.bf16.vlgmr.msra.gmra.mrb[48].mxu0 %vm1481_vm3, %v2913_v46 }
0x120d   : > { %5973 = vmatmul.mubr.msk.bf16.vlgmr.msra.gmra.mrb[56].mxu1 %vm1481_vm3, %v2965_v51  ;;  %5978 = vmatprep.mubr.msk.bf16.mxu0 %vm7060_vm1, %v7059_v27 }
0x120e   : > { %5984 = vmatprep.mubr.msk.bf16.mxu1 %vm7060_vm1, %v7059_v27 }
0x12d6   : > { %v8168_v52 = vpop.f32.mrb[44].mxu0 }
0x12d7   : > { %v5956_v54 = vpop.f32.mrb[45].mxu0 }
0x12d8   : > { %v2865_v56 = vpop.f32.mrb[46].mxu0  ;;  %v8170_v57 = vpop.f32.mrb[52].mxu1 }
0x12d9   : > { %v5957_v29 = vpop.f32.mrb[47].mxu0  ;;  %v5962_v58 = vpop.f32.mrb[53].mxu1 }
0x12da   : > { %v2908_v59 = vpop.f32.mrb[54].mxu1 }
0x12db   : > { %v5963_v30 = vpop.f32.mrb[55].mxu1 }
0x12df   : > { %v2957_v61 = vpop.f32.mrb[48].mxu0 }
0x12e0   : > { %v5968_v63 = vpop.f32.mrb[49].mxu0  ;;  %v3009_v0 = vpop.f32.mrb[56].mxu1  ;;  %v3015_v1 = vsel %vm2384_vm5, %v2957_v61, -inf }
0x12e1   : > { %3016 = vmax.xlane.f32.xlu0 %v3015_v1  ;;  %v2960_v2 = vpop.f32.mrb[50].mxu0  ;;  %v5974_v3 = vpop.f32.mrb[57].mxu1  ;;  %v3018_v15 = vsel %vm2384_vm5, %v3009_v0, -inf }
0x12e2   : > { %v5969_v16 = vpop.f32.mrb[51].mxu0  ;;  %3019 = vmax.xlane.f32.xlu1 %v3018_v15  ;;  %v3012_v35 = vpop.f32.mrb[58].mxu1 }
0x12e3   : > { %v5975_v39 = vpop.f32.mrb[59].mxu1 }
0x12f3   : > { %3040 = vrot.lane.b32.xlu1 %v8144_v33, %s7064_s2 }
0x12f7   : > { %3135 = vrot.lane.b32.xlu1 %v8108_v50, %s7066_s14 }
0x12fb   : > { %3185 = vrot.lane.b32.xlu1 %v8106_v49, %s7066_s14 }
0x12ff   : > { %3183 = vrot.lane.b32.xlu1 %v8120_v62, %s7066_s14 }
0x136e   : > { %v3017_v40 = vpop.xlane.xlu0 %3016 }
0x136f   : > { %v3021_v5 = vsub.f32 %v2957_v61, %v3017_v40  ;;  %v3020_v6 = vpop.xlane.xlu1 %3019 }
0x1370   : > { %v3022_v8 = vsub.f32 %v3009_v0, %v3020_v6 }
0x1371   : > { %v3023_v9 = vmul.f32 1.442695, %v3021_v5 }
0x1372   : > { %v3025_v10 = vmul.f32 1.442695, %v3022_v8 }
0x1373   : > { %6444 = vpow2.f32 %v3023_v9  ;;  %v3041_v11 = vpop.permute.xlu1 %3040 }
0x1374   : > { %5977 = vmatpush3.bf16.msra.mxu0 %v3041_v11  ;;  %6446 = vpow2.f32 %v3025_v10 }
0x1375   : > { %5988 = vmatprep.subr.bf16.mxu0 %v7059_v27 }
0x1377   : > { %v3136_v22 = vpop.permute.xlu1 %3135 }
0x1378   : > { %v3141_v26 = vsel %vm1481_vm3, %v3136_v22, 0 }
0x137b   : > { %v3186_v32 = vpop.permute.xlu1 %3185 }
0x137c   : > { %v3191_v4 = vsel %vm1481_vm3, %v3186_v32, 0 }
0x137d   : > { %v6445_v13 = vpop.eup %6444 }
0x137e   : > { %v3027_v14 = vsel %vm2384_vm5, %v6445_v13, 0.0  ;;  %v6447_v18 = vpop.eup %6446 }
0x137f   : > { %3028 = vadd.xlane.f32.xlu0 %v3027_v14  ;;  %v3030_v44 = vsel %vm2384_vm5, %v6447_v18, 0.0  ;;  %v3184_v37 = vpop.permute.xlu1 %3183 }
0x1383   : > { %3031 = vadd.xlane.f32.xlu0 %v3030_v44 }
0x1399   : > { %3087 = vrot.lane.b32.xlu0 %v8146_v34, %s7064_s2 }
0x139d   : > { %3133 = vrot.lane.b32.xlu0 %v8118_v60, %s7066_s14 }
0x140c   : > { %v3029_v47 = vpop.xlane.xlu0 %3028 }
0x140d   : > { %6448 = vrcp.f32 %v3029_v47 }
0x1410   : > { %v3032_v19 = vpop.xlane.xlu0 %3031 }
0x1411   : > { %6450 = vrcp.f32 %v3032_v19 }
0x1414   : > { %v3088_v53 = vpop.permute.xlu0 %3087 }
0x1415   : > { %5983 = vmatpush3.bf16.msra.mxu1 %v3088_v53 }
0x1416   : > { %5994 = vmatprep.subr.bf16.mxu1 %v7059_v27 }
0x1417   : > { %v6449_v55 = vpop.eup %6448 }
0x1418   : > { %v3035_v23 = vmul.f32 %v6449_v55, %v6445_v13  ;;  %v3134_v36 = vpop.permute.xlu0 %3133 }
0x141a   : > { %v3037_v24 = vpack.c.bf16 %v3035_v23, %v3035_v23 }
0x141b   : > { %v6451_v25 = vpop.eup %6450 }
0x141c   : > { %v3036_v31 = vmul.f32 %v6451_v25, %v6447_v18  ;;  %5979 = vmatmul.mubr.msk.bf16.vlgmr.msra.gmra.mrb[52].mxu0 %vm2384_vm5, %v3037_v24 }
0x141d   : > { %5989 = vmatpush3.bf16.xpose.msra.mxu0 %v3141_v26  ;;  %5990 = vmatprep.mubr.msk.bf16.mxu0 %vm7060_vm1, %v7059_v27 }
0x141e   : > { %v3038_v28 = vpack.c.bf16 %v3036_v31, %v3036_v31  ;;  %6000 = vmatprep.subr.bf16.mxu0 %v7059_v27 }
0x1420   : > { %5985 = vmatmul.mubr.msk.bf16.vlgmr.msra.gmra.mrb[60].mxu1 %vm2384_vm5, %v3038_v28 }
0x1421   : > { %5995 = vmatpush3.bf16.xpose.msra.mxu1 %v3191_v4  ;;  %5996 = vmatprep.mubr.msk.bf16.mxu1 %vm7060_vm1, %v7059_v27 }
0x1422   : > { %6006 = vmatprep.subr.bf16.mxu1 %v7059_v27 }
0x1424   : > { %5991 = vmatmul.mubr.msk.bf16.vlgmr.msra.gmra.mrb[56].mxu0 %vm1481_vm3, %v3134_v36 }
0x1425   : > { %6002 = vmatprep.mubr.msk.bf16.mxu0 %vm7060_vm1, %v7059_v27 }
0x1428   : > { %5997 = vmatmul.mubr.msk.bf16.vlgmr.msra.gmra.mrb[64].mxu1 %vm1481_vm3, %v3184_v37 }
0x1429   : > { %6008 = vmatprep.mubr.msk.bf16.mxu1 %vm7060_vm1, %v7059_v27 }
0x14ef   : > { %v8206_v48 = vpop.f32.mrb[52].mxu0 }
0x14f0   : > { %v5980_v42 = vpop.f32.mrb[53].mxu0 }
0x14f1   : > { %v3083_v38 = vpop.f32.mrb[54].mxu0 }
0x14f2   : > { %v5981_v41 = vpop.f32.mrb[55].mxu0 }
0x14f3   : > { %v8208_v43 = vpop.f32.mrb[60].mxu1 }
0x14f4   : > { %v6352_v45 = vpack.i.bf16 %v8208_v43, %v8206_v48  ;;  %v5986_v46 = vpop.f32.mrb[61].mxu1 }
0x14f5   : > { %v3130_v51 = vpop.f32.mrb[62].mxu1 }
0x14f6   : > { %v5987_v54 = vpop.f32.mrb[63].mxu1 }
0x14f7   : > { %v3177_v56 = vpop.f32.mrb[56].mxu0 }
0x14f8   : > { %v5992_v29 = vpop.f32.mrb[57].mxu0  ;;  %v3233_v58 = vsel %vm2384_vm5, %v3177_v56, -inf }
0x14f9   : > { %3234 = vmax.xlane.f32.xlu0 %v3233_v58  ;;  %v3180_v59 = vpop.f32.mrb[58].mxu0 }
0x14fa   : > { %v5993_v30 = vpop.f32.mrb[59].mxu0 }
0x14fb   : > { %v3227_v61 = vpop.f32.mrb[64].mxu1 }
0x14fc   : > { %v5998_v63 = vpop.f32.mrb[65].mxu1  ;;  %v3236_v0 = vsel %vm2384_vm5, %v3227_v61, -inf }
0x14fd   : > { %3237 = vmax.xlane.f32.xlu1 %v3236_v0  ;;  %v3230_v1 = vpop.f32.mrb[66].mxu1 }
0x14fe   : > { %v5999_v2 = vpop.f32.mrb[67].mxu1 }
0x150e   : > { %3257 = vrot.lane.b32.xlu1 %v8144_v33, %s7066_s14 }
0x1512   : > { %3351 = vrot.lane.b32.xlu1 %v8108_v50, %s7068_s8 }
0x1516   : > { %3401 = vrot.lane.b32.xlu1 %v8106_v49, %s7068_s8 }
0x151a   : > { %3399 = vrot.lane.b32.xlu1 %v8120_v62, %s7068_s8 }
0x1586   : > { %v3235_v3 = vpop.xlane.xlu0 %3234 }
0x1587   : > { %v3239_v15 = vsub.f32 %v3177_v56, %v3235_v3 }
0x1589   : > { %v3241_v16 = vmul.f32 1.442695, %v3239_v15 }
0x158a   : > { %v3238_v35 = vpop.xlane.xlu1 %3237 }
0x158b   : > { %6452 = vpow2.f32 %v3241_v16  ;;  %v3240_v39 = vsub.f32 %v3227_v61, %v3238_v35 }
0x158d   : > { %v3243_v40 = vmul.f32 1.442695, %v3240_v39 }
0x158e   : > { %v3258_v5 = vpop.permute.xlu1 %3257 }
0x158f   : > { %6454 = vpow2.f32 %v3243_v40  ;;  %6001 = vmatpush3.bf16.msra.mxu0 %v3258_v5 }
0x1590   : > { %6012 = vmatprep.subr.bf16.mxu0 %v7059_v27 }
0x1592   : > { %v3352_v13 = vpop.permute.xlu1 %3351 }
0x1593   : > { %v3357_v47 = vsel %vm1481_vm3, %v3352_v13, 0 }
0x1595   : > { %v6453_v6 = vpop.eup %6452 }
0x1596   : > { %v3245_v50 = vsel %vm2384_vm5, %v6453_v6, 0.0  ;;  %v3402_v53 = vpop.permute.xlu1 %3401 }
0x1597   : > { %3246 = vadd.xlane.f32.xlu0 %v3245_v50  ;;  %v3407_v55 = vsel %vm1481_vm3, %v3402_v53, 0 }
0x1599   : > { %v6455_v49 = vpop.eup %6454 }
0x159a   : > { %v3248_v8 = vsel %vm2384_vm5, %v6455_v49, 0.0  ;;  %v3400_v23 = vpop.permute.xlu1 %3399 }
0x159b   : > { %3249 = vadd.xlane.f32.xlu0 %v3248_v8  ;;  %v6389_v8 = vld [vmem:[%s1072_s12 + $0x8] sm:$0xff]  }
0x15b1   : > { %3303 = vrot.lane.b32.xlu0 %v8146_v34, %s7066_s14 }
0x15b5   : > { %3349 = vrot.lane.b32.xlu0 %v8118_v60, %s7068_s8 }
0x1624   : > { %v3247_v62 = vpop.xlane.xlu0 %3246 }
0x1625   : > { %6456 = vrcp.f32 %v3247_v62 }
0x1628   : > { %v3250_v9 = vpop.xlane.xlu0 %3249 }
0x1629   : > { %6458 = vrcp.f32 %v3250_v9 }
0x162c   : > { %v3304_v10 = vpop.permute.xlu0 %3303 }
0x162d   : > { %6007 = vmatpush3.bf16.msra.mxu1 %v3304_v10 }
0x162e   : > { %6018 = vmatprep.subr.bf16.mxu1 %v7059_v27 }
0x162f   : > { %v6457_v11 = vpop.eup %6456 }
0x1630   : > { %v3253_v14 = vmul.f32 %v6457_v11, %v6453_v6  ;;  %v3350_v22 = vpop.permute.xlu0 %3349 }
0x1632   : > { %v3255_v18 = vpack.c.bf16 %v3253_v14, %v3253_v14 }
0x1633   : > { %v6459_v44 = vpop.eup %6458 }
0x1634   : > { %v3254_v19 = vmul.f32 %v6459_v44, %v6455_v49  ;;  %6003 = vmatmul.mubr.msk.bf16.vlgmr.msra.gmra.mrb[60].mxu0 %vm2384_vm5, %v3255_v18  ;;  %v6388_v49 = vld [vmem:[%s1072_s12] sm:$0xff]   ;;  %s8769_s12 = scalar_lea.vmem [#allocation16], %s7734_s21 }
0x1635   : > { %6013 = vmatpush3.bf16.xpose.msra.mxu0 %v3357_v47  ;;  %6014 = vmatprep.mubr.msk.bf16.mxu0 %vm7060_vm1, %v7059_v27 }
0x1636   : > { %v3256_v60 = vpack.c.bf16 %v3254_v19, %v3254_v19  ;;  %6024 = vmatprep.subr.bf16.mxu0 %v7059_v27 }
0x1638   : > { %6009 = vmatmul.mubr.msk.bf16.vlgmr.msra.gmra.mrb[68].mxu1 %vm2384_vm5, %v3256_v60 }
0x1639   : > { %6019 = vmatpush3.bf16.xpose.msra.mxu1 %v3407_v55  ;;  %6020 = vmatprep.mubr.msk.bf16.mxu1 %vm7060_vm1, %v7059_v27 }
0x163a   : > { %6030 = vmatprep.subr.bf16.mxu1 %v7059_v27 }
0x163c   : > { %6015 = vmatmul.mubr.msk.bf16.vlgmr.msra.gmra.mrb[64].mxu0 %vm1481_vm3, %v3350_v22 }
0x163d   : > { %6026 = vmatprep.mubr.msk.bf16.mxu0 %vm7060_vm1, %v7059_v27 }
0x1640   : > { %6021 = vmatmul.mubr.msk.bf16.vlgmr.msra.gmra.mrb[72].mxu1 %vm1481_vm3, %v3400_v23 }
0x1641   : > { %6032 = vmatprep.mubr.msk.bf16.mxu1 %vm7060_vm1, %v7059_v27 }
0x1707   : > { %v3297_v24 = vpop.f32.mrb[60].mxu0 }
0x1708   : > { %v6004_v25 = vpop.f32.mrb[61].mxu0 }
0x1709   : > { %v3300_v26 = vpop.f32.mrb[62].mxu0 }
0x170a   : > { %v6005_v31 = vpop.f32.mrb[63].mxu0 }
0x170b   : > { %v3343_v32 = vpop.f32.mrb[68].mxu1 }
0x170c   : > { %v6357_v28 = vpack.i.bf16 %v3343_v32, %v3297_v24  ;;  %v6010_v4 = vpop.f32.mrb[69].mxu1 }
0x170d   : > { %v3346_v36 = vpop.f32.mrb[70].mxu1 }
0x170e   : > { %v6011_v37 = vpop.f32.mrb[71].mxu1 }
0x170f   : > { %v3393_v42 = vpop.f32.mrb[64].mxu0 }
0x1710   : > { %v6016_v38 = vpop.f32.mrb[65].mxu0  ;;  %v3449_v41 = vsel %vm2384_vm5, %v3393_v42, -inf }
0x1711   : > { %3450 = vmax.xlane.f32.xlu0 %v3449_v41  ;;  %v3396_v46 = vpop.f32.mrb[66].mxu0  ;;  %v5598_v38 = vld [vmem:[%s1080_s19] ss:$0 sm:$0xff]  ;;  %s8770_s19 = smov %s8769_s12 }
0x1712   : > { %v6017_v51 = vpop.f32.mrb[67].mxu0 }
0x1713   : > { %v3443_v54 = vpop.f32.mrb[72].mxu1 }
0x1714   : > { %v6022_v56 = vpop.f32.mrb[73].mxu1  ;;  %v3452_v29 = vsel %vm2384_vm5, %v3443_v54, -inf }
0x1715   : > { %3453 = vmax.xlane.f32.xlu1 %v3452_v29  ;;  %v3446_v58 = vpop.f32.mrb[74].mxu1 }
0x1716   : > { %v6023_v59 = vpop.f32.mrb[75].mxu1 }
0x1726   : > { %3473 = vrot.lane.b32.xlu1 %v8144_v33, %s7068_s8 }
0x172a   : > { %6353 = vrot.lane.b32.xlu1 %v6352_v45, %s7069_s13 }
0x172e   : > { %6358 = vrot.lane.b32.xlu1 %v6357_v28, %s7070_s3 }
0x179e   : > { %v3451_v30 = vpop.xlane.xlu0 %3450 }
0x179f   : > { %v3455_v61 = vsub.f32 %v3393_v42, %v3451_v30  ;;  %v6390_v30 = vld [vmem:[%s8769_s12] sm:$0xff]  }
0x17a1   : > { %v3457_v63 = vmul.f32 1.442695, %v3455_v61  ;;  %v6391_v61 = vld [vmem:[%s8770_s19 + $0x8] sm:$0xff]  }
0x17a2   : > { %v3454_v0 = vpop.xlane.xlu1 %3453 }
0x17a3   : > { %6460 = vpow2.f32 %v3457_v63  ;;  %v3456_v1 = vsub.f32 %v3443_v54, %v3454_v0 }
0x17a5   : > { %v3459_v2 = vmul.f32 1.442695, %v3456_v1 }
0x17a6   : > { %v3474_v3 = vpop.permute.xlu1 %3473 }
0x17a7   : > { %6462 = vpow2.f32 %v3459_v2  ;;  %6025 = vmatpush3.bf16.msra.mxu0 %v3474_v3 }
0x17a8   : > { %6036 = vmatprep.subr.bf16.mxu0 %v7059_v27 }
0x17aa   : > { %v6354_v19 = vpop.permute.xlu1 %6353 }
0x17ab   : > { %v6356_v60 = vunpack.i.h.bf16 %v6354_v19  ;;  %v6355_v55 = vunpack.i.l.bf16 %v6354_v19 }
0x17ad   : > { %v6461_v33 = vpop.eup %6460  ;;  %v3590_v25 = vsel %vm1481_vm3, %v8170_v57, %v6356_v60  ;;  %v3589_v26 = vsel %vm1481_vm3, %v8168_v52, %v6355_v55  ;;  %v6512_v60 = vld [vmem:[#allocation7] sm:$0xff] }
0x17ae   : > { %v3461_v15 = vsel %vm2384_vm5, %v6461_v33, 0.0  ;;  %v6359_v53 = vpop.permute.xlu1 %6358 }
0x17af   : > { %3462 = vadd.xlane.f32.xlu0 %v3461_v15  ;;  %v6361_v22 = vunpack.i.h.bf16 %v6359_v53  ;;  %v6360_v23 = vunpack.i.l.bf16 %v6359_v53 }
0x17b1   : > { %v6463_v48 = vpop.eup %6462  ;;  %v3591_v28 = vsel %vm2384_vm5, %v3589_v26, %v6360_v23  ;;  %v3592_v4 = vsel %vm2384_vm5, %v3590_v25, %v6361_v22  ;;  %v6513_v22 = vld [vmem:[#allocation7 + $0x8] sm:$0xff]  ;;  %v1333_v25 = vld [vmem:[%s8772_s11 + $0x8] sm:$0xff]  ;;  %v1334_v26 = vld [vmem:[%s8772_s11 + $0x10] sm:$0xff] }
0x17b2   : > { %v3464_v43 = vsel %vm2384_vm5, %v6463_v48, 0.0 }
0x17b3   : > { %3465 = vadd.xlane.f32.xlu0 %v3464_v43  ;;  %v3768_v43 = vld [vmem:[#allocation3] sm:$0xff] }
0x17c9   : > { %3519 = vrot.lane.b32.xlu0 %v8146_v34, %s7068_s8 }
0x183c   : > { %v3463_v45 = vpop.xlane.xlu0 %3462 }
0x183d   : > { %6464 = vrcp.f32 %v3463_v45  ;;  %v8302_v45 = vld [vmem:[%s8771_s6] ss:$0 sm:$0xff] }
0x1840   : > { %v3466_v16 = vpop.xlane.xlu0 %3465 }
0x1841   : > { %6466 = vrcp.f32 %v3466_v16 }
0x1844   : > { %v3520_v35 = vpop.permute.xlu0 %3519 }
0x1845   : > { %6031 = vmatpush3.bf16.msra.mxu1 %v3520_v35 }
0x1846   : > { %6044 = vmatprep.subr.bf16.mxu1 %v7059_v27 }
0x1847   : > { %v6465_v39 = vpop.eup %6464 }
0x1848   : > { %v3469_v40 = vmul.f32 %v6465_v39, %v6461_v33 }
0x184a   : > { %v3471_v5 = vpack.c.bf16 %v3469_v40, %v3469_v40 }
0x184b   : > { %v6467_v6 = vpop.eup %6466 }
0x184c   : > { %v3470_v50 = vmul.f32 %v6467_v6, %v6463_v48  ;;  %6027 = vmatmul.mubr.msk.bf16.vlgmr.msra.gmra.mrb[68].mxu0 %vm2384_vm5, %v3471_v5 }
0x184d   : > { %6040 = vmatprep.mubr.msk.bf16.mxu0 %vm7060_vm1, %v7059_v27  ;;  %6037 = vmatpush3.bf16.msra.mxu0 %v6388_v49  ;;  %v3688_v49 = vsub.s32 1, %v8065_v7 }
0x184e   : > { %v3472_v34 = vpack.c.bf16 %v3470_v50, %v3470_v50  ;;  %6038 = vmatprep.subr.bf16.mxu0 %v7059_v27 }
0x1850   : > { %6033 = vmatmul.mubr.msk.bf16.vlgmr.msra.gmra.mrb[76].mxu1 %vm2384_vm5, %v3472_v34 }
0x1851   : > { %6048 = vmatprep.mubr.msk.bf16.mxu1 %vm7060_vm1, %v7059_v27  ;;  %6039 = vmatpush3.bf16.msra.mxu0 %v6389_v8  ;;  %v3769_v8 = vld [vmem:[#allocation3 + $0x8] sm:$0xff] }
0x1852   : > { %6045 = vmatpush3.bf16.msra.mxu1 %v6390_v30 }
0x1853   : > { %6046 = vmatprep.subr.bf16.mxu1 %v7059_v27 }
0x1856   : > { %6047 = vmatpush3.bf16.msra.mxu1 %v6391_v61 }
0x191f   : > { %v3513_v62 = vpop.f32.mrb[68].mxu0 }
0x1920   : > { %v6028_v9 = vpop.f32.mrb[69].mxu0 }
0x1921   : > { %v3516_v10 = vpop.f32.mrb[70].mxu0  ;;  %v3689_v9 = vrot.slane %v8069_v12, %v3688_v49 }
0x1922   : > { %v6029_v11 = vpop.f32.mrb[71].mxu0 }
0x1923   : > { %v3559_v13 = vpop.f32.mrb[76].mxu1 }
0x1924   : > { %v6362_v14 = vpack.i.bf16 %v3559_v13, %v3513_v62  ;;  %v6034_v18 = vpop.f32.mrb[77].mxu1  ;;  %v3695_v13 = vrot.slane %v8077_v17, %v3688_v49  ;;  %v1332_v17 = vld [vmem:[%s8772_s11] sm:$0xff] }
0x1925   : > { %v3562_v44 = vpop.f32.mrb[78].mxu1 }
0x1926   : > { %6363 = vrot.lane.b32.xlu0 %v6362_v14, %s7071_s30  ;;  %v6035_v47 = vpop.f32.mrb[79].mxu1 }
0x1998   : > { %v6364_v24 = vpop.permute.xlu0 %6363 }
0x1999   : > { %v6366_v31 = vunpack.i.h.bf16 %v6364_v24  ;;  %v6365_v32 = vunpack.i.l.bf16 %v6364_v24 }
0x199b   : > { %v3594_v36 = vsel %vm2387_vm6, %v3592_v4, %v6366_v31  ;;  %v3593_v37 = vsel %vm2387_vm6, %v3591_v28, %v6365_v32  ;;  %v3834_v31 = vpack.c.bf16 %v1333_v25, %v1332_v17  ;;  %v1335_v32 = vld [vmem:[%s8772_s11 + $0x18] sm:$0xff] }
0x199c   : > { %v3595_v42 = vpack.c.bf16 %v3594_v36, %v3593_v37  ;;  %v3835_v28 = vpack.c.bf16 %v1335_v32, %v1334_v26 }
0x199e   : > { %6041 = vmatmul.mubr.msk.bf16.vlgmr.msra.gmra.mrb[72].mxu0 %vm1366_vm2, %v3595_v42 }
0x199f   : > { %6056 = vmatprep.mubr.msk.bf16.mxu0 %vm1366_vm2, %v3768_v43 }
0x1a71   : > { %v3651_v57 = vpop.f32.mrb[72].mxu0 }
0x1a72   : > { %v3652_v41 = vadd.f32 %v5598_v38, %v3651_v57  ;;  %v6042_v52 = vpop.f32.mrb[73].mxu0 }
0x1a73   : > { %v3654_v46 = vpop.f32.mrb[74].mxu0 }
0x1a74   : > { %v3655_v51 = vadd.f32 %v5598_v38, %v3654_v46  ;;  %v6043_v54 = vpop.f32.mrb[75].mxu0  ;;  %v3658_v56 = vadd.f32 %v3652_v41, %v8080_v20 }
0x1a76   : > { %v3660_v29 = vsel %vm1366_vm2, %v3658_v56, 0.0  ;;  %v3659_v58 = vadd.f32 %v3655_v51, %v8082_v21 }
0x1a77   : > { %3661 = vadd.xlane.f32.xlu1 %v3660_v29 }
0x1a78   : > { %v3663_v59 = vsel %vm1366_vm2, %v3659_v58, 0.0 }
0x1a79   : > { %3664 = vadd.xlane.f32.xlu0 %v3663_v59 }
0x1b04   : > { %v3662_v63 = vpop.xlane.xlu1 %3661 }
0x1b05   : > { %v3666_v0 = vmul.f32 0.03125, %v3662_v63 }
0x1b06   : > { %v3665_v1 = vpop.xlane.xlu0 %3664 }
0x1b07   : > { %v3668_v20 = vsub.f32 %v3658_v56, %v3666_v0  ;;  %v3667_v2 = vmul.f32 0.03125, %v3665_v1 }
0x1b09   : > { %v3669_v3 = vsub.f32 %v3659_v58, %v3667_v2  ;;  %v3670_v21 = vmul.f32 %v3668_v20, %v3668_v20 }
0x1b0b   : > { %v3672_v33 = vsel %vm1366_vm2, %v3670_v21, 0.0  ;;  %v3671_v15 = vmul.f32 %v3669_v3, %v3669_v3 }
0x1b0c   : > { %3673 = vadd.xlane.f32.xlu0 %v3672_v33 }
0x1b0d   : > { %v3675_v48 = vsel %vm1366_vm2, %v3671_v15, 0.0 }
0x1b0e   : > { %3676 = vadd.xlane.f32.xlu1 %v3675_v48 }
0x1b1f   : > { %3772 = vrot.lane.b32.xlu1 %v6391_v61, %s7062_s0 }
0x1b22   : > { %3770 = vrot.lane.b32.xlu0 %v6390_v30, %s7062_s0 }
0x1b23   : > { %3836 = vrot.lane.b32.xlu1 %v6390_v30, %s7061_s18 }
0x1b26   : > { %3838 = vrot.lane.b32.xlu0 %v6391_v61, %s7061_s18 }
0x1b27   : > { %3776 = vrot.lane.b32.xlu1 %v8302_v45, %s7062_s0 }
0x1b99   : > { %v3674_v16 = vpop.xlane.xlu0 %3673 }
0x1b9a   : > { %v3678_v35 = vmul.f32 0.03125, %v3674_v16 }
0x1b9b   : > { %v3677_v39 = vpop.xlane.xlu1 %3676 }
0x1b9c   : > { %v3680_v40 = vadd.f32 1e-05, %v3678_v35  ;;  %v3679_v5 = vmul.f32 0.03125, %v3677_v39 }
0x1b9d   : > { %v3771_v6 = vpop.permute.xlu0 %3770 }
0x1b9e   : > { %6468 = vrsqrt.f32 %v3680_v40  ;;  %v3681_v50 = vadd.f32 1e-05, %v3679_v5  ;;  %6052 = vmatprep.subr.bf16.mxu0 %v3771_v6 }
0x1b9f   : > { %6053 = vmatpush3.bf16.msra.mxu0 %v3771_v6  ;;  %v3773_v34 = vpop.permute.xlu1 %3772 }
0x1ba0   : > { %6470 = vrsqrt.f32 %v3681_v50  ;;  %6054 = vmatprep.subr.bf16.mxu0 %v3773_v34 }
0x1ba1   : > { %v3839_v24 = vpop.permute.xlu0 %3838 }
0x1ba3   : > { %6055 = vmatpush3.bf16.msra.mxu0 %v3773_v34  ;;  %v3837_v62 = vpop.permute.xlu1 %3836 }
0x1ba4   : > { %6060 = vmatprep.subr.bf16.mxu1 %v3837_v62  ;;  %6068 = vmatprep.subr.bf16.mxu0 %v7059_v27 }
0x1ba6   : > { %6057 = vmatmul.mubr.msk.bf16.vlgmr.msra.gmra.mrb[76].mxu0 %vm1366_vm2, %v3769_v8 }
0x1ba7   : > { %6070 = vmatprep.mubr.msk.bf16.mxu0 %vm7060_vm1, %v7059_v27  ;;  %v3777_v4 = vpop.permute.xlu1 %3776 }
0x1ba8   : > { %v6469_v10 = vpop.eup %6468 }
0x1ba9   : > { %v3684_v11 = vmul.f32 %v6469_v10, %v3668_v20 }
0x1baa   : > { %v6471_v14 = vpop.eup %6470 }
0x1bab   : > { %v3690_v18 = vmul.f32 %v3689_v9, %v3684_v11  ;;  %v3685_v44 = vmul.f32 %v6471_v14, %v3669_v3 }
0x1bad   : > { %v3691_v47 = vmul.f32 %v3689_v9, %v3685_v44  ;;  %v8313_v19 = vadd.f32 %v3695_v13, %v3690_v18 }
0x1baf   : > { %v8315_v53 = vadd.f32 %v3695_v13, %v3691_v47  ;;  %v3703_v55 = vadd.f32 %v6512_v60, %v8313_v19 }
0x1bb1   : > { %v3704_v12 = vadd.f32 %v6513_v22, %v8315_v53 }
0x1bb3   : > { %v3705_v23 = vpack.c.bf16 %v3704_v12, %v3703_v55 }
0x1bb5   : > { %6049 = vmatmul.mubr.msk.bf16.vlgmr.msra.gmra.mrb[80].mxu1 %vm1366_vm2, %v3705_v23 }
0x1bb6   : > { %6061 = vmatpush3.bf16.msra.mxu1 %v3837_v62  ;;  %6064 = vmatprep.mubr.msk.bf16.mxu1 %vm1366_vm2, %v3834_v31 }
0x1bb7   : > { %6062 = vmatprep.subr.bf16.mxu1 %v3839_v24 }
0x1bba   : > { %6063 = vmatpush3.bf16.msra.mxu1 %v3839_v24 }
0x1bbb   : > { %6074 = vmatprep.subr.bf16.mxu1 %v7059_v27 }
0x1bbd   : > { %6065 = vmatmul.mubr.msk.bf16.vlgmr.msra.gmra.mrb[84].mxu1 %vm1366_vm2, %v3835_v28 }
0x1bbe   : > { %6076 = vmatprep.mubr.msk.bf16.mxu1 %vm7060_vm1, %v7059_v27 }
0x1c79   : > { %v6058_v36 = vpop.f32.mrb[76].mxu0 }
0x1c7a   : > { %v3819_v37 = vpop.f32.mrb[77].mxu0  ;;  %v3828_v42 = vadd.f32 %v6058_v36, %v3777_v4 }
0x1c7b   : > { %v6059_v38 = vpop.f32.mrb[78].mxu0  ;;  %v3820_v57 = vadd.f32 %v3819_v37, %v3777_v4 }
0x1c7c   : > { %v3831_v41 = vadd.f32 %v6059_v38, %v3777_v4  ;;  %v3822_v52 = vpop.f32.mrb[79].mxu0 }
0x1c7d   : > { %v3823_v46 = vadd.f32 %v3822_v52, %v3777_v4 }
0x1c7e   : > { %v8337_v51 = vpack.c.bf16 %v3831_v41, %v3828_v42 }
0x1c7f   : > { %v8339_v54 = vpack.c.bf16 %v3823_v46, %v3820_v57 }
0x1c80   : > { %v3963_v56 = vsel %vm1481_vm3, %v8337_v51, 0 }
0x1c81   : > { %v3917_v29 = vsel %vm1481_vm3, %v8339_v54, 0  ;;  %6075 = vmatpush3.bf16.xpose.msra.mxu1 %v3963_v56 }
0x1c82   : > { %6069 = vmatpush3.bf16.xpose.msra.mxu0 %v3917_v29  ;;  %6086 = vmatprep.subr.bf16.mxu1 %v7059_v27 }
0x1c83   : > { %6080 = vmatprep.subr.bf16.mxu0 %v7059_v27 }
0x1c88   : > { %v3761_v58 = vpop.f32.mrb[80].mxu1 }
0x1c89   : > { %v3762_v59 = vadd.f32 %v8302_v45, %v3761_v58  ;;  %v6050_v30 = vpop.f32.mrb[81].mxu1 }
0x1c8a   : > { %v3764_v61 = vpop.f32.mrb[82].mxu1 }
0x1c8b   : > { %v3905_v63 = vmul.f32 0.35355338, %v3762_v59  ;;  %v3765_v0 = vadd.f32 %v8302_v45, %v3764_v61  ;;  %v6051_v1 = vpop.f32.mrb[83].mxu1 }
0x1c8d   : > { %v8349_v20 = vpack.c.bf16 %v3905_v63, %v3905_v63  ;;  %v3906_v2 = vmul.f32 0.35355338, %v3765_v0 }
0x1c8f   : > { %v8351_v3 = vpack.c.bf16 %v3906_v2, %v3906_v2  ;;  %6071 = vmatmul.mubr.msk.bf16.vlgmr.msra.gmra.mrb[80].mxu0 %vm1481_vm3, %v8349_v20 }
0x1c90   : > { %6082 = vmatprep.mubr.msk.bf16.mxu0 %vm7060_vm1, %v7059_v27  ;;  %v6066_v21 = vpop.f32.mrb[84].mxu1 }
0x1c91   : > { %6077 = vmatmul.mubr.msk.bf16.vlgmr.msra.gmra.mrb[88].mxu1 %vm1481_vm3, %v8351_v3  ;;  %v3885_v33 = vpop.f32.mrb[85].mxu1 }
0x1c92   : > { %6088 = vmatprep.mubr.msk.bf16.mxu1 %vm7060_vm1, %v7059_v27  ;;  %v6067_v15 = vpop.f32.mrb[86].mxu1 }
0x1c93   : > { %v3888_v48 = vpop.f32.mrb[87].mxu1 }
0x1d62   : > { %v3953_v43 = vpop.f32.mrb[80].mxu0 }
0x1d63   : > { %v6072_v16 = vpop.f32.mrb[81].mxu0  ;;  %v4005_v35 = vsel %vm2384_vm5, %v3953_v43, -inf }
0x1d64   : > { %4006 = vmax.xlane.f32.xlu0 %v4005_v35  ;;  %v3956_v39 = vpop.f32.mrb[82].mxu0  ;;  %v3999_v40 = vpop.f32.mrb[88].mxu1 }
0x1d65   : > { %v6073_v5 = vpop.f32.mrb[83].mxu0  ;;  %v6078_v6 = vpop.f32.mrb[89].mxu1  ;;  %v4008_v50 = vsel %vm2384_vm5, %v3999_v40, -inf }
0x1d66   : > { %4009 = vmax.xlane.f32.xlu1 %v4008_v50  ;;  %v4002_v34 = vpop.f32.mrb[90].mxu1 }
0x1d67   : > { %v6079_v49 = vpop.f32.mrb[91].mxu1 }
0x1d77   : > { %3842 = vrot.lane.b32.xlu1 %v8302_v45, %s7061_s18  ;;  %s8773_s18 = scalar_lea.vmem [#allocation18], %s7734_s21 }
0x1d7b   : > { %4171 = vrot.lane.b32.xlu1 %v8337_v51, %s7064_s2 }
0x1d7f   : > { %4116 = vrot.lane.b32.xlu1 %v8349_v20, %s7064_s2 }
0x1df1   : > { %v4007_v8 = vpop.xlane.xlu0 %4006 }
0x1df2   : > { %v4011_v62 = vsub.f32 %v3953_v43, %v4007_v8 }
0x1df3   : > { %v4010_v9 = vpop.xlane.xlu1 %4009 }
0x1df4   : > { %v4013_v10 = vmul.f32 1.442695, %v4011_v62  ;;  %v4012_v11 = vsub.f32 %v3999_v40, %v4010_v9 }
0x1df6   : > { %6472 = vpow2.f32 %v4013_v10  ;;  %v4015_v13 = vmul.f32 1.442695, %v4012_v11 }
0x1df7   : > { %v3843_v14 = vpop.permute.xlu1 %3842 }
0x1df8   : > { %6474 = vpow2.f32 %v4015_v13  ;;  %v3886_v18 = vadd.f32 %v3885_v33, %v3843_v14  ;;  %v3894_v44 = vadd.f32 %v6066_v21, %v3843_v14  ;;  %v3889_v47 = vadd.f32 %v3888_v48, %v3843_v14 }
0x1df9   : > { %v3897_v60 = vadd.f32 %v6067_v15, %v3843_v14 }
0x1dfa   : > { %v8369_v45 = vpack.c.bf16 %v3889_v47, %v3886_v18 }
0x1dfb   : > { %v8371_v55 = vpack.c.bf16 %v3897_v60, %v3894_v44  ;;  %v4172_v42 = vpop.permute.xlu1 %4171 }
0x1dfc   : > { %6081 = vmatpush3.bf16.msra.mxu0 %v8369_v45  ;;  %v4177_v57 = vsel %vm1481_vm3, %v4172_v42, 0 }
0x1dfd   : > { %6087 = vmatpush3.bf16.msra.mxu1 %v8371_v55  ;;  %6092 = vmatprep.subr.bf16.mxu0 %v7059_v27 }
0x1dfe   : > { %6098 = vmatprep.subr.bf16.mxu1 %v7059_v27 }
0x1dff   : > { %v4117_v41 = vpop.permute.xlu1 %4116 }
0x1e00   : > { %v6473_v22 = vpop.eup %6472 }
0x1e01   : > { %v4017_v12 = vsel %vm2384_vm5, %v6473_v22, 0.0 }
0x1e02   : > { %v6475_v23 = vpop.eup %6474  ;;  %4018 = vadd.xlane.f32.xlu0 %v4017_v12 }
0x1e03   : > { %v4020_v24 = vsel %vm2384_vm5, %v6475_v23, 0.0 }
0x1e06   : > { %4021 = vadd.xlane.f32.xlu0 %v4020_v24 }
0x1e1c   : > { %4119 = vrot.lane.b32.xlu0 %v8339_v54, %s7064_s2 }
0x1e20   : > { %4168 = vrot.lane.b32.xlu0 %v8351_v3, %s7064_s2 }
0x1e8f   : > { %v4019_v17 = vpop.xlane.xlu0 %4018 }
0x1e90   : > { %6476 = vrcp.f32 %v4019_v17 }
0x1e93   : > { %v4022_v25 = vpop.xlane.xlu0 %4021 }
0x1e94   : > { %6478 = vrcp.f32 %v4022_v25 }
0x1e97   : > { %v4120_v32 = vpop.permute.xlu0 %4119 }
0x1e98   : > { %v4125_v37 = vsel %vm1481_vm3, %v4120_v32, 0 }
0x1e9a   : > { %v6477_v26 = vpop.eup %6476 }
0x1e9b   : > { %v4025_v31 = vmul.f32 %v6477_v26, %v6473_v22  ;;  %v4169_v52 = vpop.permute.xlu0 %4168 }
0x1e9d   : > { %v4027_v28 = vpack.c.bf16 %v4025_v31, %v4025_v31 }
0x1e9e   : > { %v6479_v4 = vpop.eup %6478 }
0x1e9f   : > { %v4026_v36 = vmul.f32 %v6479_v4, %v6475_v23  ;;  %6083 = vmatmul.mubr.msk.bf16.vlgmr.msra.gmra.mrb[84].mxu0 %vm2384_vm5, %v4027_v28 }
0x1ea0   : > { %6093 = vmatpush3.bf16.xpose.msra.mxu0 %v4125_v37  ;;  %6094 = vmatprep.mubr.msk.bf16.mxu0 %vm7060_vm1, %v7059_v27 }
0x1ea1   : > { %v4028_v38 = vpack.c.bf16 %v4026_v36, %v4026_v36  ;;  %6104 = vmatprep.subr.bf16.mxu0 %v7059_v27 }
0x1ea3   : > { %6089 = vmatmul.mubr.msk.bf16.vlgmr.msra.gmra.mrb[92].mxu1 %vm2384_vm5, %v4028_v38 }
0x1ea4   : > { %6099 = vmatpush3.bf16.xpose.msra.mxu1 %v4177_v57  ;;  %6100 = vmatprep.mubr.msk.bf16.mxu1 %vm7060_vm1, %v7059_v27 }
0x1ea5   : > { %6110 = vmatprep.subr.bf16.mxu1 %v7059_v27 }
0x1ea7   : > { %6095 = vmatmul.mubr.msk.bf16.vlgmr.msra.gmra.mrb[88].mxu0 %vm1481_vm3, %v4117_v41 }
0x1ea8   : > { %6106 = vmatprep.mubr.msk.bf16.mxu0 %vm7060_vm1, %v7059_v27 }
0x1eab   : > { %6101 = vmatmul.mubr.msk.bf16.vlgmr.msra.gmra.mrb[96].mxu1 %vm1481_vm3, %v4169_v52 }
0x1eac   : > { %6112 = vmatprep.mubr.msk.bf16.mxu1 %vm7060_vm1, %v7059_v27 }
0x1f72   : > { %v8399_v46 = vpop.f32.mrb[84].mxu0 }
0x1f73   : > { %v6084_v56 = vpop.f32.mrb[85].mxu0 }
0x1f74   : > { %v4069_v29 = vpop.f32.mrb[86].mxu0 }
0x1f75   : > { %v6085_v58 = vpop.f32.mrb[87].mxu0 }
0x1f76   : > { %v8401_v59 = vpop.f32.mrb[92].mxu1 }
0x1f77   : > { %v6090_v30 = vpop.f32.mrb[93].mxu1 }
0x1f78   : > { %v4112_v61 = vpop.f32.mrb[94].mxu1 }
0x1f79   : > { %v6091_v63 = vpop.f32.mrb[95].mxu1 }
0x1f7a   : > { %v4161_v0 = vpop.f32.mrb[88].mxu0 }
0x1f7b   : > { %v6096_v1 = vpop.f32.mrb[89].mxu0  ;;  %v4219_v2 = vsel %vm2384_vm5, %v4161_v0, -inf }
0x1f7c   : > { %4220 = vmax.xlane.f32.xlu1 %v4219_v2  ;;  %v4164_v21 = vpop.f32.mrb[90].mxu0 }
0x1f7d   : > { %v6097_v33 = vpop.f32.mrb[91].mxu0 }
0x1f7e   : > { %v4213_v15 = vpop.f32.mrb[96].mxu1 }
0x1f7f   : > { %v6102_v48 = vpop.f32.mrb[97].mxu1  ;;  %v4222_v43 = vsel %vm2384_vm5, %v4213_v15, -inf }
0x1f80   : > { %4223 = vmax.xlane.f32.xlu0 %v4222_v43  ;;  %v4216_v16 = vpop.f32.mrb[98].mxu1 }
0x1f81   : > { %v6103_v35 = vpop.f32.mrb[99].mxu1 }
0x1f8d   : > { %4291 = vrot.lane.b32.xlu1 %v8371_v55, %s7064_s2 }
0x1f96   : > { %4244 = vrot.lane.b32.xlu0 %v8369_v45, %s7064_s2  ;;  %s8774_s2 = smov %s8773_s18 }
0x2009   : > { %v4221_v39 = vpop.xlane.xlu1 %4220 }
0x200a   : > { %v4225_v40 = vsub.f32 %v4161_v0, %v4221_v39 }
0x200c   : > { %v4227_v5 = vmul.f32 1.442695, %v4225_v40 }
0x200d   : > { %v4292_v6 = vpop.permute.xlu1 %4291  ;;  %v4224_v50 = vpop.xlane.xlu0 %4223 }
0x200e   : > { %6480 = vpow2.f32 %v4227_v5  ;;  %v4226_v34 = vsub.f32 %v4213_v15, %v4224_v50  ;;  %6111 = vmatpush3.bf16.msra.mxu1 %v4292_v6 }
0x200f   : > { %6122 = vmatprep.subr.bf16.mxu1 %v7059_v27 }
0x2010   : > { %v4229_v49 = vmul.f32 1.442695, %v4226_v34 }
0x2011   : > { %v4245_v8 = vpop.permute.xlu0 %4244 }
0x2012   : > { %6482 = vpow2.f32 %v4229_v49  ;;  %6105 = vmatpush3.bf16.msra.mxu0 %v4245_v8 }
0x2013   : > { %6116 = vmatprep.subr.bf16.mxu0 %v7059_v27 }
0x2018   : > { %v6481_v62 = vpop.eup %6480 }
0x2019   : > { %v4231_v9 = vsel %vm2384_vm5, %v6481_v62, 0.0 }
0x201a   : > { %4232 = vadd.xlane.f32.xlu0 %v4231_v9 }
0x201c   : > { %v6483_v10 = vpop.eup %6482 }
0x201d   : > { %v4234_v11 = vsel %vm2384_vm5, %v6483_v10, 0.0 }
0x201e   : > { %4235 = vadd.xlane.f32.xlu1 %v4234_v11 }
0x202f   : > { %4339 = vrot.lane.b32.xlu1 %v8339_v54, %s7066_s14 }
0x2030   : > { %4389 = vrot.lane.b32.xlu0 %v8337_v51, %s7066_s14 }
0x2033   : > { %4337 = vrot.lane.b32.xlu1 %v8349_v20, %s7066_s14 }
0x2034   : > { %4387 = vrot.lane.b32.xlu0 %v8351_v3, %s7066_s14 }
0x20a7   : > { %v4233_v13 = vpop.xlane.xlu0 %4232 }
0x20a8   : > { %6484 = vrcp.f32 %v4233_v13 }
0x20ab   : > { %v4236_v14 = vpop.xlane.xlu1 %4235  ;;  %v4390_v24 = vpop.permute.xlu0 %4389 }
0x20ac   : > { %6486 = vrcp.f32 %v4236_v14  ;;  %v4395_v25 = vsel %vm1481_vm3, %v4390_v24, 0 }
0x20af   : > { %v4340_v47 = vpop.permute.xlu1 %4339  ;;  %v4388_v31 = vpop.permute.xlu0 %4387 }
0x20b0   : > { %v4345_v23 = vsel %vm1481_vm3, %v4340_v47, 0 }
0x20b2   : > { %v6485_v18 = vpop.eup %6484 }
0x20b3   : > { %v4239_v44 = vmul.f32 %v6485_v18, %v6481_v62  ;;  %v4338_v26 = vpop.permute.xlu1 %4337 }
0x20b5   : > { %v4241_v60 = vpack.c.bf16 %v4239_v44, %v4239_v44 }
0x20b6   : > { %v6487_v22 = vpop.eup %6486 }
0x20b7   : > { %v4240_v12 = vmul.f32 %v6487_v22, %v6483_v10  ;;  %6107 = vmatmul.mubr.msk.bf16.vlgmr.msra.gmra.mrb[92].mxu0 %vm2384_vm5, %v4241_v60 }
0x20b8   : > { %6117 = vmatpush3.bf16.xpose.msra.mxu0 %v4345_v23  ;;  %6118 = vmatprep.mubr.msk.bf16.mxu0 %vm7060_vm1, %v7059_v27 }
0x20b9   : > { %v4242_v17 = vpack.c.bf16 %v4240_v12, %v4240_v12  ;;  %6128 = vmatprep.subr.bf16.mxu0 %v7059_v27 }
0x20bb   : > { %6113 = vmatmul.mubr.msk.bf16.vlgmr.msra.gmra.mrb[100].mxu1 %vm2384_vm5, %v4242_v17 }
0x20bc   : > { %6123 = vmatpush3.bf16.xpose.msra.mxu1 %v4395_v25  ;;  %6124 = vmatprep.mubr.msk.bf16.mxu1 %vm7060_vm1, %v7059_v27 }
0x20bd   : > { %6134 = vmatprep.subr.bf16.mxu1 %v7059_v27 }
0x20bf   : > { %6119 = vmatmul.mubr.msk.bf16.vlgmr.msra.gmra.mrb[96].mxu0 %vm1481_vm3, %v4338_v26 }
0x20c0   : > { %6130 = vmatprep.mubr.msk.bf16.mxu0 %vm7060_vm1, %v7059_v27 }
0x20c3   : > { %6125 = vmatmul.mubr.msk.bf16.vlgmr.msra.gmra.mrb[104].mxu1 %vm1481_vm3, %v4388_v31 }
0x20c4   : > { %6136 = vmatprep.mubr.msk.bf16.mxu1 %vm7060_vm1, %v7059_v27 }
0x218a   : > { %v8437_v32 = vpop.f32.mrb[92].mxu0 }
0x218b   : > { %v6108_v28 = vpop.f32.mrb[93].mxu0 }
0x218c   : > { %v4287_v4 = vpop.f32.mrb[94].mxu0 }
0x218d   : > { %v6109_v36 = vpop.f32.mrb[95].mxu0 }
0x218e   : > { %v8439_v37 = vpop.f32.mrb[100].mxu1 }
0x218f   : > { %v6367_v42 = vpack.i.bf16 %v8439_v37, %v8437_v32  ;;  %v6114_v38 = vpop.f32.mrb[101].mxu1 }
0x2190   : > { %v4334_v57 = vpop.f32.mrb[102].mxu1 }
0x2191   : > { %v6115_v41 = vpop.f32.mrb[103].mxu1 }
0x2192   : > { %v4381_v52 = vpop.f32.mrb[96].mxu0 }
0x2193   : > { %v6120_v56 = vpop.f32.mrb[97].mxu0  ;;  %v4437_v29 = vsel %vm2384_vm5, %v4381_v52, -inf }
0x2194   : > { %4438 = vmax.xlane.f32.xlu1 %v4437_v29  ;;  %v4384_v58 = vpop.f32.mrb[98].mxu0 }
0x2195   : > { %v6121_v30 = vpop.f32.mrb[99].mxu0 }
0x2196   : > { %v4431_v61 = vpop.f32.mrb[104].mxu1 }
0x2197   : > { %v6126_v63 = vpop.f32.mrb[105].mxu1  ;;  %v4440_v0 = vsel %vm2384_vm5, %v4431_v61, -inf }
0x2198   : > { %4441 = vmax.xlane.f32.xlu0 %v4440_v0  ;;  %v4434_v1 = vpop.f32.mrb[106].mxu1 }
0x2199   : > { %v6127_v2 = vpop.f32.mrb[107].mxu1 }
0x21a5   : > { %4507 = vrot.lane.b32.xlu1 %v8371_v55, %s7066_s14 }
0x21ae   : > { %4461 = vrot.lane.b32.xlu0 %v8369_v45, %s7066_s14  ;;  %s8775_s14 = scalar_lea.vmem [#allocation19], %s7731_s5 }
0x2221   : > { %v4439_v21 = vpop.xlane.xlu1 %4438 }
0x2222   : > { %v4443_v33 = vsub.f32 %v4381_v52, %v4439_v21 }
0x2224   : > { %v4445_v15 = vmul.f32 1.442695, %v4443_v33 }
0x2225   : > { %v4508_v48 = vpop.permute.xlu1 %4507  ;;  %v4442_v43 = vpop.xlane.xlu0 %4441 }
0x2226   : > { %6488 = vpow2.f32 %v4445_v15  ;;  %v4444_v16 = vsub.f32 %v4431_v61, %v4442_v43  ;;  %6135 = vmatpush3.bf16.msra.mxu1 %v4508_v48 }
0x2227   : > { %6146 = vmatprep.subr.bf16.mxu1 %v7059_v27 }
0x2228   : > { %v4447_v35 = vmul.f32 1.442695, %v4444_v16 }
0x2229   : > { %v4462_v39 = vpop.permute.xlu0 %4461 }
0x222a   : > { %6490 = vpow2.f32 %v4447_v35  ;;  %6129 = vmatpush3.bf16.msra.mxu0 %v4462_v39  ;;  %v6392_v39 = vld [vmem:[%s8773_s18] sm:$0xff]  }
0x222b   : > { %6140 = vmatprep.subr.bf16.mxu0 %v7059_v27 }
0x2230   : > { %v6489_v40 = vpop.eup %6488 }
0x2231   : > { %v4449_v5 = vsel %vm2384_vm5, %v6489_v40, 0.0 }
0x2232   : > { %4450 = vadd.xlane.f32.xlu0 %v4449_v5 }
0x2234   : > { %v6491_v6 = vpop.eup %6490 }
0x2235   : > { %v4452_v50 = vsel %vm2384_vm5, %v6491_v6, 0.0 }
0x2236   : > { %4453 = vadd.xlane.f32.xlu1 %v4452_v50 }
0x2247   : > { %4555 = vrot.lane.b32.xlu1 %v8339_v54, %s7068_s8 }
0x2248   : > { %4605 = vrot.lane.b32.xlu0 %v8337_v51, %s7068_s8 }
0x224b   : > { %4553 = vrot.lane.b32.xlu1 %v8349_v20, %s7068_s8 }
0x224c   : > { %4603 = vrot.lane.b32.xlu0 %v8351_v3, %s7068_s8 }
0x22bf   : > { %v4451_v34 = vpop.xlane.xlu0 %4450 }
0x22c0   : > { %6492 = vrcp.f32 %v4451_v34 }
0x22c3   : > { %v4454_v49 = vpop.xlane.xlu1 %4453  ;;  %v4606_v51 = vpop.permute.xlu0 %4605 }
0x22c4   : > { %6494 = vrcp.f32 %v4454_v49  ;;  %v4611_v3 = vsel %vm1481_vm3, %v4606_v51, 0 }
0x22c7   : > { %v4556_v9 = vpop.permute.xlu1 %4555  ;;  %v4604_v18 = vpop.permute.xlu0 %4603 }
0x22c8   : > { %v4561_v54 = vsel %vm1481_vm3, %v4556_v9, 0 }
0x22ca   : > { %v6493_v8 = vpop.eup %6492 }
0x22cb   : > { %v4457_v62 = vmul.f32 %v6493_v8, %v6489_v40  ;;  %v4554_v14 = vpop.permute.xlu1 %4553  ;;  %v6393_v40 = vld [vmem:[%s8774_s2 + $0x8] sm:$0xff]  }
0x22cd   : > { %v4459_v10 = vpack.c.bf16 %v4457_v62, %v4457_v62 }
0x22ce   : > { %v6495_v11 = vpop.eup %6494 }
0x22cf   : > { %v4458_v13 = vmul.f32 %v6495_v11, %v6491_v6  ;;  %6131 = vmatmul.mubr.msk.bf16.vlgmr.msra.gmra.mrb[100].mxu0 %vm2384_vm5, %v4459_v10 }
0x22d0   : > { %6141 = vmatpush3.bf16.xpose.msra.mxu0 %v4561_v54  ;;  %6142 = vmatprep.mubr.msk.bf16.mxu0 %vm7060_vm1, %v7059_v27 }
0x22d1   : > { %v4460_v20 = vpack.c.bf16 %v4458_v13, %v4458_v13  ;;  %6152 = vmatprep.subr.bf16.mxu0 %v7059_v27 }
0x22d3   : > { %6137 = vmatmul.mubr.msk.bf16.vlgmr.msra.gmra.mrb[108].mxu1 %vm2384_vm5, %v4460_v20 }
0x22d4   : > { %6147 = vmatpush3.bf16.xpose.msra.mxu1 %v4611_v3  ;;  %6148 = vmatprep.mubr.msk.bf16.mxu1 %vm7060_vm1, %v7059_v27 }
0x22d5   : > { %6158 = vmatprep.subr.bf16.mxu1 %v7059_v27 }
0x22d7   : > { %6143 = vmatmul.mubr.msk.bf16.vlgmr.msra.gmra.mrb[104].mxu0 %vm1481_vm3, %v4554_v14 }
0x22d8   : > { %6154 = vmatprep.mubr.msk.bf16.mxu0 %vm7060_vm1, %v7059_v27 }
0x22db   : > { %6149 = vmatmul.mubr.msk.bf16.vlgmr.msra.gmra.mrb[112].mxu1 %vm1481_vm3, %v4604_v18 }
0x22dc   : > { %6160 = vmatprep.mubr.msk.bf16.mxu1 %vm7060_vm1, %v7059_v27 }
0x23a2   : > { %v4501_v44 = vpop.f32.mrb[100].mxu0 }
0x23a3   : > { %v6132_v47 = vpop.f32.mrb[101].mxu0 }
0x23a4   : > { %v4504_v60 = vpop.f32.mrb[102].mxu0 }
0x23a5   : > { %v6133_v22 = vpop.f32.mrb[103].mxu0 }
0x23a6   : > { %v4547_v12 = vpop.f32.mrb[108].mxu1 }
0x23a7   : > { %v6372_v23 = vpack.i.bf16 %v4547_v12, %v4501_v44  ;;  %v6138_v24 = vpop.f32.mrb[109].mxu1 }
0x23a8   : > { %v4550_v17 = vpop.f32.mrb[110].mxu1 }
0x23a9   : > { %v6139_v25 = vpop.f32.mrb[111].mxu1 }
0x23aa   : > { %v4597_v26 = vpop.f32.mrb[104].mxu0 }
0x23ab   : > { %v6144_v31 = vpop.f32.mrb[105].mxu0  ;;  %v4653_v28 = vsel %vm2384_vm5, %v4597_v26, -inf }
0x23ac   : > { %4654 = vmax.xlane.f32.xlu1 %v4653_v28  ;;  %v4600_v4 = vpop.f32.mrb[106].mxu0 }
0x23ad   : > { %v6145_v36 = vpop.f32.mrb[107].mxu0 }
0x23ae   : > { %v4647_v38 = vpop.f32.mrb[112].mxu1 }
0x23af   : > { %v6150_v57 = vpop.f32.mrb[113].mxu1  ;;  %v4656_v41 = vsel %vm2384_vm5, %v4647_v38, -inf }
0x23b0   : > { %4657 = vmax.xlane.f32.xlu0 %v4656_v41  ;;  %v4650_v52 = vpop.f32.mrb[114].mxu1 }
0x23b1   : > { %v6151_v56 = vpop.f32.mrb[115].mxu1 }
0x2439   : > { %v4655_v29 = vpop.xlane.xlu1 %4654 }
0x243a   : > { %v4659_v58 = vsub.f32 %v4597_v26, %v4655_v29 }
0x243c   : > { %v4661_v30 = vmul.f32 1.442695, %v4659_v58 }
0x243d   : > { %v4658_v61 = vpop.xlane.xlu0 %4657 }
0x243e   : > { %6496 = vpow2.f32 %v4661_v30  ;;  %v4660_v63 = vsub.f32 %v4647_v38, %v4658_v61 }
0x2440   : > { %v4663_v0 = vmul.f32 1.442695, %v4660_v63 }
0x2442   : > { %6498 = vpow2.f32 %v4663_v0 }
0x2448   : > { %v6497_v1 = vpop.eup %6496 }
0x2449   : > { %v4665_v2 = vsel %vm2384_vm5, %v6497_v1, 0.0 }
0x244a   : > { %4666 = vadd.xlane.f32.xlu0 %v4665_v2 }
0x244c   : > { %v6499_v21 = vpop.eup %6498 }
0x244d   : > { %v4668_v33 = vsel %vm2384_vm5, %v6499_v21, 0.0 }
0x244e   : > { %4669 = vadd.xlane.f32.xlu1 %v4668_v33  ;;  %v6397_v33 = vld [vmem:[%s7759_s26 + $0x8] sm:$0xff]  }
0x245f   : > { %4723 = vrot.lane.b32.xlu1 %v8371_v55, %s7068_s8 }
0x2460   : > { %4677 = vrot.lane.b32.xlu0 %v8369_v45, %s7068_s8  ;;  %s8776_s8 = scalar_lea.vmem [#allocation20], %s7734_s21 }
0x2463   : > { %6368 = vrot.lane.b32.xlu1 %v6367_v42, %s7069_s13 }
0x2464   : > { %6373 = vrot.lane.b32.xlu0 %v6372_v23, %s7070_s3  ;;  %s8777_s3 = smov %s8776_s8 }
0x2465   : > { %v6395_v2 = vld [vmem:[%s8777_s3 + $0x8] sm:$0xff]  }
0x24d7   : > { %v4667_v15 = vpop.xlane.xlu0 %4666 }
0x24d8   : > { %6500 = vrcp.f32 %v4667_v15 }
0x24db   : > { %v4670_v48 = vpop.xlane.xlu1 %4669  ;;  %v4678_v43 = vpop.permute.xlu0 %4677 }
0x24dc   : > { %6502 = vrcp.f32 %v4670_v48  ;;  %6153 = vmatpush3.bf16.msra.mxu0 %v4678_v43 }
0x24dd   : > { %6164 = vmatprep.subr.bf16.mxu0 %v7059_v27 }
0x24df   : > { %v4724_v55 = vpop.permute.xlu1 %4723  ;;  %v6374_v51 = vpop.permute.xlu0 %6373 }
0x24e0   : > { %6159 = vmatpush3.bf16.msra.mxu1 %v4724_v55  ;;  %v6376_v14 = vunpack.i.h.bf16 %v6374_v51  ;;  %v6375_v18 = vunpack.i.l.bf16 %v6374_v51 }
0x24e1   : > { %6172 = vmatprep.subr.bf16.mxu1 %v7059_v27 }
0x24e2   : > { %v6501_v45 = vpop.eup %6500 }
0x24e3   : > { %v4673_v16 = vmul.f32 %v6501_v45, %v6497_v1  ;;  %v6369_v11 = vpop.permute.xlu1 %6368  ;;  %v6394_v1 = vld [vmem:[%s8776_s8] sm:$0xff]  }
0x24e4   : > { %v6371_v13 = vunpack.i.h.bf16 %v6369_v11  ;;  %v6370_v54 = vunpack.i.l.bf16 %v6369_v11  ;;  %v6399_v11 = vld [vmem:[%s7759_s26 + $0x18] sm:$0xff]  }
0x24e5   : > { %v4675_v32 = vpack.c.bf16 %v4673_v16, %v4673_v16 }
0x24e6   : > { %v6503_v37 = vpop.eup %6502  ;;  %v4794_v20 = vsel %vm1481_vm3, %v8401_v59, %v6371_v13  ;;  %v4793_v3 = vsel %vm1481_vm3, %v8399_v46, %v6370_v54  ;;  %v5626_v46 = vld [vmem:[%s8775_s14] ss:$0 sm:$0xff] }
0x24e7   : > { %v4674_v42 = vmul.f32 %v6503_v37, %v6499_v21  ;;  %6155 = vmatmul.mubr.msk.bf16.vlgmr.msra.gmra.mrb[108].mxu0 %vm2384_vm5, %v4675_v32  ;;  %v4795_v22 = vsel %vm2384_vm5, %v4793_v3, %v6375_v18  ;;  %v4796_v12 = vsel %vm2384_vm5, %v4794_v20, %v6376_v14  ;;  %v6396_v21 = vld [vmem:[%s7759_s26] sm:$0xff]   ;;  %v4892_v32 = vsub.s32 2, %v8065_v7 }
0x24e8   : > { %6168 = vmatprep.mubr.msk.bf16.mxu0 %vm7060_vm1, %v7059_v27  ;;  %6165 = vmatpush3.bf16.msra.mxu0 %v6392_v39 }
0x24e9   : > { %v4676_v35 = vpack.c.bf16 %v4674_v42, %v4674_v42  ;;  %6166 = vmatprep.subr.bf16.mxu0 %v7059_v27  ;;  %v8535_v42 = vld [vmem:[%s7765_s7] sm:$0xf] }
0x24eb   : > { %6161 = vmatmul.mubr.msk.bf16.vlgmr.msra.gmra.mrb[116].mxu1 %vm2384_vm5, %v4676_v35  ;;  %v4893_v35 = vrot.slane %v8535_v42, %v4892_v32 }
0x24ec   : > { %6176 = vmatprep.mubr.msk.bf16.mxu1 %vm7060_vm1, %v7059_v27  ;;  %6167 = vmatpush3.bf16.msra.mxu0 %v6393_v40 }
0x24ed   : > { %6180 = vmatprep.subr.bf16.mxu0 %v7059_v27  ;;  %6173 = vmatpush3.bf16.msra.mxu1 %v6394_v1  ;;  %v5087_v1 = vsub.s32 3, %v8065_v7 }
0x24ee   : > { %6174 = vmatprep.subr.bf16.mxu1 %v7059_v27 }
0x24f1   : > { %6175 = vmatpush3.bf16.msra.mxu1 %v6395_v2  ;;  %v5088_v2 = vrot.slane %v8535_v42, %v5087_v1 }
0x25ba   : > { %v4717_v5 = vpop.f32.mrb[108].mxu0 }
0x25bb   : > { %v6156_v6 = vpop.f32.mrb[109].mxu0 }
0x25bc   : > { %v4720_v50 = vpop.f32.mrb[110].mxu0 }
0x25bd   : > { %v6157_v34 = vpop.f32.mrb[111].mxu0  ;;  %v6515_v50 = vld [vmem:[%s7770_s29] sm:$0xf]  ;;  %s8780_s29 = scalar_lea.vmem [#allocation21], %s7731_s5  ;;  %s8781_s5 = sld [smem:[#allocation29_spill]] }
0x25be   : > { %v4763_v49 = vpop.f32.mrb[116].mxu1  ;;  %v4899_v34 = vrot.slane %v6515_v50, %v4892_v32 }
0x25bf   : > { %v6377_v8 = vpack.i.bf16 %v4763_v49, %v4717_v5  ;;  %v6162_v62 = vpop.f32.mrb[117].mxu1 }
0x25c0   : > { %v4766_v9 = vpop.f32.mrb[118].mxu1 }
0x25c1   : > { %6378 = vrot.lane.b32.xlu1 %v6377_v8, %s7071_s30  ;;  %v6163_v10 = vpop.f32.mrb[119].mxu1  ;;  %s8778_s30 = sld [smem:[#allocation50_spill]] }
0x25c2   : > { %v6398_v10 = vld [vmem:[%s7759_s26 + $0x10] sm:$0xff]  }
0x25c3   : > { %p5640_p0 = scmp.ne.s32.totalorder %s8781_s5, 1 }
0x25c4   : > { %s8782_s12 = sld [smem:[#allocation54_spill]] (!%p5640_p0)  ;;  %s8783_s0 = sld [smem:[#allocation55_spill]] (!%p5640_p0) }
0x25c7   : > { %s8779_s9 = scalar_lea.vmem %s8778_s30, %s7743_s28 }
0x25c8   : > { %v5630_v13 = vld [vmem:[%s8779_s9] ss:$0 sm:$0xff] }
0x2633   : > { %v6379_v44 = vpop.permute.xlu1 %6378 }
0x2634   : > { %v6381_v47 = vunpack.i.h.bf16 %v6379_v44  ;;  %v6380_v60 = vunpack.i.l.bf16 %v6379_v44 }
0x2636   : > { %v4798_v23 = vsel %vm2387_vm6, %v4796_v12, %v6381_v47  ;;  %v4797_v24 = vsel %vm2387_vm6, %v4795_v22, %v6380_v60 }
0x2637   : > { %v4799_v17 = vpack.c.bf16 %v4798_v23, %v4797_v24 }
0x2639   : > { %6169 = vmatmul.mubr.msk.bf16.vlgmr.msra.gmra.mrb[112].mxu0 %vm1366_vm2, %v4799_v17 }
0x263a   : > { %6188 = vmatprep.mubr.msk.bf16.mxu0 %vm7060_vm1, %v7059_v27  ;;  %6181 = vmatpush3.bf16.msra.mxu0 %v6396_v21 }
0x263b   : > { %6182 = vmatprep.subr.bf16.mxu0 %v7059_v27 }
0x263e   : > { %6183 = vmatpush3.bf16.msra.mxu0 %v6397_v33  ;;  %v5094_v33 = vrot.slane %v6515_v50, %v5087_v1 }
0x263f   : > { %6184 = vmatprep.subr.bf16.mxu0 %v7059_v27 }
0x2642   : > { %6185 = vmatpush3.bf16.msra.mxu0 %v6398_v10 }
0x2643   : > { %6186 = vmatprep.subr.bf16.mxu0 %v7059_v27  ;;  %v5634_v27 = vld [vmem:[%s8780_s29] ss:$0 sm:$0xff] }
0x2646   : > { %6187 = vmatpush3.bf16.msra.mxu0 %v6399_v11 }
0x270c   : > { %v4855_v59 = vpop.f32.mrb[112].mxu0 }
0x270d   : > { %v4856_v25 = vadd.f32 %v5626_v46, %v4855_v59  ;;  %v6170_v26 = vpop.f32.mrb[113].mxu0 }
0x270e   : > { %v4858_v31 = vpop.f32.mrb[114].mxu0 }
0x270f   : > { %v4862_v28 = vadd.f32 %v4856_v25, %v8313_v19  ;;  %v4859_v4 = vadd.f32 %v5626_v46, %v4858_v31  ;;  %v6171_v36 = vpop.f32.mrb[115].mxu0 }
0x2711   : > { %v4863_v38 = vadd.f32 %v4859_v4, %v8315_v53  ;;  %v4864_v57 = vsel %vm1366_vm2, %v4862_v28, 0.0 }
0x2712   : > { %4865 = vadd.xlane.f32.xlu0 %v4864_v57 }
0x2713   : > { %v4867_v41 = vsel %vm1366_vm2, %v4863_v38, 0.0 }
0x2714   : > { %4868 = vadd.xlane.f32.xlu1 %v4867_v41 }
0x279f   : > { %v4866_v52 = vpop.xlane.xlu0 %4865 }
0x27a0   : > { %v4870_v56 = vmul.f32 0.03125, %v4866_v52 }
0x27a1   : > { %v4869_v29 = vpop.xlane.xlu1 %4868 }
0x27a2   : > { %v4872_v58 = vsub.f32 %v4862_v28, %v4870_v56  ;;  %v4871_v30 = vmul.f32 0.03125, %v4869_v29 }
0x27a4   : > { %v4873_v19 = vsub.f32 %v4863_v38, %v4871_v30  ;;  %v4874_v61 = vmul.f32 %v4872_v58, %v4872_v58 }
0x27a6   : > { %v4876_v63 = vsel %vm1366_vm2, %v4874_v61, 0.0  ;;  %v4875_v53 = vmul.f32 %v4873_v19, %v4873_v19 }
0x27a7   : > { %4877 = vadd.xlane.f32.xlu0 %v4876_v63 }
0x27a8   : > { %v4879_v0 = vsel %vm1366_vm2, %v4875_v53, 0.0 }
0x27ab   : > { %4880 = vadd.xlane.f32.xlu0 %v4879_v0 }
0x2834   : > { %v4878_v15 = vpop.xlane.xlu0 %4877 }
0x2835   : > { %v4882_v48 = vmul.f32 0.03125, %v4878_v15 }
0x2837   : > { %v4884_v43 = vadd.f32 1e-05, %v4882_v48 }
0x2838   : > { %v4881_v55 = vpop.xlane.xlu0 %4880 }
0x2839   : > { %6504 = vrsqrt.f32 %v4884_v43  ;;  %v4883_v45 = vmul.f32 0.03125, %v4881_v55 }
0x283b   : > { %v4885_v16 = vadd.f32 1e-05, %v4883_v45 }
0x283d   : > { %6506 = vrsqrt.f32 %v4885_v16 }
0x2843   : > { %v6505_v37 = vpop.eup %6504 }
0x2844   : > { %v4888_v39 = vmul.f32 %v6505_v37, %v4872_v58 }
0x2846   : > { %v4894_v5 = vmul.f32 %v4893_v35, %v4888_v39 }
0x2847   : > { %v6507_v40 = vpop.eup %6506 }
0x2848   : > { %v4889_v6 = vmul.f32 %v6507_v40, %v4873_v19  ;;  %v4900_v8 = vadd.f32 %v4899_v34, %v4894_v5 }
0x284a   : > { %v4895_v49 = vmul.f32 %v4893_v35, %v4889_v6 }
0x284c   : > { %v4901_v62 = vadd.f32 %v4899_v34, %v4895_v49 }
0x284e   : > { %v4907_v9 = vpack.c.bf16 %v4901_v62, %v4900_v8 }
0x2850   : > { %6177 = vmatmul.mubr.msk.bf16.vlgmr.msra.gmra.mrb[120].mxu1 %vm1366_vm2, %v4907_v9 }
0x2923   : > { %v4963_v54 = vpop.f32.mrb[120].mxu1 }
0x2924   : > { %v4964_v51 = vadd.f32 %v5630_v13, %v4963_v54  ;;  %v6178_v20 = vpop.f32.mrb[121].mxu1 }
0x2925   : > { %v4966_v3 = vpop.f32.mrb[122].mxu1  ;;  %v5641_v20 = vld [vmem:[%s8782_s12] ss:$0 sm:$0xff] (!%p5640_p0) }
0x2926   : > { %v4967_v14 = vadd.f32 %v5630_v13, %v4966_v3  ;;  %v6179_v18 = vpop.f32.mrb[123].mxu1  ;;  %v4970_v44 = vmax.f32 %v4964_v51, 0.0 }
0x2928   : > { %v4971_v47 = vmax.f32 %v4967_v14, 0.0  ;;  %v5642_v14 = vld [vmem:[%s8783_s0] ss:$0 sm:$0xff] (!%p5640_p0) }
0x292a   : > { %v4981_v60 = vpack.c.bf16 %v4971_v47, %v4970_v44 }
0x292c   : > { %6189 = vmatmul.mubr.msk.bf16.vlgmr.msra.gmra.mrb[116].mxu0 %vm5012_vm7, %v4981_v60 }
0x29ff   : > { %v5050_v22 = vpop.f32.mrb[116].mxu0 }
0x2a00   : > { %v5051_v12 = vadd.f32 %v5634_v27, %v5050_v22  ;;  %v6190_v23 = vpop.f32.mrb[117].mxu0 }
0x2a01   : > { %v5053_v24 = vpop.f32.mrb[118].mxu0 }
0x2a02   : > { %v5057_v17 = vadd.f32 %v5051_v12, %v4900_v8  ;;  %v5054_v46 = vadd.f32 %v5634_v27, %v5053_v24  ;;  %v6191_v59 = vpop.f32.mrb[119].mxu0 }
0x2a04   : > { %v5058_v25 = vadd.f32 %v5054_v46, %v4901_v62  ;;  %v5059_v26 = vsel %vm1366_vm2, %v5057_v17, 0.0 }
0x2a05   : > { %5060 = vadd.xlane.f32.xlu1 %v5059_v26 }
0x2a06   : > { %v5062_v31 = vsel %vm1366_vm2, %v5058_v25, 0.0 }
0x2a07   : > { %5063 = vadd.xlane.f32.xlu0 %v5062_v31 }
0x2a92   : > { %v5061_v28 = vpop.xlane.xlu1 %5060 }
0x2a93   : > { %v5065_v4 = vmul.f32 0.03125, %v5061_v28 }
0x2a94   : > { %v5064_v36 = vpop.xlane.xlu0 %5063 }
0x2a95   : > { %v5067_v38 = vsub.f32 %v5057_v17, %v5065_v4  ;;  %v5066_v57 = vmul.f32 0.03125, %v5064_v36 }
0x2a97   : > { %v5068_v41 = vsub.f32 %v5058_v25, %v5066_v57  ;;  %v5069_v52 = vmul.f32 %v5067_v38, %v5067_v38 }
0x2a99   : > { %v5071_v56 = vsel %vm1366_vm2, %v5069_v52, 0.0  ;;  %v5070_v29 = vmul.f32 %v5068_v41, %v5068_v41 }
0x2a9a   : > { %5072 = vadd.xlane.f32.xlu1 %v5071_v56 }
0x2a9b   : > { %v5074_v58 = vsel %vm1366_vm2, %v5070_v29, 0.0 }
0x2a9c   : > { %5075 = vadd.xlane.f32.xlu0 %v5074_v58 }
0x2b27   : > { %v5073_v30 = vpop.xlane.xlu1 %5072 }
0x2b28   : > { %v5077_v19 = vmul.f32 0.03125, %v5073_v30 }
0x2b29   : > { %v5076_v61 = vpop.xlane.xlu0 %5075 }
0x2b2a   : > { %v5079_v63 = vadd.f32 1e-05, %v5077_v19  ;;  %v5078_v53 = vmul.f32 0.03125, %v5076_v61 }
0x2b2c   : > { %6508 = vrsqrt.f32 %v5079_v63  ;;  %v5080_v0 = vadd.f32 1e-05, %v5078_v53 }
0x2b2e   : > { %6510 = vrsqrt.f32 %v5080_v0 }
0x2b36   : > { %v6509_v21 = vpop.eup %6508 }
0x2b37   : > { %v5083_v15 = vmul.f32 %v6509_v21, %v5067_v38 }
0x2b38   : > { %v6511_v48 = vpop.eup %6510 }
0x2b39   : > { %v5089_v43 = vmul.f32 %v5088_v2, %v5083_v15  ;;  %v5084_v55 = vmul.f32 %v6511_v48, %v5068_v41  ;;  %5102 = sbr.rel (%p5640_p0) target bundleno = 11387 (0x2c7b), region = 188 }
0x2b3b   : > { %v5095_v45 = vadd.f32 %v5094_v33, %v5089_v43  ;;  %v5090_v16 = vmul.f32 %v5088_v2, %v5084_v55 }
0x2b3d   : > { %5097 = vst.msk [vmem:[#allocation22] sm:$0xff] %vm1366_vm2, %v5095_v45  ;;  %v5096_v32 = vadd.f32 %v5094_v33, %v5090_v16  ;;  %v5105_v7 = vsel (!%p5640_p0), %vm1366_vm2, %v5095_v45, 0.0 }
0x2b3e   : > { %5106 = vadd.xlane.f32.xlu0 (!%p5640_p0), %v5105_v7 }
0x2b3f   : > { %5098 = vst.msk [vmem:[#allocation22 + $0x8] sm:$0xff] %vm1366_vm2, %v5096_v32  ;;  %v5108_v37 = vsel (!%p5640_p0), %vm1366_vm2, %v5096_v32, 0.0 }
0x2b42   : > { %5109 = vadd.xlane.f32.xlu0 %v5108_v37 }
0x2bcb   : > { %v5107_v42 = vpop.xlane.xlu0 %5106 }
0x2bcc   : > { %v5111_v35 = vmul.f32 0.03125, %v5107_v42 }
0x2bce   : > { %v5113_v39 = vsub.f32 %v5095_v45, %v5111_v35 }
0x2bcf   : > { %v5110_v40 = vpop.xlane.xlu0 %5109 }
0x2bd0   : > { %v5112_v5 = vmul.f32 0.03125, %v5110_v40  ;;  %v5115_v6 = vmul.f32 %v5113_v39, %v5113_v39 }
0x2bd2   : > { %v5114_v50 = vsub.f32 %v5096_v32, %v5112_v5  ;;  %v5117_v34 = vsel %vm1366_vm2, %v5115_v6, 0.0 }
0x2bd3   : > { %5118 = vadd.xlane.f32.xlu1 %v5117_v34 }
0x2bd4   : > { %v5116_v49 = vmul.f32 %v5114_v50, %v5114_v50 }
0x2bd6   : > { %v5120_v8 = vsel %vm1366_vm2, %v5116_v49, 0.0 }
0x2bd7   : > { %5121 = vadd.xlane.f32.xlu1 %v5120_v8 }
0x2c60   : > { %v5119_v62 = vpop.xlane.xlu1 %5118 }
0x2c61   : > { %v5123_v9 = vmul.f32 0.03125, %v5119_v62 }
0x2c63   : > { %v5125_v10 = vadd.f32 1e-05, %v5123_v9 }
0x2c64   : > { %v5122_v11 = vpop.xlane.xlu1 %5121 }
0x2c65   : > { %6516 = vrsqrt.f32 %v5125_v10  ;;  %v5124_v13 = vmul.f32 0.03125, %v5122_v11 }
0x2c67   : > { %v5126_v54 = vadd.f32 1e-05, %v5124_v13 }
0x2c69   : > { %6518 = vrsqrt.f32 %v5126_v54 }
0x2c6f   : > { %v6517_v51 = vpop.eup %6516 }
0x2c70   : > { %v5129_v3 = vmul.f32 %v6517_v51, %v5113_v39 }
0x2c72   : > { %v5137_v18 = vmul.f32 %v5641_v20, %v5129_v3 }
0x2c73   : > { %v6519_v44 = vpop.eup %6518 }
0x2c74   : > { %v5145_v47 = vadd.f32 %v5642_v14, %v5137_v18  ;;  %v5130_v60 = vmul.f32 %v6519_v44, %v5114_v50 }
0x2c76   : > { %5147 = vst.msk [vmem:[#allocation22] sm:$0xff] %vm1366_vm2, %v5145_v47  ;;  %v5138_v27 = vmul.f32 %v5641_v20, %v5130_v60 }
0x2c78   : > { %v5146_v22 = vadd.f32 %v5642_v14, %v5138_v27 }
0x2c7a   : > { %5148 = vst.msk [vmem:[#allocation22 + $0x8] sm:$0xff] %vm1366_vm2, %v5146_v22 }
0x2c7b PF: > { %s8784_s10 = sld [smem:[#allocation29_spill]]  ;;  %s7072_s11 = smov [#allocation22]  }
0x2c7c   : > { %s5155_s24 = sshll.u32 %s7072_s11, 4  ;;  %s5156_s24 = int_to_ptr.vmem [resolvable:$true] %s5155_s24 }
0x2c7d   : > { %s6966_s27 = scalar_lea.vmem %s5156_s24, 256  ;;  %p6973_p8 = scmp.lt.s32.totalorder %s5156_s24, %s5156_s24 }
0x2c7e   : > { %p6967_p9 = scmp.ne.s32.totalorder %s5156_s24, %s6966_s27  ;;  %p6974_p13 = scmp.lt.s32.totalorder %s6966_s27, %s6966_s27 }
0x2c80   : > { %p6975_p10 = por %p6974_p13, %p6973_p8 }
0x2c81   : > { %p6282_p6 = scmp.eq.s32.totalorder %s8784_s10, 1 }
0x2c83   : > { %p6968_p12 = pnand %p6967_p9, %p6282_p6 }
0x2c85   : > { %p6969_p1 = pneg %p6968_p12 }
0x2c87   : > { %p6976_p4 = pnand %p6975_p10, %p6969_p1 }
0x2c89   : > { %6979 = shalt.err (!%p6976_p4)
}
0x2c8a   : > { %s8785_s1 = sld [smem:[#allocation56_spill]] }
0x2c90   : > { %s6980_s22 = scalar_lea.hbm %s8785_s1, 256 }
0x2c91   : > { %p6981_p2 = scmp.ne.s32.totalorder %s8785_s1, %s6980_s22  ;;  %p6986_p7 = scmp.lt.u32.totalorder %s6980_s22, %s8785_s1 }
0x2c93   : > { %p6982_p5 = pnand %p6981_p2, %p6282_p6 }
0x2c95   : > { %p6983_p11 = pneg %p6982_p5 }
0x2c97   : > { %p6988_p3 = pnand %p6986_p7, %p6983_p11 }
0x2c99   : > { %6991 = shalt.err (!%p6988_p3)
}
0x2c9a   : > { %s7073_s3 = smov 128  }
0x2c9b   : > { %6227 = dma.vmem_to_hbm [thread:$0]  (%p6282_p6), %s5156_s24, 256, %s8785_s1, [#allocation6], %s7073_s3, %s7073_s3, %s7069_s13  }
0x2c9c   : > { %7021 = dma.done.wait (%p6282_p6), [#allocation6], 256  }
0x2c9d   : > { %7023 = vsyncadd (%p6282_p6), [#allocation6], 4294967040 }
0x2c9e PF: > { %s8786_s30 = sld [smem:[#allocation30_spill]]  ;;  %s8787_s29 = sld [smem:[#allocation27_spill]] }
0x2c9f   : > { %s8788_s2 = sld [smem:[#allocation28_spill]]  ;;  %s8789_s6 = sld [smem:[#allocation31_spill]] }
0x2ca4   : > { %p35_p0 = scmp.ge.s32.totalorder %s8786_s30, 4  }
0x2ca6   :  { %37 = sbr.rel (!%p35_p0) target bundleno = 28 (0x1c), region = 319 }
0x2cad   :  { %5171 = vsyncpa [#allocation5], 1 }
0x2cae   :  { %5173 = vsyncpa [#allocation5 + $0x1], 1 }
0x2caf   :  { %5174 = vsyncpa [#allocation8], 1 }
0x2cb0   :  { %5175 = vsyncpa [#allocation6], 1 }
0x2cb1   :  { %5177 = vsyncpa [#allocation6 + $0x1], 1 }

</bundles_post_ra>
